<compile_context>
chip_gen: v5e
topology: v5e:2x2
jax: 0.10.0
libtpu: 0.0.40
codegen_flags: <defaults>
</compile_context>

<pallas_src>
import numpy as np
import jax
import jax.numpy as jnp
from jax.experimental import pallas as pl
from jax.experimental.pallas import tpu as pltpu

NUM_JOINTS = 16
NUM_BONES = 15          # num_joints - 1
KCS_CH = 256            # kcs_channel
CH_MID = 100            # channel_mid
POSE_IN = NUM_JOINTS * 2
KCS_PAD = 256           # 15*15 = 225 Psi features zero-padded to 256 lanes
MID_PAD = 128           # 100-wide layers zero-padded to 128 lanes

# TODO(synk): get_BoneVecbypose3d's source was not provided; skeleton reconstructed from
# the standard H36M 16-joint tree (bone = child joint - parent joint).
_BONES = [(0, 1), (1, 2), (2, 3), (0, 4), (4, 5), (5, 6), (0, 7), (7, 8),
          (8, 9), (8, 10), (10, 11), (11, 12), (8, 13), (13, 14), (14, 15)]
_PARENTS = np.array([p for p, _ in _BONES], dtype=np.int32)
_CHILDREN = np.array([c for _, c in _BONES], dtype=np.int32)


def _build_psi_selector():
    """Constant (32, 4*KCS_PAD) matrix M such that, for x_flat (B, 32),
         y = x_flat @ M = [bvx_rep | bvx_tile | bvy_rep | bvy_tile]  (each KCS_PAD wide)
       and Psi.view(B, 225) (zero-padded to 256 lanes) ==
         y[:, 0:256]*y[:, 256:512] + y[:, 512:768]*y[:, 768:1024].
       (The hb_idx mask in kcs_layer_hb_2d keeps all 15 bones -> identity, omitted.)
       Entries are exactly 0 / +-1, so a bf16 cast of M is lossless."""
    D = np.zeros((POSE_IN, NUM_BONES, 2), np.float32)        # x_flat -> bone vectors
    for k, (p, c) in enumerate(_BONES):
        for coord in range(2):
            D[2 * c + coord, k, coord] += 1.0
            D[2 * p + coord, k, coord] -= 1.0
    rep = np.zeros((NUM_BONES, NUM_BONES * NUM_BONES), np.float32)   # col i -> 15*i + j
    til = np.zeros((NUM_BONES, NUM_BONES * NUM_BONES), np.float32)   # col j -> 15*i + j
    for i in range(NUM_BONES):
        for j in range(NUM_BONES):
            rep[i, NUM_BONES * i + j] = 1.0
            til[j, NUM_BONES * i + j] = 1.0
    pad = ((0, 0), (0, KCS_PAD - NUM_BONES * NUM_BONES))
    blocks = [np.pad(D[:, :, 0] @ rep, pad), np.pad(D[:, :, 0] @ til, pad),
              np.pad(D[:, :, 1] @ rep, pad), np.pad(D[:, :, 1] @ til, pad)]
    return np.concatenate(blocks, axis=1)                    # (32, 1024)


_PSI_SEL = _build_psi_selector()


def _disc_kernel(x_ref, w0_ref, bp1_ref,
                 wk1, bk1, wk2, bk2, wk3, bk3, wkl, bkl,
                 wp2, bp2, wp3, bp3, wp4, bp4, wpl, bpl,
                 wq1, bq1, wq2, bq2,
                 o_ref):
    bf16 = jnp.bfloat16

    def dense(a_bf, w_ref, b_ref=None):
        # bf16 x bf16 on the MXU with f32 accumulation; bias add stays f32.
        y = jnp.dot(a_bf, w_ref[...], preferred_element_type=jnp.float32)
        if b_ref is not None:
            y = y + b_ref[...]
        return y                                              # f32

    def act(y):
        # nn.LeakyReLU() default negative_slope = 0.01, computed in f32;
        # cast to bf16 exactly once here (next-layer matmul operand).
        return jnp.where(y > 0, y, 0.01 * y).astype(bf16)

    x_bf = x_ref[...].astype(bf16)                            # (tb, 32) -- cast once

    # --- fused selector + pose_layer_1: one K=32 bf16 matmul --------------------------
    y0 = jnp.dot(x_bf, w0_ref[...], preferred_element_type=jnp.float32)   # (tb, 1152)
    psi = (y0[:, 0 * KCS_PAD:1 * KCS_PAD] * y0[:, 1 * KCS_PAD:2 * KCS_PAD]
           + y0[:, 2 * KCS_PAD:3 * KCS_PAD] * y0[:, 3 * KCS_PAD:4 * KCS_PAD])  # (tb,256)

    # --- KCSpath2d --------------------------------------------------------------------
    p1 = act(dense(psi.astype(bf16), wk1, bk1))               # (tb, 256) bf16
    p2 = act(dense(p1, wk2, bk2))
    p3 = dense(p2, wk3, bk3) + p1                             # residual, no relu (f32)
    k_hb = act(dense(p3.astype(bf16), wkl, bkl))              # (tb, 128) bf16

    # --- pose path (pose_layer_1 pre-activation came out of the fused matmul) ----------
    d1 = act(y0[:, 4 * KCS_PAD:] + bp1_ref[...])              # (tb, 128) bf16
    d2 = act(dense(d1, wp2, bp2))
    d3 = act(dense(d2, wp3, bp3) + d1)                        # residual + relu
    d4 = dense(d3, wp4, bp4)                                  # no relu
    d_last = act(dense(d4.astype(bf16), wpl, bpl))            # (tb, 128) bf16

    # --- prediction head: Linear(200,100) over cat((k_hb, d_last)) as ONE K=256 matmul -
    h = act(dense(jnp.concatenate([k_hb, d_last], axis=-1), wq1, bq1))    # (tb, 128)

    # final Linear(100,1), lane-dense: out[0, b] = sum_k wq2[0, k] * h[b, k] + bq2
    out_row = jax.lax.dot_general(wq2[...], h, (((1,), (1,)), ((), ())),
                                  preferred_element_type=jnp.float32)     # (1, tb)
    o_ref[...] = out_row + bq2[...]


def init_params(key):
    """Deterministic PyTorch-style Linear init: U(-1/sqrt(fan_in), 1/sqrt(fan_in)).
    Weights stored transposed as (fan_in, fan_out) so the kernel does x @ W."""
    def linear(k, fan_in, fan_out):
        kw, kb = jax.random.split(k)
        bound = 1.0 / np.sqrt(fan_in)
        w = jax.random.uniform(kw, (fan_in, fan_out), jnp.float32, -bound, bound)
        b = jax.random.uniform(kb, (1, fan_out), jnp.float32, -bound, bound)
        return w, b

    keys = jax.random.split(key, 11)
    return {
        "kcs1": linear(keys[0], NUM_BONES * NUM_BONES, KCS_CH),
        "kcs2": linear(keys[1], KCS_CH, KCS_CH),
        "kcs3": linear(keys[2], KCS_CH, KCS_CH),
        "kcsl": linear(keys[3], KCS_CH, CH_MID),
        "pose1": linear(keys[4], POSE_IN, 100),
        "pose2": linear(keys[5], 100, 100),
        "pose3": linear(keys[6], 100, 100),
        "pose4": linear(keys[7], 100, 100),
        "posel": linear(keys[8], 100, 100),
        "pred1": linear(keys[9], 2 * CH_MID, 100),
        "pred2": linear(keys[10], 100, 1),
    }


def _pack_params(params):
    """Zero-pad ragged dims (225->256, 100->128), cast matmul operands to bf16
    (biases stay f32), fuse selector+pose1, and re-lay layer_pred1 for the lane concat."""
    bf16, f32 = jnp.bfloat16, jnp.float32

    def wpad(w, rows, cols, dtype):
        r, c = w.shape
        return jnp.pad(w, ((0, rows - r), (0, cols - c))).astype(dtype)

    wk1, bk1 = params["kcs1"]; wk2, bk2 = params["kcs2"]
    wk3, bk3 = params["kcs3"]; wkl, bkl = params["kcsl"]
    wp1, bp1 = params["pose1"]; wp2, bp2 = params["pose2"]
    wp3, bp3 = params["pose3"]; wp4, bp4 = params["pose4"]
    wpl, bpl = params["posel"]
    wq1, bq1 = params["pred1"]; wq2, bq2 = params["pred2"]

    # Fused first weight: [selector (32, 1024) | pose_layer_1 (32, 100 -> 128)], bf16.
    w0 = jnp.concatenate(
        [jnp.asarray(_PSI_SEL), wpad(wp1, POSE_IN, MID_PAD, f32)], axis=1).astype(bf16)

    # layer_pred1 weight re-laid out for cat((k_hb, d_last)) in 128-lane halves:
    # rows [0:100] multiply k_hb lanes, rows [128:228] multiply d_last lanes.
    wq1_packed = jnp.zeros((2 * MID_PAD, MID_PAD), f32)
    wq1_packed = wq1_packed.at[:CH_MID, :CH_MID].set(wq1[:CH_MID])
    wq1_packed = wq1_packed.at[MID_PAD:MID_PAD + CH_MID, :CH_MID].set(wq1[CH_MID:])

    return [
        w0,
        wpad(bp1, 1, MID_PAD, f32),
        wpad(wk1, KCS_PAD, KCS_CH, bf16), wpad(bk1, 1, KCS_CH, f32),
        wpad(wk2, KCS_CH, KCS_CH, bf16), wpad(bk2, 1, KCS_CH, f32),
        wpad(wk3, KCS_CH, KCS_CH, bf16), wpad(bk3, 1, KCS_CH, f32),
        wpad(wkl, KCS_CH, MID_PAD, bf16), wpad(bkl, 1, MID_PAD, f32),
        wpad(wp2, MID_PAD, MID_PAD, bf16), wpad(bp2, 1, MID_PAD, f32),
        wpad(wp3, MID_PAD, MID_PAD, bf16), wpad(bp3, 1, MID_PAD, f32),
        wpad(wp4, MID_PAD, MID_PAD, bf16), wpad(bp4, 1, MID_PAD, f32),
        wpad(wpl, MID_PAD, MID_PAD, bf16), wpad(bpl, 1, MID_PAD, f32),
        wq1_packed.astype(bf16), wpad(bq1, 1, MID_PAD, f32),
        wpad(wq2.T, 1, MID_PAD, bf16),    # (1, 128) final-layer row, bf16 single-pass
        bq2.astype(f32),                   # (1, 1)
    ]


def pos2d_discriminator_kcs(inputs_2d, params, tb=None):
    # torch .squeeze() intent: drop the singleton dim(s) around (B, 16, 2); reshape also
    # handles B == 1 safely (keeps the batch axis).
    x = jnp.asarray(inputs_2d, jnp.float32).reshape(-1, NUM_JOINTS, 2)
    B = x.shape[0]
    x_flat = x.reshape(B, POSE_IN)                                   # (B, 32)

    if tb is None:
        # >= 2 grid steps whenever B > 128 (keeps both v7x TensorCores busy under
        # "parallel"), capped at 512 to amortize per-step overhead, floored at 128 for
        # lane-dense output rows; don't over-pad tiny batches.
        tb = max(128, min(512, 128 * pl.cdiv(pl.cdiv(B, 2), 128)))
    else:
        assert tb % 128 == 0, "tb must be a multiple of 128 (lane-dense output rows)"
        tb = min(tb, max(128, 128 * pl.cdiv(B, 128)))
    grid_n = pl.cdiv(B, tb)
    Bp = grid_n * tb
    if Bp != B:
        x_flat = jnp.pad(x_flat, ((0, Bp - B), (0, 0)))

    packed = _pack_params(params)

    flops = 2 * Bp * (POSE_IN * (4 * KCS_PAD + MID_PAD)      # fused selector + pose1
                      + 3 * KCS_CH * KCS_CH                  # kcs layers 1-3
                      + KCS_CH * MID_PAD                     # kcs layer_last
                      + 4 * MID_PAD * MID_PAD                # pose 2-4 + layer_last
                      + 2 * MID_PAD * MID_PAD                # pred1 (K=256)
                      + MID_PAD)                             # pred2
    bytes_accessed = (x_flat.size * 4 + Bp * 4
                      + sum(int(p.size) * p.dtype.itemsize for p in packed))

    const_spec = lambda a: pl.BlockSpec(a.shape, lambda i: (0, 0))

    out = pl.pallas_call(
        _disc_kernel,
        out_shape=jax.ShapeDtypeStruct((1, Bp), jnp.float32),
        grid=(grid_n,),
        in_specs=[pl.BlockSpec((tb, POSE_IN), lambda i: (i, 0))]
                 + [const_spec(a) for a in packed],
        out_specs=pl.BlockSpec((1, tb), lambda i: (0, i)),
        compiler_params=pltpu.CompilerParams(dimension_semantics=("parallel",)),
        cost_estimate=pl.CostEstimate(flops=flops, transcendentals=0,
                                      bytes_accessed=bytes_accessed),
    )(x_flat, *packed)

    return out[0, :B].reshape(B, 1)


def _reference_forward(inputs_2d, params):
    """Plain-JAX f32 reference matching the PyTorch module (same reconstructed skeleton)."""
    x = jnp.asarray(inputs_2d, jnp.float32).reshape(-1, NUM_JOINTS, 2)
    B = x.shape[0]
    bv = x[:, _CHILDREN, :] - x[:, _PARENTS, :]                      # (B, 15, 2)
    psi = jnp.einsum("bik,bjk->bij", bv, bv).reshape(B, NUM_BONES * NUM_BONES)
    xf = x.reshape(B, POSE_IN)
    lrelu = lambda v: jnp.where(v > 0, v, 0.01 * v)
    lin = lambda a, p: a @ p[0] + p[1]
    p1 = lrelu(lin(psi, params["kcs1"]))
    p2 = lrelu(lin(p1, params["kcs2"]))
    p3 = lin(p2, params["kcs3"]) + p1
    k_hb = lrelu(lin(p3, params["kcsl"]))
    d1 = lrelu(lin(xf, params["pose1"]))
    d2 = lrelu(lin(d1, params["pose2"]))
    d3 = lrelu(lin(d2, params["pose3"]) + d1)
    d4 = lin(d3, params["pose4"])
    d_last = lrelu(lin(d4, params["posel"]))
    h = lrelu(lin(jnp.concatenate([k_hb, d_last], axis=-1), params["pred1"]))
    return lin(h, params["pred2"])


if __name__ == "__main__":
    key = jax.random.PRNGKey(0)
    k_in, k_par = jax.random.split(key)

    # Small batch (padded to the 128-row minimum tile inside the wrapper; also exercises
    # the batch-padding path).
    B = 4
    inputs_2d = jax.random.normal(k_in, (B, 1, NUM_JOINTS, 2), dtype=jnp.float32)
    params = init_params(k_par)

    out = jax.block_until_ready(pos2d_discriminator_kcs(inputs_2d, params))
    assert out.shape == (B, 1) and out.dtype == jnp.float32

    # Sanity check vs. the plain-JAX f32 reference (bf16 weights/activations with f32
    # accumulation => intentionally loose tolerance).
    ref = jax.block_until_ready(_reference_forward(inputs_2d, params))
    err = float(jnp.max(jnp.abs(out - ref)))
    scale = float(jnp.max(jnp.abs(ref)))
    assert err <= 6e-2 * (1.0 + scale), (err, scale)

    print("KERNEL_OK")
</pallas_src>

<mosaic_0001>
module attributes {stable_mosaic.version = 11 : i64} {
  func.func @_disc_kernel(%arg0: i32, %arg1: memref<128x32xf32, #tpu.memory_space<vmem>>, %arg2: memref<32x1152xbf16, #tpu.memory_space<vmem>>, %arg3: memref<1x128xf32, #tpu.memory_space<vmem>>, %arg4: memref<256x256xbf16, #tpu.memory_space<vmem>>, %arg5: memref<1x256xf32, #tpu.memory_space<vmem>>, %arg6: memref<256x256xbf16, #tpu.memory_space<vmem>>, %arg7: memref<1x256xf32, #tpu.memory_space<vmem>>, %arg8: memref<256x256xbf16, #tpu.memory_space<vmem>>, %arg9: memref<1x256xf32, #tpu.memory_space<vmem>>, %arg10: memref<256x128xbf16, #tpu.memory_space<vmem>>, %arg11: memref<1x128xf32, #tpu.memory_space<vmem>>, %arg12: memref<128x128xbf16, #tpu.memory_space<vmem>>, %arg13: memref<1x128xf32, #tpu.memory_space<vmem>>, %arg14: memref<128x128xbf16, #tpu.memory_space<vmem>>, %arg15: memref<1x128xf32, #tpu.memory_space<vmem>>, %arg16: memref<128x128xbf16, #tpu.memory_space<vmem>>, %arg17: memref<1x128xf32, #tpu.memory_space<vmem>>, %arg18: memref<128x128xbf16, #tpu.memory_space<vmem>>, %arg19: memref<1x128xf32, #tpu.memory_space<vmem>>, %arg20: memref<256x128xbf16, #tpu.memory_space<vmem>>, %arg21: memref<1x128xf32, #tpu.memory_space<vmem>>, %arg22: memref<1x128xbf16, #tpu.memory_space<vmem>>, %arg23: memref<1x1xf32, #tpu.memory_space<vmem>>, %arg24: memref<1x128xf32, #tpu.memory_space<vmem>>) attributes {dimension_semantics = [#tpu.dimension_semantics<parallel>], iteration_bounds = array<i64: 1>, scalar_prefetch = 0 : i64, scratch_operands = 0 : i64, tpu.core_type = #tpu.core_type<tc>, window_params = [{transform_indices = @transform_0, window_bounds = array<i64: 128, 32>}, {pipeline_mode = #tpu.pipeline_mode<synchronous>, transform_indices = @transform_1, window_bounds = array<i64: 32, 1152>}, {pipeline_mode = #tpu.pipeline_mode<synchronous>, transform_indices = @transform_2, window_bounds = array<i64: 1, 128>}, {pipeline_mode = #tpu.pipeline_mode<synchronous>, transform_indices = @transform_3, window_bounds = array<i64: 256, 256>}, {pipeline_mode = #tpu.pipeline_mode<synchronous>, transform_indices = @transform_4, window_bounds = array<i64: 1, 256>}, {pipeline_mode = #tpu.pipeline_mode<synchronous>, transform_indices = @transform_5, window_bounds = array<i64: 256, 256>}, {pipeline_mode = #tpu.pipeline_mode<synchronous>, transform_indices = @transform_6, window_bounds = array<i64: 1, 256>}, {pipeline_mode = #tpu.pipeline_mode<synchronous>, transform_indices = @transform_7, window_bounds = array<i64: 256, 256>}, {pipeline_mode = #tpu.pipeline_mode<synchronous>, transform_indices = @transform_8, window_bounds = array<i64: 1, 256>}, {pipeline_mode = #tpu.pipeline_mode<synchronous>, transform_indices = @transform_9, window_bounds = array<i64: 256, 128>}, {pipeline_mode = #tpu.pipeline_mode<synchronous>, transform_indices = @transform_10, window_bounds = array<i64: 1, 128>}, {pipeline_mode = #tpu.pipeline_mode<synchronous>, transform_indices = @transform_11, window_bounds = array<i64: 128, 128>}, {pipeline_mode = #tpu.pipeline_mode<synchronous>, transform_indices = @transform_12, window_bounds = array<i64: 1, 128>}, {pipeline_mode = #tpu.pipeline_mode<synchronous>, transform_indices = @transform_13, window_bounds = array<i64: 128, 128>}, {pipeline_mode = #tpu.pipeline_mode<synchronous>, transform_indices = @transform_14, window_bounds = array<i64: 1, 128>}, {pipeline_mode = #tpu.pipeline_mode<synchronous>, transform_indices = @transform_15, window_bounds = array<i64: 128, 128>}, {pipeline_mode = #tpu.pipeline_mode<synchronous>, transform_indices = @transform_16, window_bounds = array<i64: 1, 128>}, {pipeline_mode = #tpu.pipeline_mode<synchronous>, transform_indices = @transform_17, window_bounds = array<i64: 128, 128>}, {pipeline_mode = #tpu.pipeline_mode<synchronous>, transform_indices = @transform_18, window_bounds = array<i64: 1, 128>}, {pipeline_mode = #tpu.pipeline_mode<synchronous>, transform_indices = @transform_19, window_bounds = array<i64: 256, 128>}, {pipeline_mode = #tpu.pipeline_mode<synchronous>, transform_indices = @transform_20, window_bounds = array<i64: 1, 128>}, {pipeline_mode = #tpu.pipeline_mode<synchronous>, transform_indices = @transform_21, window_bounds = array<i64: 1, 128>}, {pipeline_mode = #tpu.pipeline_mode<synchronous>, transform_indices = @transform_22, window_bounds = array<i64: 1, 1>}, {transform_indices = @transform_23, window_bounds = array<i64: 1, 128>}]} {
    %c0 = arith.constant 0 : index
    %c0_0 = arith.constant 0 : index
    %0 = vector.load %arg1[%c0, %c0_0] : memref<128x32xf32, #tpu.memory_space<vmem>>, vector<128x32xf32>
    %1 = arith.truncf %0 : vector<128x32xf32> to vector<128x32xbf16>
    %c0_1 = arith.constant 0 : index
    %c0_2 = arith.constant 0 : index
    %2 = vector.load %arg2[%c0_1, %c0_2] : memref<32x1152xbf16, #tpu.memory_space<vmem>>, vector<32x1152xbf16>
    %cst = arith.constant dense<0.000000e+00> : vector<128x1152xf32>
    %3 = tpu.matmul %1, %2, %cst {dimension_numbers = #tpu.dot_dimension_numbers<[1], [0], [0], [1], [0, 0, 1, 1], [], []>} : vector<128x32xbf16>, vector<32x1152xbf16>, vector<128x1152xf32> -> vector<128x1152xf32>
    %4 = vector.extract_strided_slice %3 {offsets = [0, 0], sizes = [128, 256], strides = [1, 1]} : vector<128x1152xf32> to vector<128x256xf32>
    %5 = vector.extract_strided_slice %3 {offsets = [0, 256], sizes = [128, 256], strides = [1, 1]} : vector<128x1152xf32> to vector<128x256xf32>
    %6 = arith.mulf %4, %5 : vector<128x256xf32>
    %7 = vector.extract_strided_slice %3 {offsets = [0, 512], sizes = [128, 256], strides = [1, 1]} : vector<128x1152xf32> to vector<128x256xf32>
    %8 = vector.extract_strided_slice %3 {offsets = [0, 768], sizes = [128, 256], strides = [1, 1]} : vector<128x1152xf32> to vector<128x256xf32>
    %9 = arith.mulf %7, %8 : vector<128x256xf32>
    %10 = arith.addf %6, %9 : vector<128x256xf32>
    %11 = arith.truncf %10 : vector<128x256xf32> to vector<128x256xbf16>
    %c0_3 = arith.constant 0 : index
    %c0_4 = arith.constant 0 : index
    %12 = vector.load %arg4[%c0_3, %c0_4] : memref<256x256xbf16, #tpu.memory_space<vmem>>, vector<256x256xbf16>
    %cst_5 = arith.constant dense<0.000000e+00> : vector<128x256xf32>
    %13 = tpu.matmul %11, %12, %cst_5 {dimension_numbers = #tpu.dot_dimension_numbers<[1], [0], [0], [1], [0, 0, 1, 1], [], []>} : vector<128x256xbf16>, vector<256x256xbf16>, vector<128x256xf32> -> vector<128x256xf32>
    %c0_6 = arith.constant 0 : index
    %c0_7 = arith.constant 0 : index
    %14 = vector.load %arg5[%c0_6, %c0_7] : memref<1x256xf32, #tpu.memory_space<vmem>>, vector<1x256xf32>
    %15 = vector.broadcast %14 : vector<1x256xf32> to vector<128x256xf32>
    %16 = arith.addf %13, %15 : vector<128x256xf32>
    %cst_8 = arith.constant 0.000000e+00 : f32
    %17 = vector.broadcast %cst_8 : f32 to vector<128x256xf32>
    %18 = arith.cmpf ogt, %16, %17 : vector<128x256xf32>
    %cst_9 = arith.constant 0.00999999977 : f32
    %19 = vector.broadcast %cst_9 : f32 to vector<128x256xf32>
    %20 = arith.mulf %19, %16 : vector<128x256xf32>
    %21 = arith.select %18, %16, %20 : vector<128x256xi1>, vector<128x256xf32>
    %22 = arith.truncf %21 : vector<128x256xf32> to vector<128x256xbf16>
    %c0_10 = arith.constant 0 : index
    %c0_11 = arith.constant 0 : index
    %23 = vector.load %arg6[%c0_10, %c0_11] : memref<256x256xbf16, #tpu.memory_space<vmem>>, vector<256x256xbf16>
    %cst_12 = arith.constant dense<0.000000e+00> : vector<128x256xf32>
    %24 = tpu.matmul %22, %23, %cst_12 {dimension_numbers = #tpu.dot_dimension_numbers<[1], [0], [0], [1], [0, 0, 1, 1], [], []>} : vector<128x256xbf16>, vector<256x256xbf16>, vector<128x256xf32> -> vector<128x256xf32>
    %c0_13 = arith.constant 0 : index
    %c0_14 = arith.constant 0 : index
    %25 = vector.load %arg7[%c0_13, %c0_14] : memref<1x256xf32, #tpu.memory_space<vmem>>, vector<1x256xf32>
    %26 = vector.broadcast %25 : vector<1x256xf32> to vector<128x256xf32>
    %27 = arith.addf %24, %26 : vector<128x256xf32>
    %cst_15 = arith.constant 0.000000e+00 : f32
    %28 = vector.broadcast %cst_15 : f32 to vector<128x256xf32>
    %29 = arith.cmpf ogt, %27, %28 : vector<128x256xf32>
    %cst_16 = arith.constant 0.00999999977 : f32
    %30 = vector.broadcast %cst_16 : f32 to vector<128x256xf32>
    %31 = arith.mulf %30, %27 : vector<128x256xf32>
    %32 = arith.select %29, %27, %31 : vector<128x256xi1>, vector<128x256xf32>
    %33 = arith.truncf %32 : vector<128x256xf32> to vector<128x256xbf16>
    %c0_17 = arith.constant 0 : index
    %c0_18 = arith.constant 0 : index
    %34 = vector.load %arg8[%c0_17, %c0_18] : memref<256x256xbf16, #tpu.memory_space<vmem>>, vector<256x256xbf16>
    %cst_19 = arith.constant dense<0.000000e+00> : vector<128x256xf32>
    %35 = tpu.matmul %33, %34, %cst_19 {dimension_numbers = #tpu.dot_dimension_numbers<[1], [0], [0], [1], [0, 0, 1, 1], [], []>} : vector<128x256xbf16>, vector<256x256xbf16>, vector<128x256xf32> -> vector<128x256xf32>
    %c0_20 = arith.constant 0 : index
    %c0_21 = arith.constant 0 : index
    %36 = vector.load %arg9[%c0_20, %c0_21] : memref<1x256xf32, #tpu.memory_space<vmem>>, vector<1x256xf32>
    %37 = vector.broadcast %36 : vector<1x256xf32> to vector<128x256xf32>
    %38 = arith.addf %35, %37 : vector<128x256xf32>
    %39 = arith.extf %22 : vector<128x256xbf16> to vector<128x256xf32>
    %40 = arith.addf %38, %39 : vector<128x256xf32>
    %41 = arith.truncf %40 : vector<128x256xf32> to vector<128x256xbf16>
    %c0_22 = arith.constant 0 : index
    %c0_23 = arith.constant 0 : index
    %42 = vector.load %arg10[%c0_22, %c0_23] : memref<256x128xbf16, #tpu.memory_space<vmem>>, vector<256x128xbf16>
    %cst_24 = arith.constant dense<0.000000e+00> : vector<128x128xf32>
    %43 = tpu.matmul %41, %42, %cst_24 {dimension_numbers = #tpu.dot_dimension_numbers<[1], [0], [0], [1], [0, 0, 1, 1], [], []>} : vector<128x256xbf16>, vector<256x128xbf16>, vector<128x128xf32> -> vector<128x128xf32>
    %c0_25 = arith.constant 0 : index
    %c0_26 = arith.constant 0 : index
    %44 = vector.load %arg11[%c0_25, %c0_26] : memref<1x128xf32, #tpu.memory_space<vmem>>, vector<1x128xf32>
    %45 = vector.broadcast %44 : vector<1x128xf32> to vector<128x128xf32>
    %46 = arith.addf %43, %45 : vector<128x128xf32>
    %cst_27 = arith.constant 0.000000e+00 : f32
    %47 = vector.broadcast %cst_27 : f32 to vector<128x128xf32>
    %48 = arith.cmpf ogt, %46, %47 : vector<128x128xf32>
    %cst_28 = arith.constant 0.00999999977 : f32
    %49 = vector.broadcast %cst_28 : f32 to vector<128x128xf32>
    %50 = arith.mulf %49, %46 : vector<128x128xf32>
    %51 = arith.select %48, %46, %50 : vector<128x128xi1>, vector<128x128xf32>
    %52 = arith.truncf %51 : vector<128x128xf32> to vector<128x128xbf16>
    %53 = vector.extract_strided_slice %3 {offsets = [0, 1024], sizes = [128, 128], strides = [1, 1]} : vector<128x1152xf32> to vector<128x128xf32>
    %c0_29 = arith.constant 0 : index
    %c0_30 = arith.constant 0 : index
    %54 = vector.load %arg3[%c0_29, %c0_30] : memref<1x128xf32, #tpu.memory_space<vmem>>, vector<1x128xf32>
    %55 = vector.broadcast %54 : vector<1x128xf32> to vector<128x128xf32>
    %56 = arith.addf %53, %55 : vector<128x128xf32>
    %cst_31 = arith.constant 0.000000e+00 : f32
    %57 = vector.broadcast %cst_31 : f32 to vector<128x128xf32>
    %58 = arith.cmpf ogt, %56, %57 : vector<128x128xf32>
    %cst_32 = arith.constant 0.00999999977 : f32
    %59 = vector.broadcast %cst_32 : f32 to vector<128x128xf32>
    %60 = arith.mulf %59, %56 : vector<128x128xf32>
    %61 = arith.select %58, %56, %60 : vector<128x128xi1>, vector<128x128xf32>
    %62 = arith.truncf %61 : vector<128x128xf32> to vector<128x128xbf16>
    %c0_33 = arith.constant 0 : index
    %c0_34 = arith.constant 0 : index
    %63 = vector.load %arg12[%c0_33, %c0_34] : memref<128x128xbf16, #tpu.memory_space<vmem>>, vector<128x128xbf16>
    %cst_35 = arith.constant dense<0.000000e+00> : vector<128x128xf32>
    %64 = tpu.matmul %62, %63, %cst_35 {dimension_numbers = #tpu.dot_dimension_numbers<[1], [0], [0], [1], [0, 0, 1, 1], [], []>} : vector<128x128xbf16>, vector<128x128xbf16>, vector<128x128xf32> -> vector<128x128xf32>
    %c0_36 = arith.constant 0 : index
    %c0_37 = arith.constant 0 : index
    %65 = vector.load %arg13[%c0_36, %c0_37] : memref<1x128xf32, #tpu.memory_space<vmem>>, vector<1x128xf32>
    %66 = vector.broadcast %65 : vector<1x128xf32> to vector<128x128xf32>
    %67 = arith.addf %64, %66 : vector<128x128xf32>
    %cst_38 = arith.constant 0.000000e+00 : f32
    %68 = vector.broadcast %cst_38 : f32 to vector<128x128xf32>
    %69 = arith.cmpf ogt, %67, %68 : vector<128x128xf32>
    %cst_39 = arith.constant 0.00999999977 : f32
    %70 = vector.broadcast %cst_39 : f32 to vector<128x128xf32>
    %71 = arith.mulf %70, %67 : vector<128x128xf32>
    %72 = arith.select %69, %67, %71 : vector<128x128xi1>, vector<128x128xf32>
    %73 = arith.truncf %72 : vector<128x128xf32> to vector<128x128xbf16>
    %c0_40 = arith.constant 0 : index
    %c0_41 = arith.constant 0 : index
    %74 = vector.load %arg14[%c0_40, %c0_41] : memref<128x128xbf16, #tpu.memory_space<vmem>>, vector<128x128xbf16>
    %cst_42 = arith.constant dense<0.000000e+00> : vector<128x128xf32>
    %75 = tpu.matmul %73, %74, %cst_42 {dimension_numbers = #tpu.dot_dimension_numbers<[1], [0], [0], [1], [0, 0, 1, 1], [], []>} : vector<128x128xbf16>, vector<128x128xbf16>, vector<128x128xf32> -> vector<128x128xf32>
    %c0_43 = arith.constant 0 : index
    %c0_44 = arith.constant 0 : index
    %76 = vector.load %arg15[%c0_43, %c0_44] : memref<1x128xf32, #tpu.memory_space<vmem>>, vector<1x128xf32>
    %77 = vector.broadcast %76 : vector<1x128xf32> to vector<128x128xf32>
    %78 = arith.addf %75, %77 : vector<128x128xf32>
    %79 = arith.extf %62 : vector<128x128xbf16> to vector<128x128xf32>
    %80 = arith.addf %78, %79 : vector<128x128xf32>
    %cst_45 = arith.constant 0.000000e+00 : f32
    %81 = vector.broadcast %cst_45 : f32 to vector<128x128xf32>
    %82 = arith.cmpf ogt, %80, %81 : vector<128x128xf32>
    %cst_46 = arith.constant 0.00999999977 : f32
    %83 = vector.broadcast %cst_46 : f32 to vector<128x128xf32>
    %84 = arith.mulf %83, %80 : vector<128x128xf32>
    %85 = arith.select %82, %80, %84 : vector<128x128xi1>, vector<128x128xf32>
    %86 = arith.truncf %85 : vector<128x128xf32> to vector<128x128xbf16>
    %c0_47 = arith.constant 0 : index
    %c0_48 = arith.constant 0 : index
    %87 = vector.load %arg16[%c0_47, %c0_48] : memref<128x128xbf16, #tpu.memory_space<vmem>>, vector<128x128xbf16>
    %cst_49 = arith.constant dense<0.000000e+00> : vector<128x128xf32>
    %88 = tpu.matmul %86, %87, %cst_49 {dimension_numbers = #tpu.dot_dimension_numbers<[1], [0], [0], [1], [0, 0, 1, 1], [], []>} : vector<128x128xbf16>, vector<128x128xbf16>, vector<128x128xf32> -> vector<128x128xf32>
    %c0_50 = arith.constant 0 : index
    %c0_51 = arith.constant 0 : index
    %89 = vector.load %arg17[%c0_50, %c0_51] : memref<1x128xf32, #tpu.memory_space<vmem>>, vector<1x128xf32>
    %90 = vector.broadcast %89 : vector<1x128xf32> to vector<128x128xf32>
    %91 = arith.addf %88, %90 : vector<128x128xf32>
    %92 = arith.truncf %91 : vector<128x128xf32> to vector<128x128xbf16>
    %c0_52 = arith.constant 0 : index
    %c0_53 = arith.constant 0 : index
    %93 = vector.load %arg18[%c0_52, %c0_53] : memref<128x128xbf16, #tpu.memory_space<vmem>>, vector<128x128xbf16>
    %cst_54 = arith.constant dense<0.000000e+00> : vector<128x128xf32>
    %94 = tpu.matmul %92, %93, %cst_54 {dimension_numbers = #tpu.dot_dimension_numbers<[1], [0], [0], [1], [0, 0, 1, 1], [], []>} : vector<128x128xbf16>, vector<128x128xbf16>, vector<128x128xf32> -> vector<128x128xf32>
    %c0_55 = arith.constant 0 : index
    %c0_56 = arith.constant 0 : index
    %95 = vector.load %arg19[%c0_55, %c0_56] : memref<1x128xf32, #tpu.memory_space<vmem>>, vector<1x128xf32>
    %96 = vector.broadcast %95 : vector<1x128xf32> to vector<128x128xf32>
    %97 = arith.addf %94, %96 : vector<128x128xf32>
    %cst_57 = arith.constant 0.000000e+00 : f32
    %98 = vector.broadcast %cst_57 : f32 to vector<128x128xf32>
    %99 = arith.cmpf ogt, %97, %98 : vector<128x128xf32>
    %cst_58 = arith.constant 0.00999999977 : f32
    %100 = vector.broadcast %cst_58 : f32 to vector<128x128xf32>
    %101 = arith.mulf %100, %97 : vector<128x128xf32>
    %102 = arith.select %99, %97, %101 : vector<128x128xi1>, vector<128x128xf32>
    %103 = arith.truncf %102 : vector<128x128xf32> to vector<128x128xbf16>
    %104 = tpu.concatenate %52, %103 in 1 : vector<128x128xbf16>, vector<128x128xbf16> -> vector<128x256xbf16>
    %c0_59 = arith.constant 0 : index
    %c0_60 = arith.constant 0 : index
    %105 = vector.load %arg20[%c0_59, %c0_60] : memref<256x128xbf16, #tpu.memory_space<vmem>>, vector<256x128xbf16>
    %cst_61 = arith.constant dense<0.000000e+00> : vector<128x128xf32>
    %106 = tpu.matmul %104, %105, %cst_61 {dimension_numbers = #tpu.dot_dimension_numbers<[1], [0], [0], [1], [0, 0, 1, 1], [], []>} : vector<128x256xbf16>, vector<256x128xbf16>, vector<128x128xf32> -> vector<128x128xf32>
    %c0_62 = arith.constant 0 : index
    %c0_63 = arith.constant 0 : index
    %107 = vector.load %arg21[%c0_62, %c0_63] : memref<1x128xf32, #tpu.memory_space<vmem>>, vector<1x128xf32>
    %108 = vector.broadcast %107 : vector<1x128xf32> to vector<128x128xf32>
    %109 = arith.addf %106, %108 : vector<128x128xf32>
    %cst_64 = arith.constant 0.000000e+00 : f32
    %110 = vector.broadcast %cst_64 : f32 to vector<128x128xf32>
    %111 = arith.cmpf ogt, %109, %110 : vector<128x128xf32>
    %cst_65 = arith.constant 0.00999999977 : f32
    %112 = vector.broadcast %cst_65 : f32 to vector<128x128xf32>
    %113 = arith.mulf %112, %109 : vector<128x128xf32>
    %114 = arith.select %111, %109, %113 : vector<128x128xi1>, vector<128x128xf32>
    %115 = arith.truncf %114 : vector<128x128xf32> to vector<128x128xbf16>
    %c0_66 = arith.constant 0 : index
    %c0_67 = arith.constant 0 : index
    %116 = vector.load %arg22[%c0_66, %c0_67] : memref<1x128xbf16, #tpu.memory_space<vmem>>, vector<1x128xbf16>
    %cst_68 = arith.constant dense<0.000000e+00> : vector<1x128xf32>
    %117 = tpu.matmul %116, %115, %cst_68 {dimension_numbers = #tpu.dot_dimension_numbers<[1], [1], [0], [0], [0, 0, 1, 0], [], []>} : vector<1x128xbf16>, vector<128x128xbf16>, vector<1x128xf32> -> vector<1x128xf32>
    %c0_69 = arith.constant 0 : index
    %c0_70 = arith.constant 0 : index
    %118 = vector.load %arg23[%c0_69, %c0_70] : memref<1x1xf32, #tpu.memory_space<vmem>>, vector<1x1xf32>
    %119 = vector.broadcast %118 : vector<1x1xf32> to vector<1x128xf32>
    %120 = arith.addf %117, %119 : vector<1x128xf32>
    %c0_71 = arith.constant 0 : index
    %c0_72 = arith.constant 0 : index
    %121 = vector.load %arg24[%c0_71, %c0_72] : memref<1x128xf32, #tpu.memory_space<vmem>>, vector<1x128xf32>
    tpu.vector_store %arg24[%c0_71, %c0_72], %120 {strides = array<i32>} : memref<1x128xf32, #tpu.memory_space<vmem>>, vector<1x128xf32>,
    return
  }
  func.func @transform_0(%arg0: i32) -> (i32, i32) {
    %c0_i32 = arith.constant 0 : i32
    %c0_i32_0 = arith.constant 0 : i32
    return %arg0, %c0_i32 : i32, i32
  }
  func.func @transform_1(%arg0: i32) -> (i32, i32) {
    %c0_i32 = arith.constant 0 : i32
    %c0_i32_0 = arith.constant 0 : i32
    %c0_i32_1 = arith.constant 0 : i32
    return %c0_i32, %c0_i32_0 : i32, i32
  }
  func.func @transform_2(%arg0: i32) -> (i32, i32) {
    %c0_i32 = arith.constant 0 : i32
    %c0_i32_0 = arith.constant 0 : i32
    %c0_i32_1 = arith.constant 0 : i32
    return %c0_i32, %c0_i32_0 : i32, i32
  }
  func.func @transform_3(%arg0: i32) -> (i32, i32) {
    %c0_i32 = arith.constant 0 : i32
    %c0_i32_0 = arith.constant 0 : i32
    %c0_i32_1 = arith.constant 0 : i32
    return %c0_i32, %c0_i32_0 : i32, i32
  }
  func.func @transform_4(%arg0: i32) -> (i32, i32) {
    %c0_i32 = arith.constant 0 : i32
    %c0_i32_0 = arith.constant 0 : i32
    %c0_i32_1 = arith.constant 0 : i32
    return %c0_i32, %c0_i32_0 : i32, i32
  }
  func.func @transform_5(%arg0: i32) -> (i32, i32) {
    %c0_i32 = arith.constant 0 : i32
    %c0_i32_0 = arith.constant 0 : i32
    %c0_i32_1 = arith.constant 0 : i32
    return %c0_i32, %c0_i32_0 : i32, i32
  }
  func.func @transform_6(%arg0: i32) -> (i32, i32) {
    %c0_i32 = arith.constant 0 : i32
    %c0_i32_0 = arith.constant 0 : i32
    %c0_i32_1 = arith.constant 0 : i32
    return %c0_i32, %c0_i32_0 : i32, i32
  }
  func.func @transform_7(%arg0: i32) -> (i32, i32) {
    %c0_i32 = arith.constant 0 : i32
    %c0_i32_0 = arith.constant 0 : i32
    %c0_i32_1 = arith.constant 0 : i32
    return %c0_i32, %c0_i32_0 : i32, i32
  }
  func.func @transform_8(%arg0: i32) -> (i32, i32) {
    %c0_i32 = arith.constant 0 : i32
    %c0_i32_0 = arith.constant 0 : i32
    %c0_i32_1 = arith.constant 0 : i32
    return %c0_i32, %c0_i32_0 : i32, i32
  }
  func.func @transform_9(%arg0: i32) -> (i32, i32) {
    %c0_i32 = arith.constant 0 : i32
    %c0_i32_0 = arith.constant 0 : i32
    %c0_i32_1 = arith.constant 0 : i32
    return %c0_i32, %c0_i32_0 : i32, i32
  }
  func.func @transform_10(%arg0: i32) -> (i32, i32) {
    %c0_i32 = arith.constant 0 : i32
    %c0_i32_0 = arith.constant 0 : i32
    %c0_i32_1 = arith.constant 0 : i32
    return %c0_i32, %c0_i32_0 : i32, i32
  }
  func.func @transform_11(%arg0: i32) -> (i32, i32) {
    %c0_i32 = arith.constant 0 : i32
    %c0_i32_0 = arith.constant 0 : i32
    %c0_i32_1 = arith.constant 0 : i32
    return %c0_i32, %c0_i32_0 : i32, i32
  }
  func.func @transform_12(%arg0: i32) -> (i32, i32) {
    %c0_i32 = arith.constant 0 : i32
    %c0_i32_0 = arith.constant 0 : i32
    %c0_i32_1 = arith.constant 0 : i32
    return %c0_i32, %c0_i32_0 : i32, i32
  }
  func.func @transform_13(%arg0: i32) -> (i32, i32) {
    %c0_i32 = arith.constant 0 : i32
    %c0_i32_0 = arith.constant 0 : i32
    %c0_i32_1 = arith.constant 0 : i32
    return %c0_i32, %c0_i32_0 : i32, i32
  }
  func.func @transform_14(%arg0: i32) -> (i32, i32) {
    %c0_i32 = arith.constant 0 : i32
    %c0_i32_0 = arith.constant 0 : i32
    %c0_i32_1 = arith.constant 0 : i32
    return %c0_i32, %c0_i32_0 : i32, i32
  }
  func.func @transform_15(%arg0: i32) -> (i32, i32) {
    %c0_i32 = arith.constant 0 : i32
    %c0_i32_0 = arith.constant 0 : i32
    %c0_i32_1 = arith.constant 0 : i32
    return %c0_i32, %c0_i32_0 : i32, i32
  }
  func.func @transform_16(%arg0: i32) -> (i32, i32) {
    %c0_i32 = arith.constant 0 : i32
    %c0_i32_0 = arith.constant 0 : i32
    %c0_i32_1 = arith.constant 0 : i32
    return %c0_i32, %c0_i32_0 : i32, i32
  }
  func.func @transform_17(%arg0: i32) -> (i32, i32) {
    %c0_i32 = arith.constant 0 : i32
    %c0_i32_0 = arith.constant 0 : i32
    %c0_i32_1 = arith.constant 0 : i32
    return %c0_i32, %c0_i32_0 : i32, i32
  }
  func.func @transform_18(%arg0: i32) -> (i32, i32) {
    %c0_i32 = arith.constant 0 : i32
    %c0_i32_0 = arith.constant 0 : i32
    %c0_i32_1 = arith.constant 0 : i32
    return %c0_i32, %c0_i32_0 : i32, i32
  }
  func.func @transform_19(%arg0: i32) -> (i32, i32) {
    %c0_i32 = arith.constant 0 : i32
    %c0_i32_0 = arith.constant 0 : i32
    %c0_i32_1 = arith.constant 0 : i32
    return %c0_i32, %c0_i32_0 : i32, i32
  }
  func.func @transform_20(%arg0: i32) -> (i32, i32) {
    %c0_i32 = arith.constant 0 : i32
    %c0_i32_0 = arith.constant 0 : i32
    %c0_i32_1 = arith.constant 0 : i32
    return %c0_i32, %c0_i32_0 : i32, i32
  }
  func.func @transform_21(%arg0: i32) -> (i32, i32) {
    %c0_i32 = arith.constant 0 : i32
    %c0_i32_0 = arith.constant 0 : i32
    %c0_i32_1 = arith.constant 0 : i32
    return %c0_i32, %c0_i32_0 : i32, i32
  }
  func.func @transform_22(%arg0: i32) -> (i32, i32) {
    %c0_i32 = arith.constant 0 : i32
    %c0_i32_0 = arith.constant 0 : i32
    %c0_i32_1 = arith.constant 0 : i32
    return %c0_i32, %c0_i32_0 : i32, i32
  }
  func.func @transform_23(%arg0: i32) -> (i32, i32) {
    %c0_i32 = arith.constant 0 : i32
    %c0_i32_0 = arith.constant 0 : i32
    return %c0_i32, %arg0 : i32, i32
  }
}

</mosaic_0001>

<bundles_post_ra>
// kernel: tpu_custom_call.1
= control target key start
LH: loop header
LB: loop body
LE: loop exit
PB: predicated region body
PF: predicated region fallthrough
CT: control target
= control target key end

     0   :  { %s6487_s0 = inlined_call_operand.vmem [shape: f32[128,32], index: 0, kind: input, shape index: {}]   ;;  %s6488_s1 = inlined_call_operand.vmem [shape: bf16[32,1152], index: 1, kind: input, shape index: {}]   ;;  %s6489_s2 = inlined_call_operand.vmem [shape: f32[1,128], index: 2, kind: input, shape index: {}]   ;;  %s6490_s3 = inlined_call_operand.hbm [shape: bf16[256,256], index: 3, kind: input, shape index: {}]   ;;  %s6491_s4 = inlined_call_operand.vmem [shape: f32[1,256], index: 4, kind: input, shape index: {}]   ;;  %s6492_s5 = inlined_call_operand.hbm [shape: bf16[256,256], index: 5, kind: input, shape index: {}]   ;;  %s6493_s6 = inlined_call_operand.vmem [shape: f32[1,256], index: 6, kind: input, shape index: {}]   ;;  %s6494_s7 = inlined_call_operand.hbm [shape: bf16[256,256], index: 7, kind: input, shape index: {}]   ;;  %s6495_s8 = inlined_call_operand.vmem [shape: f32[1,256], index: 8, kind: input, shape index: {}]   ;;  %s6496_s9 = inlined_call_operand.hbm [shape: bf16[256,128], index: 9, kind: input, shape index: {}]   ;;  %s6497_s10 = inlined_call_operand.vmem [shape: f32[1,128], index: 10, kind: input, shape index: {}]   ;;  %s6498_s11 = inlined_call_operand.hbm [shape: bf16[128,128], index: 11, kind: input, shape index: {}]   ;;  %s6499_s12 = inlined_call_operand.vmem [shape: f32[1,128], index: 12, kind: input, shape index: {}]   ;;  %s6500_s13 = inlined_call_operand.hbm [shape: bf16[128,128], index: 13, kind: input, shape index: {}]   ;;  %s6501_s14 = inlined_call_operand.vmem [shape: f32[1,128], index: 14, kind: input, shape index: {}]   ;;  %s6502_s15 = inlined_call_operand.hbm [shape: bf16[128,128], index: 15, kind: input, shape index: {}]   ;;  %s6503_s16 = inlined_call_operand.vmem [shape: f32[1,128], index: 16, kind: input, shape index: {}]   ;;  %s6504_s17 = inlined_call_operand.hbm [shape: bf16[128,128], index: 17, kind: input, shape index: {}]   ;;  %s6505_s18 = inlined_call_operand.vmem [shape: f32[1,128], index: 18, kind: input, shape index: {}]   ;;  %s6506_s19 = inlined_call_operand.hbm [shape: bf16[256,128], index: 19, kind: input, shape index: {}]   ;;  %s6507_s20 = inlined_call_operand.vmem [shape: f32[1,128], index: 20, kind: input, shape index: {}]   ;;  %s6508_s21 = inlined_call_operand.vmem [shape: bf16[1,128], index: 21, kind: input, shape index: {}]   ;;  %s6509_s22 = inlined_call_operand.<no memory space> [shape: f32[1,1], index: 22, kind: input, shape index: {}]   ;;  %s6510_s23 = inlined_call_operand.hbm [shape: f32[1,128], index: 23, kind: output, shape index: {}]  }
   0x1   :  { %6515 = sst [smem:[#allocation44_spill]] %s6487_s0  ;;  %v28_v0 = vstv %s6509_s22 }
   0x2   :  { %6516 = sst [smem:[#allocation45_spill]] %s6488_s1  ;;  %29 = vst [vmem:[#allocation2] sm:$0x1] %v28_v0 }
   0x3   :  { %6517 = sst [smem:[#allocation46_spill]] %s6489_s2 }
   0x4   :  { %6518 = sst [smem:[#allocation47_spill]] %s6490_s3 }
   0x5   :  { %6519 = sst [smem:[#allocation48_spill]] %s6491_s4 }
   0x6   :  { %6520 = sst [smem:[#allocation49_spill]] %s6492_s5 }
   0x7   :  { %6521 = sst [smem:[#allocation50_spill]] %s6493_s6 }
   0x8   :  { %6522 = sst [smem:[#allocation51_spill]] %s6494_s7 }
   0x9   :  { %30 = vsyncpa [#allocation4], 0 }
   0xa   :  { %31 = vsyncpa [#allocation7], 0 }
   0xb   :  { %32 = vsyncpa [#allocation10], 0 }
   0xc   :  { %33 = vsyncpa [#allocation13], 0 }
   0xd   :  { %34 = vsyncpa [#allocation16], 0 }
   0xe   :  { %35 = vsyncpa [#allocation5], 0  ;;  %s6523_s5 = sld [smem:[#allocation49_spill]]  ;;  %s5275_s26 = smov [#allocation6]  }
   0xf   :  { %s63_s2 = sshll.u32 %s5275_s26, 4  ;;  %s91_s7 = sshll.u32 %s6496_s9, 4  ;;  %s64_s2 = int_to_ptr.vmem [resolvable:$true] %s63_s2  ;;  %s92_s7 = int_to_ptr.hbm [resolvable:$true] %s91_s7 }
  0x10   :  { %s5276_s22 = smov 128   ;;  %s5277_s28 = smov 8  }
  0x11   :  { %s5278_s29 = smov [#allocation9]   ;;  %s5279_s0 = smov 64  }
  0x12   :  { %s93_s3 = sshll.u32 %s5278_s29, 4  ;;  %s5280_s4 = smov 4   ;;  %s94_s3 = int_to_ptr.vmem [resolvable:$true] %s93_s3 }
  0x13   :  { %99 = dma.hbm_to_vmem [thread:$0]  %s92_s7, 2048, %s94_s3, [#allocation10], %s5279_s0, %s5279_s0, %s5280_s4  }
  0x14   :  { %s61_s1 = sshll.u32 %s6523_s5, 4  ;;  %s121_s9 = sshll.u32 %s6500_s13, 4  ;;  %s62_s1 = int_to_ptr.hbm [resolvable:$true] %s61_s1  ;;  %s122_s9 = int_to_ptr.hbm [resolvable:$true] %s121_s9 }
  0x15   :  { %69 = dma.hbm_to_vmem [thread:$0]  %s62_s1, 4096, %s64_s2, [#allocation7], %s5276_s22, %s5276_s22, %s5277_s28  }
  0x16   :  { %s5281_s25 = smov [#allocation12]   ;;  %s151_s2 = sshll.u32 %s6504_s17, 4  ;;  %s152_s2 = int_to_ptr.hbm [resolvable:$true] %s151_s2 }
  0x17   :  { %s123_s5 = sshll.u32 %s5281_s25, 4  ;;  %s5282_s6 = smov [#allocation15]   ;;  %s124_s5 = int_to_ptr.vmem [resolvable:$true] %s123_s5 }
  0x18   :  { %129 = dma.hbm_to_vmem [thread:$0]  %s122_s9, 1024, %s124_s5, [#allocation13], %s5279_s0, %s5279_s0, %s5280_s4  }
  0x19   :  { %s153_s27 = sshll.u32 %s5282_s6, 4  ;;  %s6524_s3 = sld [smem:[#allocation47_spill]]  ;;  %s154_s27 = int_to_ptr.vmem [resolvable:$true] %s153_s27 }
  0x1a   :  { %159 = dma.hbm_to_vmem [thread:$0]  %s152_s2, 1024, %s154_s27, [#allocation16], %s5279_s0, %s5279_s0, %s5280_s4  }
  0x1b   :  { %s6525_s17 = sld [smem:[#allocation51_spill]]  ;;  %s5283_s26 = smov [#allocation3]  }
  0x1c   :  { %s48_s1 = sshll.u32 %s5283_s26, 4  ;;  %s5284_s9 = smov [#allocation8]   ;;  %s49_s1 = int_to_ptr.vmem [resolvable:$true] %s48_s1 }
  0x1d   :  { %s78_s5 = sshll.u32 %s5284_s9, 4  ;;  %s106_s29 = sshll.u32 %s6498_s11, 4  ;;  %s79_s5 = int_to_ptr.vmem [resolvable:$true] %s78_s5  ;;  %s107_s29 = int_to_ptr.hbm [resolvable:$true] %s106_s29 }
  0x1e   :  { %s5285_s13 = smov [#allocation11]  }
  0x1f   :  { %s46_s30 = sshll.u32 %s6524_s3, 4  ;;  %s136_s3 = sshll.u32 %s6502_s15, 4  ;;  %s47_s30 = int_to_ptr.hbm [resolvable:$true] %s46_s30  ;;  %s137_s3 = int_to_ptr.hbm [resolvable:$true] %s136_s3 }
  0x20   :  { %54 = dma.hbm_to_vmem [thread:$0]  %s47_s30, 4096, %s49_s1, [#allocation4], %s5276_s22, %s5276_s22, %s5277_s28  }
  0x21   :  { %s76_s25 = sshll.u32 %s6525_s17, 4  ;;  %s108_s24 = sshll.u32 %s5285_s13, 4  ;;  %s77_s25 = int_to_ptr.hbm [resolvable:$true] %s76_s25  ;;  %s109_s24 = int_to_ptr.vmem [resolvable:$true] %s108_s24 }
  0x22   :  { %84 = dma.hbm_to_vmem [thread:$0]  %s77_s25, 4096, %s79_s5, [#allocation7], %s5276_s22, %s5276_s22, %s5277_s28  }
  0x23   :  { %114 = dma.hbm_to_vmem [thread:$0]  %s107_s29, 1024, %s109_s24, [#allocation10], %s5279_s0, %s5279_s0, %s5280_s4  }
  0x24   :  { %s5286_s30 = smov [#allocation14]   ;;  %s166_s1 = sshll.u32 %s6506_s19, 4  ;;  %s167_s1 = int_to_ptr.hbm [resolvable:$true] %s166_s1 }
  0x25   :  { %s138_s11 = sshll.u32 %s5286_s30, 4  ;;  %s5287_s15 = smov [#allocation17]   ;;  %s139_s11 = int_to_ptr.vmem [resolvable:$true] %s138_s11 }
  0x26   :  { %144 = dma.hbm_to_vmem [thread:$0]  %s137_s3, 1024, %s139_s11, [#allocation13], %s5279_s0, %s5279_s0, %s5280_s4  }
  0x27   :  { %s168_s22 = sshll.u32 %s5287_s15, 4  ;;  %s169_s22 = int_to_ptr.vmem [resolvable:$true] %s168_s22 }
  0x28   :  { %174 = dma.hbm_to_vmem [thread:$0]  %s167_s1, 2048, %s169_s22, [#allocation16], %s5279_s0, %s5279_s0, %s5280_s4  }
  0x29   :  { %5263 = dma.done.wait [#allocation4], 4096  }
  0x2a   :  { %5264 = vsyncadd [#allocation4], 4294963200 }
  0x2b   :  { %5265 = dma.done.wait [#allocation7], 8192  }
  0x2c   :  { %5266 = vsyncadd [#allocation7], 4294959104 }
  0x2d   :  { %5267 = dma.done.wait [#allocation10], 3072  }
  0x2e   :  { %5268 = vsyncadd [#allocation10], 4294964224 }
  0x2f   :  { %5269 = dma.done.wait [#allocation13], 2048  }
  0x30   :  { %5270 = vsyncadd [#allocation13], 4294965248 }
  0x31   :  { %5271 = dma.done.wait [#allocation16], 3072  }
  0x32   :  { %5272 = vsyncadd [#allocation16], 4294964224  ;;  %s6526_s25 = sld [smem:[#allocation45_spill]]  ;;  %vm354_vm0 = vcmask 261120   ;;  %s5289_s19 = smov [#allocation18]  }
  0x33   :  { %s6527_s27 = sld [smem:[#allocation44_spill]]  ;;  %s4017_s28 = sshll.u32 %s5289_s19, 4  ;;  %s4018_s28 = int_to_ptr.vmem [resolvable:$true] %s4017_s28 }
  0x34   :  { %s6546_s5 = sld [smem:[#allocation46_spill]] }
  0x35   :  { %s6566_s4 = sld [smem:[#allocation48_spill]] }
  0x36   :  { %s6567_s2 = sld [smem:[#allocation50_spill]] }
  0x38   :  { %v4071_v1 = vld [vmem:[%s6526_s25 + $0x48] sm:$0xf]  ;;  %v4830_v2 = vld [vmem:[%s6526_s25 + $0x68] sm:$0xf0]  ;;  %v4035_v3 = vld [vmem:[%s6526_s25] sm:$0xf] }
  0x39   :  { %v4072_v4 = vor.u32 %v4830_v2, %v4071_v1  ;;  %v4821_v5 = vld [vmem:[%s6526_s25 + $0x20] sm:$0xf0]  ;;  %v224_v6 = vld [vmem:[%s6527_s27 + $0x30] sm:$0xff]  ;;  %v225_v8 = vld [vmem:[%s6527_s27 + $0x38] sm:$0xff] }
  0x3a   :  { %v4036_v7 = vor.u32 %v4821_v5, %v4035_v3  ;;  %v230_v9 = vld [vmem:[%s6527_s27 + $0x60] sm:$0xff]  ;;  %v231_v10 = vld [vmem:[%s6527_s27 + $0x68] sm:$0xff]  ;;  %v4827_v13 = vld [vmem:[%s6526_s25 + $0x54] sm:$0xf]  ;;  %v5503_v15 = vpack.c.bf16 %v225_v8, %v224_v6 }
  0x3b   :  { %4995 = vmatpush.bf16.msra.mxu2 %v4072_v4  ;;  %4996 = vmatpush.bf16.msra.mxu3 %v4072_v4  ;;  %v218_v11 = vld [vmem:[%s6527_s27] sm:$0xff]  ;;  %v219_v12 = vld [vmem:[%s6527_s27 + $0x8] sm:$0xff]  ;;  %v4081_v14 = vld [vmem:[%s6526_s25 + $0x74] sm:$0xf0]  ;;  %v5505_v16 = vpack.c.bf16 %v231_v10, %v230_v9 }
  0x3c   :  { %385 = vmatpush.bf16.msra.mxu0 %v4072_v4  ;;  %v4084_v17 = vor.u32 %v4827_v13, %v4081_v14  ;;  %v4818_v18 = vld [vmem:[%s6526_s25 + $0xc] sm:$0xf]  ;;  %v4045_v19 = vld [vmem:[%s6526_s25 + $0x2c] sm:$0xf0]  ;;  %v5516_v21 = vpack.c.bf16 %v219_v12, %v218_v11  ;;  %v4817_v25 = vld [vmem:[%s6526_s25 + $0x4] sm:$0xf] }
  0x3d   :  { %v4826_v20 = vld [vmem:[%s6526_s25 + $0x4c] sm:$0xf]  ;;  %v4073_v22 = vld [vmem:[%s6526_s25 + $0x6c] sm:$0xf0]  ;;  %v4048_v23 = vor.u32 %v4818_v18, %v4045_v19  ;;  %v4037_v26 = vld [vmem:[%s6526_s25 + $0x24] sm:$0xf0] }
  0x3e   :  { %v4076_v24 = vor.u32 %v4826_v20, %v4073_v22  ;;  %v4040_v27 = vor.u32 %v4817_v25, %v4037_v26  ;;  %v4079_v28 = vld [vmem:[%s6526_s25 + $0x50] sm:$0xf]  ;;  %v4831_v29 = vld [vmem:[%s6526_s25 + $0x70] sm:$0xf0]  ;;  %v4087_v30 = vld [vmem:[%s6526_s25 + $0x58] sm:$0xf] }
  0x3f   :  { %4997 = vmatpush.bf16.msra.mxu2 %v4036_v7  ;;  %4998 = vmatpush.bf16.msra.mxu3 %v4036_v7  ;;  %v4080_v31 = vor.u32 %v4831_v29, %v4079_v28  ;;  %v4832_v32 = vld [vmem:[%s6526_s25 + $0x78] sm:$0xf0]  ;;  %v4043_v33 = vld [vmem:[%s6526_s25 + $0x8] sm:$0xf]  ;;  %v4822_v34 = vld [vmem:[%s6526_s25 + $0x28] sm:$0xf0] }
  0x40   :  { %386 = vmatpush.bf16.msra.mxu0 %v4036_v7  ;;  %434 = vmatpush.bf16.msra.mxu1 %v4076_v24  ;;  %v4088_v35 = vor.u32 %v4832_v32, %v4087_v30  ;;  %v4051_v36 = vld [vmem:[%s6526_s25 + $0x10] sm:$0xf]  ;;  %v4823_v37 = vld [vmem:[%s6526_s25 + $0x30] sm:$0xf0]  ;;  %v4044_v38 = vor.u32 %v4822_v34, %v4043_v33  ;;  %v226_v40 = vld [vmem:[%s6527_s27 + $0x40] sm:$0xff] }
  0x41   :  { %v4052_v39 = vor.u32 %v4823_v37, %v4051_v36  ;;  %v227_v41 = vld [vmem:[%s6527_s27 + $0x48] sm:$0xff]  ;;  %v232_v42 = vld [vmem:[%s6527_s27 + $0x70] sm:$0xff]  ;;  %v233_v43 = vld [vmem:[%s6527_s27 + $0x78] sm:$0xff] }
  0x42   :  { %4108 = vmatmul.msk.bf16.vlgmr.msra.gmra.mxu2 %vm354_vm0, %v5503_v15  ;;  %4111 = vmatmul.msk.bf16.vlgmr.msra.gmra.mxu3 %vm354_vm0, %v5505_v16  ;;  %v220_v44 = vld [vmem:[%s6527_s27 + $0x10] sm:$0xff]  ;;  %v221_v45 = vld [vmem:[%s6527_s27 + $0x18] sm:$0xff]  ;;  %v5577_v46 = vpack.c.bf16 %v227_v41, %v226_v40  ;;  %v5579_v47 = vpack.c.bf16 %v233_v43, %v232_v42  ;;  %v222_v51 = vld [vmem:[%s6527_s27 + $0x20] sm:$0xff] }
  0x43   :  { %532 = vmatpush.bf16.msrb.mxu3 %v4084_v17  ;;  %4105 = vmatmul.msk.bf16.vlgmr.msra.gmra.mxu0 %vm354_vm0, %v5516_v21  ;;  %v5581_v48 = vpack.c.bf16 %v221_v45, %v220_v44  ;;  %v228_v49 = vld [vmem:[%s6527_s27 + $0x50] sm:$0xff]  ;;  %v229_v50 = vld [vmem:[%s6527_s27 + $0x58] sm:$0xff]  ;;  %v223_v52 = vld [vmem:[%s6527_s27 + $0x28] sm:$0xff] }
  0x44   :  { %483 = vmatpush.bf16.msrb.mxu2 %v4080_v31  ;;  %435 = vmatpush.bf16.msra.mxu1 %v4040_v27  ;;  %v5603_v53 = vpack.c.bf16 %v229_v50, %v228_v49  ;;  %v5605_v54 = vpack.c.bf16 %v223_v52, %v222_v51  ;;  %v4095_v55 = vld [vmem:[%s6526_s25 + $0x60] sm:$0xf]  ;;  %v4833_v56 = vld [vmem:[%s6526_s25 + $0x80] sm:$0xf0]  ;;  %v4097_v59 = vld [vmem:[%s6526_s25 + $0x84] sm:$0xf0] }
  0x45   :  { %581 = vmatpush.bf16.msrb.mxu0 %v4088_v35  ;;  %v4096_v57 = vor.u32 %v4833_v56, %v4095_v55  ;;  %v4829_v58 = vld [vmem:[%s6526_s25 + $0x64] sm:$0xf]  ;;  %v4828_v60 = vld [vmem:[%s6526_s25 + $0x5c] sm:$0xf]  ;;  %v4089_v62 = vld [vmem:[%s6526_s25 + $0x7c] sm:$0xf0] }
  0x46   :  { %v4100_v61 = vor.u32 %v4829_v58, %v4097_v59  ;;  %v4092_v63 = vor.u32 %v4828_v60, %v4089_v62  ;;  %v4103_v0 = vld [vmem:[%s6526_s25 + $0x68] sm:$0xf]  ;;  %v4834_v1 = vld [vmem:[%s6526_s25 + $0x88] sm:$0xf0]  ;;  %v4820_v3 = vld [vmem:[%s6526_s25 + $0x1c] sm:$0xf] }
  0x47   :  { %533 = vmatpush.bf16.msrb.mxu3 %v4048_v23  ;;  %4113 = vmatmul.msk.bf16.vlgmr.msra.gmra.mxu1 %vm354_vm0, %v5516_v21  ;;  %v4104_v2 = vor.u32 %v4834_v1, %v4103_v0  ;;  %v4061_v4 = vld [vmem:[%s6526_s25 + $0x3c] sm:$0xf0]  ;;  %v4819_v7 = vld [vmem:[%s6526_s25 + $0x14] sm:$0xf]  ;;  %v4053_v8 = vld [vmem:[%s6526_s25 + $0x34] sm:$0xf0] }
  0x48   :  { %484 = vmatpush.bf16.msrb.mxu2 %v4044_v38  ;;  %630 = vmatpush.bf16.msrb.mxu1 %v4092_v63  ;;  %v4064_v5 = vor.u32 %v4820_v3, %v4061_v4  ;;  %v4056_v9 = vor.u32 %v4819_v7, %v4053_v8  ;;  %v4059_v14 = vld [vmem:[%s6526_s25 + $0x18] sm:$0xf]  ;;  %v4824_v17 = vld [vmem:[%s6526_s25 + $0x38] sm:$0xf0]  ;;  %v4067_v22 = vld [vmem:[%s6526_s25 + $0x20] sm:$0xf] }
  0x49   :  { %582 = vmatpush.bf16.msrb.mxu0 %v4052_v39  ;;  %v4060_v20 = vor.u32 %v4824_v17, %v4059_v14  ;;  %v4825_v23 = vld [vmem:[%s6526_s25 + $0x40] sm:$0xf0] }
  0x4a   :  { %v4068_v25 = vor.u32 %v4825_v23, %v4067_v22 }
  0x4b   :  { %728 = vmatpush.bf16.msra.mxu3 %v4100_v61 }
  0x4c   :  { %679 = vmatpush.bf16.msra.mxu2 %v4096_v57  ;;  %631 = vmatpush.bf16.msrb.mxu1 %v4056_v9 }
  0x4d   :  { %777 = vmatpush.bf16.msra.mxu0 %v4104_v2 }
  0x4f   :  { %729 = vmatpush.bf16.msra.mxu3 %v4064_v5 }
  0x50   :  { %680 = vmatpush.bf16.msra.mxu2 %v4060_v20 }
  0x51   :  { %778 = vmatpush.bf16.msra.mxu0 %v4068_v25 }
  0x52   :  { %4109 = vmatmul.msk.bf16.gmra.mxu2 %vm354_vm0, %v5577_v46  ;;  %4112 = vmatmul.msk.bf16.gmra.mxu3 %vm354_vm0, %v5579_v47 }
  0x53   :  { %4106 = vmatmul.msk.bf16.gmra.mxu0 %vm354_vm0, %v5581_v48 }
  0x57   :  { %4114 = vmatmul.msk.bf16.gmra.mxu1 %vm354_vm0, %v5581_v48 }
  0x62   :  { %4110 = vmatmul.msk.bf16.gmra.mxu2 %vm354_vm0, %v5603_v53  ;;  %4129 = vmatmul.msk.bf16.vlgmr.msrb.gmra.mxu3 %vm354_vm0, %v5516_v21 }
  0x63   :  { %4107 = vmatmul.msk.bf16.gmra.mxu0 %vm354_vm0, %v5605_v54 }
  0x67   :  { %4115 = vmatmul.msk.bf16.gmra.mxu1 %vm354_vm0, %v5605_v54 }
  0x72   :  { %4121 = vmatmul.msk.bf16.vlgmr.msrb.gmra.mxu2 %vm354_vm0, %v5516_v21  ;;  %4130 = vmatmul.msk.bf16.gmra.mxu3 %vm354_vm0, %v5581_v48 }
  0x73   :  { %4137 = vmatmul.msk.bf16.vlgmr.msrb.gmra.mxu0 %vm354_vm0, %v5516_v21 }
  0x77   :  { %4116 = vmatmul.msk.bf16.gmra.mxu1 %vm354_vm0, %v5503_v15 }
  0x82   :  { %4122 = vmatmul.msk.bf16.gmra.mxu2 %vm354_vm0, %v5581_v48  ;;  %4131 = vmatmul.msk.bf16.gmra.mxu3 %vm354_vm0, %v5605_v54 }
  0x83   :  { %4138 = vmatmul.msk.bf16.gmra.mxu0 %vm354_vm0, %v5581_v48 }
  0x87   :  { %4117 = vmatmul.msk.bf16.gmra.mxu1 %vm354_vm0, %v5577_v46 }
  0x92   :  { %4123 = vmatmul.msk.bf16.gmra.mxu2 %vm354_vm0, %v5605_v54  ;;  %4132 = vmatmul.msk.bf16.gmra.mxu3 %vm354_vm0, %v5503_v15 }
  0x93   :  { %4139 = vmatmul.msk.bf16.gmra.mxu0 %vm354_vm0, %v5605_v54 }
  0x97   :  { %4118 = vmatmul.msk.bf16.gmra.mxu1 %vm354_vm0, %v5603_v53 }
  0xa2   :  { %4124 = vmatmul.msk.bf16.gmra.mxu2 %vm354_vm0, %v5503_v15  ;;  %4133 = vmatmul.msk.bf16.gmra.mxu3 %vm354_vm0, %v5577_v46 }
  0xa3   :  { %4140 = vmatmul.msk.bf16.gmra.mxu0 %vm354_vm0, %v5503_v15 }
  0xa7   :  { %4119 = vmatmul.msk.bf16.gmra.mxu1 %vm354_vm0, %v5505_v16 }
  0xb2   :  { %4125 = vmatmul.msk.bf16.gmra.mxu2 %vm354_vm0, %v5577_v46  ;;  %4134 = vmatmul.msk.bf16.gmra.mxu3 %vm354_vm0, %v5603_v53 }
  0xb3   :  { %4141 = vmatmul.msk.bf16.gmra.mxu0 %vm354_vm0, %v5577_v46 }
  0xb7   :  { %4120 = vmatmul.msk.bf16.gmra.mxu1 %vm354_vm0, %v5579_v47 }
  0xc0   :  { %v388_v6 = vpop.f32.mrf.mxu0 }
  0xc2   :  { %4126 = vmatmul.msk.bf16.gmra.mxu2 %vm354_vm0, %v5603_v53  ;;  %4135 = vmatmul.msk.bf16.gmra.mxu3 %vm354_vm0, %v5505_v16 }
  0xc3   :  { %4142 = vmatmul.msk.bf16.gmra.mxu0 %vm354_vm0, %v5603_v53 }
  0xc4   :  { %v437_v12 = vpop.f32.mrf.mxu1 }
  0xc5   :  { %v5697_v10 = vpop.f32.mrf.mxu2  ;;  %v5699_v11 = vpop.f32.mrf.mxu3 }
  0xc6   :  { %6528 = vst [vmem:[#allocation25_spill] sm:$0xff] %v5699_v11  ;;  %v4261_v11 = vld [vmem:[#allocation3 + $0xa8] sm:$0xf0] }
  0xc7   :  { %4145 = vmatmul.msk.bf16.vlgmr.msrb.gmra.mxu1 %vm354_vm0, %v5516_v21 }
  0xc8   :  { %v390_v13 = vpop.f32.mrf.mxu0 }
  0xcc   :  { %v439_v24 = vpop.f32.mrf.mxu1 }
  0xcd   :  { %v5709_v18 = vpop.f32.mrf.mxu2  ;;  %v5711_v19 = vpop.f32.mrf.mxu3 }
  0xce   :  { %6529 = vst [vmem:[#allocation26_spill] sm:$0xff] %v5711_v19 }
  0xd0   :  { %v393_v26 = vpop.f32.mrf.mxu0 }
  0xd2   :  { %4127 = vmatmul.msk.bf16.gmra.mxu2 %vm354_vm0, %v5505_v16  ;;  %4136 = vmatmul.msk.bf16.gmra.mxu3 %vm354_vm0, %v5579_v47 }
  0xd3   :  { %4143 = vmatmul.msk.bf16.gmra.mxu0 %vm354_vm0, %v5505_v16 }
  0xd4   :  { %v442_v29 = vpop.f32.mrf.mxu1 }
  0xd5   :  { %v5725_v27 = vpop.f32.mrf.mxu2  ;;  %v5727_v28 = vpop.f32.mrf.mxu3 }
  0xd6   :  { %6530 = vst [vmem:[#allocation27_spill] sm:$0xff] %v5727_v28  ;;  %v4855_v28 = vld [vmem:[#allocation3 + $0xa4] sm:$0xf] }
  0xd7   :  { %4146 = vmatmul.msk.bf16.gmra.mxu1 %vm354_vm0, %v5581_v48 }
  0xd8   :  { %v395_v30 = vpop.f32.mrf.mxu0 }
  0xdc   :  { %v444_v33 = vpop.f32.mrf.mxu1 }
  0xdd   :  { %v5731_v31 = vpop.f32.mrf.mxu2  ;;  %v5733_v32 = vpop.f32.mrf.mxu3 }
  0xde   :  { %6531 = vst [vmem:[#allocation28_spill] sm:$0xff] %v5733_v32 }
  0xe0   :  { %v398_v34 = vpop.f32.mrf.mxu0 }
  0xe2   :  { %4128 = vmatmul.msk.bf16.gmra.mxu2 %vm354_vm0, %v5579_v47  ;;  %4161 = vmatmul.msk.bf16.vlgmr.msra.gmra.mxu3 %vm354_vm0, %v5516_v21 }
  0xe3   :  { %4144 = vmatmul.msk.bf16.gmra.mxu0 %vm354_vm0, %v5579_v47 }
  0xe4   :  { %v447_v38 = vpop.f32.mrf.mxu1 }
  0xe5   :  { %v5741_v35 = vpop.f32.mrf.mxu2  ;;  %v535_v36 = vpop.f32.mrf.mxu3 }
  0xe6   :  { %v5743_v37 = vmul.f32 %v535_v36, %v437_v12  ;;  %v4299_v36 = vld [vmem:[#allocation3 + $0xf0] sm:$0xf] }
  0xe7   :  { %4147 = vmatmul.msk.bf16.gmra.mxu1 %vm354_vm0, %v5605_v54 }
  0xe8   :  { %v400_v39 = vpop.f32.mrf.mxu0 }
  0xec   :  { %v449_v43 = vpop.f32.mrf.mxu1 }
  0xed   :  { %v5747_v40 = vpop.f32.mrf.mxu2  ;;  %v537_v41 = vpop.f32.mrf.mxu3 }
  0xee   :  { %6532 = vst [vmem:[#allocation29_spill] sm:$0xff] %v5747_v40  ;;  %v5749_v42 = vmul.f32 %v537_v41, %v439_v24  ;;  %v4866_v41 = vld [vmem:[#allocation3 + $0xf4] sm:$0xf0] }
  0xf0   :  { %v5751_v44 = vpop.f32.mrf.mxu0 }
  0xf2   :  { %4153 = vmatmul.msk.bf16.vlgmr.msra.gmra.mxu2 %vm354_vm0, %v5516_v21  ;;  %4162 = vmatmul.msk.bf16.gmra.mxu3 %vm354_vm0, %v5581_v48 }
  0xf3   :  { %4169 = vmatmul.msk.bf16.vlgmr.msra.gmra.mxu0 %vm354_vm0, %v5516_v21 }
  0xf4   :  { %v452_v52 = vpop.f32.mrf.mxu1 }
  0xf5   :  { %v486_v45 = vpop.f32.mrf.mxu2  ;;  %v540_v49 = vpop.f32.mrf.mxu3 }
  0xf6   :  { %v5759_v50 = vmul.f32 %v486_v45, %v388_v6  ;;  %v5761_v51 = vmul.f32 %v540_v49, %v442_v29  ;;  %v4300_v45 = vor.u32 %v4866_v41, %v4299_v36  ;;  %v4235_v49 = vld [vmem:[#allocation3 + $0x70] sm:$0xf]  ;;  %v4864_v36 = vld [vmem:[#allocation3 + $0xe4] sm:$0xf0]  ;;  %v4293_v41 = vld [vmem:[#allocation3 + $0xe8] sm:$0xf0] }
  0xf7   :  { %4148 = vmatmul.msk.bf16.gmra.mxu1 %vm354_vm0, %v5503_v15 }
  0xf8   :  { %v5763_v55 = vpop.f32.mrf.mxu0  ;;  %1179 = vmatpush.bf16.msrb.mxu2 %v4300_v45 }
  0xfc   :  { %v454_v60 = vpop.f32.mrf.mxu1 }
  0xfd   :  { %v488_v56 = vpop.f32.mrf.mxu2  ;;  %v542_v57 = vpop.f32.mrf.mxu3 }
  0xfe   :  { %v5767_v58 = vmul.f32 %v488_v56, %v390_v13  ;;  %v5769_v59 = vmul.f32 %v542_v57, %v444_v33  ;;  %v4849_v33 = vld [vmem:[#allocation3 + $0x74] sm:$0xf] }
 0x100   :  { %v5771_v21 = vpop.f32.mrf.mxu0 }
 0x102   :  { %4154 = vmatmul.msk.bf16.gmra.mxu2 %vm354_vm0, %v5581_v48  ;;  %4163 = vmatmul.msk.bf16.gmra.mxu3 %vm354_vm0, %v5605_v54 }
 0x103   :  { %4170 = vmatmul.msk.bf16.gmra.mxu0 %vm354_vm0, %v5581_v48 }
 0x104   :  { %v457_v1 = vpop.f32.mrf.mxu1 }
 0x105   :  { %v491_v61 = vpop.f32.mrf.mxu2  ;;  %v545_v62 = vpop.f32.mrf.mxu3 }
 0x106   :  { %v5779_v63 = vmul.f32 %v491_v61, %v393_v26  ;;  %v5781_v0 = vmul.f32 %v545_v62, %v447_v38  ;;  %v4301_v61 = vld [vmem:[#allocation3 + $0xf8] sm:$0xf0] }
 0x107   :  { %4149 = vmatmul.msk.bf16.gmra.mxu1 %vm354_vm0, %v5577_v46 }
 0x108   :  { %v5783_v2 = vpop.f32.mrf.mxu0 }
 0x10c   :  { %v5791_v7 = vpop.f32.mrf.mxu1 }
 0x10d   :  { %v493_v3 = vpop.f32.mrf.mxu2  ;;  %v547_v4 = vpop.f32.mrf.mxu3 }
 0x10e   :  { %v5787_v5 = vmul.f32 %v493_v3, %v395_v30  ;;  %v5789_v6 = vmul.f32 %v547_v4, %v449_v43 }
 0x110   :  { %v5793_v48 = vpop.f32.mrf.mxu0 }
 0x112   :  { %4155 = vmatmul.msk.bf16.gmra.mxu2 %vm354_vm0, %v5605_v54  ;;  %4164 = vmatmul.msk.bf16.gmra.mxu3 %vm354_vm0, %v5503_v15 }
 0x113   :  { %4171 = vmatmul.msk.bf16.gmra.mxu0 %vm354_vm0, %v5605_v54 }
 0x114   :  { %v462_v14 = vpop.f32.mrf.mxu1 }
 0x115   :  { %v496_v8 = vpop.f32.mrf.mxu2  ;;  %v550_v9 = vpop.f32.mrf.mxu3 }
 0x116   :  { %v5801_v12 = vmul.f32 %v496_v8, %v398_v34  ;;  %v5803_v13 = vmul.f32 %v550_v9, %v452_v52  ;;  %v4237_v34 = vld [vmem:[#allocation3 + $0x78] sm:$0xf0]  ;;  %v4850_v52 = vld [vmem:[#allocation3 + $0x74] sm:$0xf0] }
 0x117   :  { %4150 = vmatmul.msk.bf16.gmra.mxu1 %vm354_vm0, %v5603_v53  ;;  %v4236_v56 = vor.u32 %v4850_v52, %v4235_v49 }
 0x118   :  { %v5805_v17 = vpop.f32.mrf.mxu0 }
 0x119   :  { %1130 = vmatpush.bf16.msra.mxu1 %v4236_v56  ;;  %v4227_v56 = vld [vmem:[#allocation3 + $0x60] sm:$0xf] }
 0x11c   :  { %v5813_v25 = vpop.f32.mrf.mxu1 }
 0x11d   :  { %v498_v20 = vpop.f32.mrf.mxu2  ;;  %v552_v22 = vpop.f32.mrf.mxu3 }
 0x11e   :  { %v5809_v23 = vmul.f32 %v498_v20, %v400_v39  ;;  %v5811_v24 = vmul.f32 %v552_v22, %v454_v60  ;;  %v4240_v39 = vor.u32 %v4849_v33, %v4237_v34  ;;  %v4865_v60 = vld [vmem:[#allocation3 + $0xf4] sm:$0xf]  ;;  %v4847_v20 = vld [vmem:[#allocation3 + $0x64] sm:$0xf]  ;;  %v4229_v22 = vld [vmem:[#allocation3 + $0x68] sm:$0xf0] }
 0x11f   :  { %v4232_v34 = vor.u32 %v4847_v20, %v4229_v22  ;;  %v4285_v20 = vld [vmem:[#allocation3 + $0xd8] sm:$0xf0] }
 0x120   :  { %v5815_v54 = vpop.f32.mrf.mxu0  ;;  %1228 = vmatpush.bf16.msrb.mxu3 %v4240_v39  ;;  %v4863_v39 = vld [vmem:[#allocation3 + $0xe4] sm:$0xf] }
 0x121   :  { %v4296_v52 = vor.u32 %v4863_v39, %v4293_v41  ;;  %v4859_v39 = vld [vmem:[#allocation3 + $0xc4] sm:$0xf] }
 0x122   :  { %4156 = vmatmul.msk.bf16.gmra.mxu2 %vm354_vm0, %v5503_v15  ;;  %4165 = vmatmul.msk.bf16.gmra.mxu3 %vm354_vm0, %v5577_v46 }
 0x123   :  { %4172 = vmatmul.msk.bf16.gmra.mxu0 %vm354_vm0, %v5503_v15 }
 0x124   :  { %v5827_v38 = vpop.f32.mrf.mxu1  ;;  %1229 = vmatpush.bf16.msrb.mxu3 %v4232_v34  ;;  %v4860_v34 = vld [vmem:[#allocation3 + $0xc4] sm:$0xf0] }
 0x125   :  { %v5823_v26 = vpop.f32.mrf.mxu2  ;;  %v555_v29 = vpop.f32.mrf.mxu3 }
 0x126   :  { %v5825_v30 = vmul.f32 %v555_v29, %v457_v1  ;;  %v4304_v1 = vor.u32 %v4865_v60, %v4301_v61  ;;  %v4291_v29 = vld [vmem:[#allocation3 + $0xe0] sm:$0xf]  ;;  %v4862_v61 = vld [vmem:[#allocation3 + $0xd4] sm:$0xf0] }
 0x127   :  { %4151 = vmatmul.msk.bf16.gmra.mxu1 %vm354_vm0, %v5505_v16  ;;  %v4292_v49 = vor.u32 %v4864_v36, %v4291_v29  ;;  %v4275_v36 = vld [vmem:[#allocation3 + $0xc0] sm:$0xf] }
 0x128   :  { %v5829_v43 = vpop.f32.mrf.mxu0  ;;  %1277 = vmatpush.bf16.msrb.mxu0 %v4304_v1  ;;  %v4861_v1 = vld [vmem:[#allocation3 + $0xd4] sm:$0xf] }
 0x129   :  { %1180 = vmatpush.bf16.msrb.mxu2 %v4292_v49  ;;  %v4288_v22 = vor.u32 %v4861_v1, %v4285_v20  ;;  %v4276_v49 = vor.u32 %v4860_v34, %v4275_v36 }
 0x12c   :  { %v5837_v62 = vpop.f32.mrf.mxu1  ;;  %1278 = vmatpush.bf16.msrb.mxu0 %v4296_v52 }
 0x12d   :  { %v5833_v15 = vpop.f32.mrf.mxu2  ;;  %v5835_v57 = vpop.f32.mrf.mxu3  ;;  %6533 = vst [vmem:[#allocation30_spill] sm:$0xff] %v5837_v62 }
 0x130   :  { %v5839_v3 = vpop.f32.mrf.mxu0  ;;  %1279 = vmatpush.bf16.msrb.mxu0 %v4288_v22 }
 0x132   :  { %4157 = vmatmul.msk.bf16.gmra.mxu2 %vm354_vm0, %v5577_v46  ;;  %4166 = vmatmul.msk.bf16.gmra.mxu3 %vm354_vm0, %v5603_v53 }
 0x133   :  { %4173 = vmatmul.msk.bf16.gmra.mxu0 %vm354_vm0, %v5577_v46  ;;  %v4848_v46 = vld [vmem:[#allocation3 + $0x64] sm:$0xf0] }
 0x134   :  { %v5851_v33 = vpop.f32.mrf.mxu1  ;;  %v4228_v60 = vor.u32 %v4848_v46, %v4227_v56  ;;  %v4277_v56 = vld [vmem:[#allocation3 + $0xc8] sm:$0xf0] }
 0x135   :  { %v5847_v4 = vpop.f32.mrf.mxu2  ;;  %v560_v8 = vpop.f32.mrf.mxu3  ;;  %v4280_v52 = vor.u32 %v4859_v39, %v4277_v56  ;;  %v4259_v39 = vld [vmem:[#allocation3 + $0xa0] sm:$0xf]  ;;  %v4856_v56 = vld [vmem:[#allocation3 + $0xa4] sm:$0xf0] }
 0x136   :  { %v5849_v9 = vmul.f32 %v560_v8, %v462_v14  ;;  %v4283_v14 = vld [vmem:[#allocation3 + $0xd0] sm:$0xf]  ;;  %1131 = vmatpush.bf16.msra.mxu1 %v4228_v60  ;;  %v4260_v19 = vor.u32 %v4856_v56, %v4259_v39 }
 0x137   :  { %4152 = vmatmul.msk.bf16.gmra.mxu1 %vm354_vm0, %v5579_v47  ;;  %v4284_v8 = vor.u32 %v4862_v61, %v4283_v14  ;;  %v4267_v60 = vld [vmem:[#allocation3 + $0xb0] sm:$0xf]  ;;  %v4858_v14 = vld [vmem:[#allocation3 + $0xb4] sm:$0xf0]  ;;  %v4857_v61 = vld [vmem:[#allocation3 + $0xb4] sm:$0xf]  ;;  %1280 = vmatpush.bf16.msrb.mxu0 %v4280_v52  ;;  %v4264_v52 = vor.u32 %v4855_v28, %v4261_v11 }
 0x138   :  { %v5853_v45 = vpop.f32.mrf.mxu0  ;;  %v4268_v1 = vor.u32 %v4858_v14, %v4267_v60  ;;  %v4221_v60 = vld [vmem:[#allocation3 + $0x58] sm:$0xf0]  ;;  %v4219_v14 = vld [vmem:[#allocation3 + $0x50] sm:$0xf]  ;;  %v4844_v11 = vld [vmem:[#allocation3 + $0x44] sm:$0xf0] }
 0x139   :  { %1181 = vmatpush.bf16.msrb.mxu2 %v4284_v8  ;;  %v4269_v8 = vld [vmem:[#allocation3 + $0xb8] sm:$0xf0]  ;;  %v4243_v28 = vld [vmem:[#allocation3 + $0x80] sm:$0xf] }
 0x13a   :  { %v4272_v20 = vor.u32 %v4857_v61, %v4269_v8  ;;  %v4846_v8 = vld [vmem:[#allocation3 + $0x54] sm:$0xf0] }
 0x13b   :  { %v4220_v62 = vor.u32 %v4846_v8, %v4219_v14  ;;  %v4852_v14 = vld [vmem:[#allocation3 + $0x84] sm:$0xf0]  ;;  %v4843_v8 = vld [vmem:[#allocation3 + $0x44] sm:$0xf] }
 0x13c   :  { %v5861_v41 = vpop.f32.mrf.mxu1  ;;  %1281 = vmatpush.bf16.msrb.mxu0 %v4272_v20  ;;  %v4211_v20 = vld [vmem:[#allocation3 + $0x40] sm:$0xf] }
 0x13d   :  { %v5857_v32 = vpop.f32.mrf.mxu2  ;;  %v5859_v29 = vpop.f32.mrf.mxu3  ;;  %6534 = vst [vmem:[#allocation31_spill] sm:$0xff] %v5861_v41  ;;  %1182 = vmatpush.bf16.msrb.mxu2 %v4276_v49  ;;  %v4845_v49 = vld [vmem:[#allocation3 + $0x54] sm:$0xf]  ;;  %1132 = vmatpush.bf16.msra.mxu1 %v4220_v62 }
 0x13e   :  { %v4224_v61 = vor.u32 %v4845_v49, %v4221_v60  ;;  %v4212_v60 = vor.u32 %v4844_v11, %v4211_v20  ;;  %v4205_v11 = vld [vmem:[#allocation3 + $0x38] sm:$0xf0] }
 0x140   :  { %v5863_v46 = vpop.f32.mrf.mxu0  ;;  %1230 = vmatpush.bf16.msrb.mxu3 %v4224_v61  ;;  %1282 = vmatpush.bf16.msrb.mxu0 %v4264_v52  ;;  %v4213_v61 = vld [vmem:[#allocation3 + $0x48] sm:$0xf0]  ;;  %v4244_v52 = vor.u32 %v4852_v14, %v4243_v28 }
 0x141   :  { %1183 = vmatpush.bf16.msrb.mxu2 %v4268_v1  ;;  %v4216_v62 = vor.u32 %v4843_v8, %v4213_v61  ;;  %1133 = vmatpush.bf16.msra.mxu1 %v4212_v60  ;;  %v4195_v61 = vld [vmem:[#allocation3 + $0x20] sm:$0xf] }
 0x142   :  { %4158 = vmatmul.msk.bf16.gmra.mxu2 %vm354_vm0, %v5603_v53  ;;  %4167 = vmatmul.msk.bf16.gmra.mxu3 %vm354_vm0, %v5505_v16 }
 0x143   :  { %4174 = vmatmul.msk.bf16.gmra.mxu0 %vm354_vm0, %v5603_v53 }
 0x144   :  { %v5876_v41 = vpop.f32.mrf.mxu1  ;;  %1231 = vmatpush.bf16.msrb.mxu3 %v4216_v62  ;;  %v4187_v62 = vld [vmem:[#allocation3 + $0x10] sm:$0xf] }
 0x145   :  { %v5871_v22 = vpop.f32.mrf.mxu2  ;;  %v565_v36 = vpop.f32.mrf.mxu3  ;;  %1184 = vmatpush.bf16.msrb.mxu2 %v4260_v19 }
 0x146   :  { %6535 = vst [vmem:[#allocation32_spill] sm:$0xff] %v5871_v22  ;;  %v5874_v34 = vmul.f32 %v565_v36, %v5827_v38  ;;  %v4251_v38 = vld [vmem:[#allocation3 + $0x90] sm:$0xf]  ;;  %v4854_v36 = vld [vmem:[#allocation3 + $0x94] sm:$0xf0] }
 0x147   :  { %v4252_v40 = vor.u32 %v4854_v36, %v4251_v38  ;;  %v4253_v22 = vld [vmem:[#allocation3 + $0x98] sm:$0xf0]  ;;  %v4842_v36 = vld [vmem:[#allocation3 + $0x34] sm:$0xf0] }
 0x148   :  { %6536 = vst [vmem:[#allocation33_spill] sm:$0xff] %v5874_v34  ;;  %v5878_v53 = vpop.f32.mrf.mxu0  ;;  %v4853_v34 = vld [vmem:[#allocation3 + $0x94] sm:$0xf] }
 0x149   :  { %6537 = vst [vmem:[#allocation34_spill] sm:$0xff] %v5878_v53  ;;  %v4256_v1 = vor.u32 %v4853_v34, %v4253_v22  ;;  %1185 = vmatpush.bf16.msrb.mxu2 %v4252_v40  ;;  %v4851_v22 = vld [vmem:[#allocation3 + $0x84] sm:$0xf]  ;;  %v4245_v34 = vld [vmem:[#allocation3 + $0x88] sm:$0xf0] }
 0x14a   :  { %v4248_v38 = vor.u32 %v4851_v22, %v4245_v34  ;;  %v4203_v40 = vld [vmem:[#allocation3 + $0x30] sm:$0xf]  ;;  %v4840_v22 = vld [vmem:[#allocation3 + $0x24] sm:$0xf0]  ;;  %v4839_v34 = vld [vmem:[#allocation3 + $0x24] sm:$0xf] }
 0x14b   :  { %1283 = vmatpush.bf16.msrb.mxu0 %v4256_v1  ;;  %v4204_v20 = vor.u32 %v4842_v36, %v4203_v40  ;;  %v4841_v1 = vld [vmem:[#allocation3 + $0x34] sm:$0xf]  ;;  %v4197_v53 = vld [vmem:[#allocation3 + $0x28] sm:$0xf0] }
 0x14c   :  { %v5884_v49 = vpop.f32.mrf.mxu1  ;;  %v4208_v28 = vor.u32 %v4841_v1, %v4205_v11  ;;  %v4200_v40 = vor.u32 %v4839_v34, %v4197_v53  ;;  %v4837_v36 = vld [vmem:[#allocation3 + $0x14] sm:$0xf]  ;;  %v4189_v11 = vld [vmem:[#allocation3 + $0x18] sm:$0xf0] }
 0x14d   :  { %v5880_v39 = vpop.f32.mrf.mxu2  ;;  %v5882_v56 = vpop.f32.mrf.mxu3  ;;  %1186 = vmatpush.bf16.msrb.mxu2 %v4244_v52  ;;  %1134 = vmatpush.bf16.msra.mxu1 %v4204_v20  ;;  %v4192_v20 = vor.u32 %v4837_v36, %v4189_v11 }
 0x14e   :  { %1232 = vmatpush.bf16.msrb.mxu3 %v4208_v28 }
 0x14f   :  { %1284 = vmatpush.bf16.msrb.mxu0 %v4248_v38  ;;  %v4838_v38 = vld [vmem:[#allocation3 + $0x14] sm:$0xf0] }
 0x150   :  { %v5886_v19 = vpop.f32.mrf.mxu0  ;;  %v4188_v1 = vor.u32 %v4838_v38, %v4187_v62 }
 0x151   :  { %6538 = vst [vmem:[#allocation35_spill] sm:$0xff] %v5886_v19  ;;  %v4196_v19 = vor.u32 %v4840_v22, %v4195_v61  ;;  %v4179_v61 = vld [vmem:[#allocation3] sm:$0xf]  ;;  %v4836_v22 = vld [vmem:[#allocation3 + $0x4] sm:$0xf0] }
 0x152   :  { %4159 = vmatmul.msk.bf16.gmra.mxu2 %vm354_vm0, %v5505_v16  ;;  %4168 = vmatmul.msk.bf16.gmra.mxu3 %vm354_vm0, %v5579_v47 }
 0x153   :  { %4175 = vmatmul.msk.bf16.gmra.mxu0 %vm354_vm0, %v5505_v16  ;;  %1135 = vmatpush.bf16.msra.mxu1 %v4196_v19 }
 0x154   :  { %v638_v52 = vpop.f32.mrf.mxu1  ;;  %1233 = vmatpush.bf16.msrb.mxu3 %v4200_v40 }
 0x155   :  { %v5894_v60 = vpop.f32.mrf.mxu2  ;;  %v570_v14 = vpop.f32.mrf.mxu3 }
 0x156   :  { %6539 = vst [vmem:[#allocation36_spill] sm:$0xff] %v5894_v60  ;;  %v5897_v8 = vmul.f32 %v570_v14, %v5851_v33  ;;  %v4181_v60 = vld [vmem:[#allocation3 + $0x8] sm:$0xf0] }
 0x157   :  { %1136 = vmatpush.bf16.msra.mxu1 %v4188_v1 }
 0x158   :  { %6540 = vst [vmem:[#allocation37_spill] sm:$0xff] %v5897_v8  ;;  %v5899_v16 = vpop.f32.mrf.mxu0  ;;  %v4835_v8 = vld [vmem:[#allocation3 + $0x4] sm:$0xf]  ;;  %1234 = vmatpush.bf16.msrb.mxu3 %v4192_v20 }
 0x159   :  { %6541 = vst [vmem:[#allocation38_spill] sm:$0xff] %v5899_v16  ;;  %v4180_v16 = vor.u32 %v4836_v22, %v4179_v61  ;;  %v4184_v53 = vor.u32 %v4835_v8, %v4181_v60  ;;  %v5921_v8 = vld [vmem:[%s6546_s5] ss:$0 sm:$0xff] }
 0x15b   :  { %1137 = vmatpush.bf16.msra.mxu1 %v4180_v16 }
 0x15c   :  { %v640_v19 = vpop.f32.mrf.mxu1  ;;  %1235 = vmatpush.bf16.msrb.mxu3 %v4184_v53 }
 0x15d   :  { %v5901_v33 = vpop.f32.mrf.mxu2  ;;  %v5903_v14 = vpop.f32.mrf.mxu3 }
 0x160   :  { %v5905_v28 = vpop.f32.mrf.mxu0 }
 0x161   :  { %6542 = vst [vmem:[#allocation39_spill] sm:$0xff] %v5905_v28 }
 0x162   :  { %4160 = vmatmul.msk.bf16.gmra.mxu2 %vm354_vm0, %v5579_v47 }
 0x163   :  { %4176 = vmatmul.msk.bf16.gmra.mxu0 %vm354_vm0, %v5579_v47 }
 0x164   :  { %v643_v36 = vpop.f32.mrf.mxu1 }
 0x165   :  { %v5911_v34 = vpop.f32.mrf.mxu2  ;;  %v731_v40 = vpop.f32.mrf.mxu3 }
 0x166   :  { %6543 = vst [vmem:[#allocation40_spill] sm:$0xff] %v5911_v34  ;;  %v853_v38 = vmul.f32 %v731_v40, %v5876_v41 }
 0x168   :  { %v5913_v62 = vpop.f32.mrf.mxu0  ;;  %v885_v47 = vadd.f32 %v853_v38, %v5743_v37 }
 0x169   :  { %6544 = vst [vmem:[#allocation41_spill] sm:$0xff] %v5913_v62 }
 0x16c   :  { %v645_v62 = vpop.f32.mrf.mxu1 }
 0x16d   :  { %v5916_v1 = vpop.f32.mrf.mxu2  ;;  %v733_v60 = vpop.f32.mrf.mxu3 }
 0x16e   :  { %6545 = vst [vmem:[#allocation42_spill] sm:$0xff] %v5916_v1  ;;  %v855_v16 = vmul.f32 %v733_v60, %v5884_v49 }
 0x170   :  { %v887_v11 = vadd.f32 %v855_v16, %v5749_v42  ;;  %v780_v20 = vpop.f32.mrf.mxu0 }
 0x171   :  { %v2796_v61 = vadd.f32 %v5921_v8, %v780_v20 }
 0x172   :  { %v917_v22 = vpack.c.bf16 %v887_v11, %v885_v47 }
 0x173   :  { %v2828_v41 = vmul.f32 0.01, %v2796_v61  ;;  %vm2812_vm1 = vcmp.gt.f32.partialorder %v2796_v61, 0.0 }
 0x174   :  { %1187 = vmatmul.bf16.vlgmr.msrb.gmra.mxu2 %v917_v22  ;;  %1285 = vmatmul.bf16.vlgmr.msrb.gmra.mxu0 %v917_v22 }
 0x175   :  { %v682_v53 = vpop.f32.mrf.mxu2  ;;  %v736_v40 = vpop.f32.mrf.mxu3  ;;  %v2844_v1 = vsel %vm2812_vm1, %v2796_v61, %v2828_v41 }
 0x176   :  { %v5928_v49 = vpack.c.bf16 %v2844_v1, %v2844_v1  ;;  %v852_v37 = vmul.f32 %v682_v53, %v5751_v44  ;;  %v857_v38 = vmul.f32 %v736_v40, %v638_v52  ;;  %v648_v53 = vpop.f32.mrf.mxu1 }
 0x178   :  { %v782_v34 = vpop.f32.mrf.mxu0  ;;  %6547 = vst [vmem:[#allocation43_spill] sm:$0xff] %v5928_v49  ;;  %v2912_v11 = vunpack.c.l.b16 %v5928_v49  ;;  %v884_v41 = vadd.f32 %v852_v37, %v5759_v50 }
 0x179   :  { %v2797_v28 = vadd.f32 %v5921_v8, %v782_v34  ;;  %v889_v34 = vadd.f32 %v857_v38, %v5761_v51 }
 0x17b   :  { %vm2813_vm2 = vcmp.gt.f32.partialorder %v2797_v28, 0.0  ;;  %v2829_v42 = vmul.f32 0.01, %v2797_v28 }
 0x17d   :  { %v2845_v60 = vsel %vm2813_vm2, %v2797_v28, %v2829_v42  ;;  %v684_v16 = vpop.f32.mrf.mxu2  ;;  %v738_v47 = vpop.f32.mrf.mxu3 }
 0x17e   :  { %v5932_v20 = vpack.c.bf16 %v2845_v60, %v2845_v60  ;;  %v854_v22 = vmul.f32 %v684_v16, %v5763_v55  ;;  %v859_v61 = vmul.f32 %v738_v47, %v640_v19  ;;  %v650_v38 = vpop.f32.mrf.mxu1 }
 0x180   :  { %v2913_v1 = vunpack.c.l.b16 %v5932_v20  ;;  %v886_v44 = vadd.f32 %v854_v22, %v5767_v58  ;;  %v891_v52 = vadd.f32 %v859_v61, %v5769_v59  ;;  %v785_v28 = vpop.f32.mrf.mxu0 }
 0x181   :  { %v2798_v40 = vadd.f32 %v5921_v8, %v785_v28 }
 0x182   :  { %v5941_v42 = vpack.c.b16 %v2913_v1, %v2912_v11  ;;  %v916_v60 = vpack.c.bf16 %v886_v44, %v884_v41  ;;  %v919_v49 = vpack.c.bf16 %v891_v52, %v889_v34 }
 0x183   :  { %v2830_v55 = vmul.f32 0.01, %v2798_v40  ;;  %vm2814_vm3 = vcmp.gt.f32.partialorder %v2798_v40, 0.0 }
 0x184   :  { %1138 = vmatmul.bf16.vlgmr.msra.gmra.mxu1 %v916_v60  ;;  %1192 = vmatmul.bf16.gmra.mxu2 %v919_v49 }
 0x185   :  { %1236 = vmatmul.bf16.vlgmr.msrb.gmra.mxu3 %v916_v60  ;;  %1290 = vmatmul.bf16.gmra.mxu0 %v919_v49  ;;  %v687_v50 = vpop.f32.mrf.mxu2  ;;  %v741_v51 = vpop.f32.mrf.mxu3  ;;  %v2846_v19 = vsel %vm2814_vm3, %v2798_v40, %v2830_v55 }
 0x186   :  { %v5944_v37 = vpack.c.bf16 %v2846_v19, %v2846_v19  ;;  %v856_v16 = vmul.f32 %v687_v50, %v5771_v21  ;;  %v861_v11 = vmul.f32 %v741_v51, %v643_v36 }
 0x188   :  { %v787_v58 = vpop.f32.mrf.mxu0  ;;  %v2914_v44 = vunpack.c.l.b16 %v5944_v37  ;;  %v888_v52 = vadd.f32 %v856_v16, %v5779_v63  ;;  %v893_v28 = vadd.f32 %v861_v11, %v5781_v0  ;;  %v653_v63 = vpop.f32.mrf.mxu1 }
 0x189   :  { %v2799_v59 = vadd.f32 %v5921_v8, %v787_v58 }
 0x18b   :  { %vm2815_vm4 = vcmp.gt.f32.partialorder %v2799_v59, 0.0  ;;  %v2831_v47 = vmul.f32 0.01, %v2799_v59 }
 0x18d   :  { %v2847_v22 = vsel %vm2815_vm4, %v2799_v59, %v2831_v47  ;;  %v689_v61 = vpop.f32.mrf.mxu2  ;;  %v743_v41 = vpop.f32.mrf.mxu3 }
 0x18e   :  { %v5947_v34 = vpack.c.bf16 %v2847_v22, %v2847_v22  ;;  %v858_v49 = vmul.f32 %v689_v61, %v5783_v2  ;;  %v863_v1 = vmul.f32 %v743_v41, %v645_v62 }
 0x190   :  { %v890_v40 = vadd.f32 %v858_v49, %v5787_v5  ;;  %v895_v21 = vadd.f32 %v863_v1, %v5789_v6  ;;  %v790_v60 = vpop.f32.mrf.mxu0  ;;  %v2915_v36 = vunpack.c.l.b16 %v5947_v34 }
 0x191   :  { %v2800_v55 = vadd.f32 %v5921_v8, %v790_v60 }
 0x192   :  { %v918_v50 = vpack.c.bf16 %v890_v40, %v888_v52  ;;  %v921_v51 = vpack.c.bf16 %v895_v21, %v893_v28  ;;  %v5957_v19 = vpack.c.b16 %v2915_v36, %v2914_v44  ;;  %v655_v52 = vpop.f32.mrf.mxu1 }
 0x193   :  { %v2832_v2 = vmul.f32 0.01, %v2800_v55  ;;  %vm2816_vm5 = vcmp.gt.f32.partialorder %v2800_v55, 0.0 }
 0x194   :  { %1143 = vmatmul.bf16.gmra.mxu1 %v918_v50  ;;  %1197 = vmatmul.bf16.gmra.mxu2 %v921_v51 }
 0x195   :  { %1241 = vmatmul.bf16.gmra.mxu3 %v918_v50  ;;  %1295 = vmatmul.bf16.gmra.mxu0 %v921_v51  ;;  %v692_v0 = vpop.f32.mrf.mxu2  ;;  %v746_v5 = vpop.f32.mrf.mxu3  ;;  %v2848_v62 = vsel %vm2816_vm5, %v2800_v55, %v2832_v2 }
 0x196   :  { %v5960_v59 = vpack.c.bf16 %v2848_v62, %v2848_v62  ;;  %v860_v16 = vmul.f32 %v692_v0, %v5793_v48  ;;  %v865_v11 = vmul.f32 %v746_v5, %v648_v53 }
 0x198   :  { %v792_v6 = vpop.f32.mrf.mxu0  ;;  %v2916_v28 = vunpack.c.l.b16 %v5960_v59  ;;  %v892_v40 = vadd.f32 %v860_v16, %v5801_v12  ;;  %v897_v21 = vadd.f32 %v865_v11, %v5803_v13  ;;  %v832_v16 = vmul.f32 %v5823_v26, %v5697_v10 }
 0x199   :  { %v2801_v58 = vadd.f32 %v5921_v8, %v792_v6  ;;  %v839_v11 = vmul.f32 %v5835_v57, %v5791_v7 }
 0x19b   :  { %vm2817_vm6 = vcmp.gt.f32.partialorder %v2801_v58, 0.0  ;;  %v2833_v47 = vmul.f32 0.01, %v2801_v58 }
 0x19d   :  { %v2849_v22 = vsel %vm2817_vm6, %v2801_v58, %v2833_v47  ;;  %v694_v61 = vpop.f32.mrf.mxu2  ;;  %v748_v41 = vpop.f32.mrf.mxu3  ;;  %v834_v47 = vmul.f32 %v5833_v15, %v5709_v18 }
 0x19e   :  { %v5963_v49 = vpack.c.bf16 %v2849_v22, %v2849_v22  ;;  %v862_v1 = vmul.f32 %v694_v61, %v5805_v17  ;;  %v867_v44 = vmul.f32 %v748_v41, %v650_v38 }
 0x1a0   :  { %v894_v48 = vadd.f32 %v862_v1, %v5809_v23  ;;  %v899_v60 = vadd.f32 %v867_v44, %v5811_v24  ;;  %v795_v53 = vpop.f32.mrf.mxu0  ;;  %v2917_v36 = vunpack.c.l.b16 %v5963_v49  ;;  %v658_v24 = vpop.f32.mrf.mxu1 }
 0x1a1   :  { %v2802_v55 = vadd.f32 %v5921_v8, %v795_v53 }
 0x1a2   :  { %v920_v50 = vpack.c.bf16 %v894_v48, %v892_v40  ;;  %v923_v51 = vpack.c.bf16 %v899_v60, %v897_v21  ;;  %v5973_v17 = vpack.c.b16 %v2917_v36, %v2916_v28  ;;  %v836_v36 = vmul.f32 %v5847_v4, %v5725_v27  ;;  %v4898_v27 = vld [vmem:[#allocation6 + $0xf4] sm:$0xf0] }
 0x1a3   :  { %v2834_v38 = vmul.f32 0.01, %v2802_v55  ;;  %vm2818_vm7 = vcmp.gt.f32.partialorder %v2802_v55, 0.0 }
 0x1a4   :  { %1148 = vmatmul.bf16.gmra.mxu1 %v920_v50  ;;  %1202 = vmatmul.bf16.gmra.mxu2 %v923_v51 }
 0x1a5   :  { %1246 = vmatmul.bf16.gmra.mxu3 %v920_v50  ;;  %1300 = vmatmul.bf16.gmra.mxu0 %v923_v51  ;;  %v697_v12 = vpop.f32.mrf.mxu2  ;;  %v751_v13 = vpop.f32.mrf.mxu3  ;;  %v2850_v23 = vsel %vm2818_vm7, %v2802_v55, %v2834_v38  ;;  %v838_v51 = vmul.f32 %v5857_v32, %v5731_v31  ;;  %v843_v38 = vmul.f32 %v5859_v29, %v5813_v25  ;;  %v4363_v25 = vld [vmem:[#allocation6 + $0x70] sm:$0xf] }
 0x1a6   :  { %v5976_v5 = vpack.c.bf16 %v2850_v23, %v2850_v23  ;;  %v864_v62 = vmul.f32 %v697_v12, %v5815_v54  ;;  %v869_v58 = vmul.f32 %v751_v13, %v653_v63 }
 0x1a8   :  { %v797_v2 = vpop.f32.mrf.mxu0  ;;  %v2918_v44 = vunpack.c.l.b16 %v5976_v5  ;;  %v896_v63 = vadd.f32 %v864_v62, %v832_v16  ;;  %v901_v28 = vadd.f32 %v869_v58, %v5825_v30  ;;  %v660_v57 = vpop.f32.mrf.mxu1  ;;  %v4427_v62 = vld [vmem:[#allocation6 + $0xf0] sm:$0xf] }
 0x1a9   :  { %v2803_v0 = vadd.f32 %v5921_v8, %v797_v2  ;;  %v4428_v4 = vor.u32 %v4898_v27, %v4427_v62  ;;  %v4897_v62 = vld [vmem:[#allocation6 + $0xf4] sm:$0xf] }
 0x1ab   :  { %vm2819_vm8 = vcmp.gt.f32.partialorder %v2803_v0, 0.0  ;;  %v2835_v6 = vmul.f32 0.01, %v2803_v0  ;;  %1765 = vmatpush.bf16.msra.mxu2 %v4428_v4  ;;  %v4429_v4 = vld [vmem:[#allocation6 + $0xf8] sm:$0xf0] }
 0x1ad   :  { %v2851_v22 = vsel %vm2819_vm8, %v2803_v0, %v2835_v6  ;;  %v699_v61 = vpop.f32.mrf.mxu2  ;;  %v753_v41 = vpop.f32.mrf.mxu3 }
 0x1ae   :  { %v5985_v8 = vpack.c.bf16 %v2851_v22, %v2851_v22  ;;  %v866_v1 = vmul.f32 %v699_v61, %v5829_v43  ;;  %v871_v54 = vmul.f32 %v753_v41, %v655_v52  ;;  %v6548_v22 = vld [vmem:[#allocation32_spill] sm:$0xff] }
 0x1af   :  { %v840_v61 = vmul.f32 %v6548_v22, %v5741_v35  ;;  %v4896_v35 = vld [vmem:[#allocation6 + $0xe4] sm:$0xf0] }
 0x1b0   :  { %v898_v10 = vadd.f32 %v866_v1, %v834_v47  ;;  %v903_v26 = vadd.f32 %v871_v54, %v839_v11  ;;  %v5990_v40 = vpop.f32.mrf.mxu0  ;;  %v2919_v18 = vunpack.c.l.b16 %v5985_v8  ;;  %v663_v53 = vpop.f32.mrf.mxu1  ;;  %v6549_v54 = vld [vmem:[#allocation29_spill] sm:$0xff]  ;;  %v6556_v22 = vld [vmem:[#allocation26_spill] sm:$0xff] }
 0x1b2   :  { %v922_v7 = vpack.c.bf16 %v898_v10, %v896_v63  ;;  %v925_v15 = vpack.c.bf16 %v903_v26, %v901_v28  ;;  %v5993_v21 = vpack.c.b16 %v2919_v18, %v2918_v44  ;;  %v842_v44 = vmul.f32 %v5880_v39, %v6549_v54  ;;  %v6550_v63 = vld [vmem:[#allocation30_spill] sm:$0xff]  ;;  %v4355_v39 = vld [vmem:[#allocation6 + $0x60] sm:$0xf] }
 0x1b3   :  { %v847_v28 = vmul.f32 %v5882_v56, %v6550_v63  ;;  %v6551_v10 = vld [vmem:[#allocation34_spill] sm:$0xff] }
 0x1b4   :  { %1153 = vmatmul.bf16.gmra.mxu1 %v922_v7  ;;  %1207 = vmatmul.bf16.gmra.mxu2 %v925_v15  ;;  %v6558_v54 = vld [vmem:[#allocation38_spill] sm:$0xff] }
 0x1b5   :  { %1251 = vmatmul.bf16.gmra.mxu3 %v922_v7  ;;  %1305 = vmatmul.bf16.gmra.mxu0 %v925_v15  ;;  %v702_v43 = vpop.f32.mrf.mxu2  ;;  %v756_v52 = vpop.f32.mrf.mxu3  ;;  %v6552_v15 = vld [vmem:[#allocation33_spill] sm:$0xff] }
 0x1b6   :  { %v868_v30 = vmul.f32 %v702_v43, %v5839_v3  ;;  %v873_v60 = vmul.f32 %v756_v52, %v658_v24 }
 0x1b8   :  { %v5995_v48 = vpop.f32.mrf.mxu0  ;;  %v900_v23 = vadd.f32 %v868_v30, %v836_v36  ;;  %v905_v2 = vadd.f32 %v873_v60, %v5849_v9  ;;  %v665_v29 = vpop.f32.mrf.mxu1  ;;  %v4419_v30 = vld [vmem:[#allocation6 + $0xe0] sm:$0xf]  ;;  %v4881_v36 = vld [vmem:[#allocation6 + $0x74] sm:$0xf] }
 0x1bd   :  { %v704_v55 = vpop.f32.mrf.mxu2  ;;  %v758_v50 = vpop.f32.mrf.mxu3 }
 0x1be   :  { %v870_v12 = vmul.f32 %v704_v55, %v5853_v45  ;;  %v875_v13 = vmul.f32 %v758_v50, %v660_v57  ;;  %v4882_v45 = vld [vmem:[#allocation6 + $0x74] sm:$0xf0]  ;;  %v4365_v55 = vld [vmem:[#allocation6 + $0x78] sm:$0xf0] }
 0x1bf   :  { %v4364_v9 = vor.u32 %v4882_v45, %v4363_v25  ;;  %v4368_v56 = vor.u32 %v4881_v36, %v4365_v55  ;;  %v6554_v45 = vld [vmem:[#allocation25_spill] sm:$0xff]  ;;  %v4878_v36 = vld [vmem:[#allocation6 + $0x54] sm:$0xf0]  ;;  %v4877_v55 = vld [vmem:[#allocation6 + $0x54] sm:$0xf] }
 0x1c0   :  { %v902_v3 = vadd.f32 %v870_v12, %v838_v51  ;;  %v907_v24 = vadd.f32 %v875_v13, %v843_v38  ;;  %v6006_v0 = vpop.f32.mrf.mxu0  ;;  %v668_v60 = vpop.f32.mrf.mxu1  ;;  %v4880_v38 = vld [vmem:[#allocation6 + $0x64] sm:$0xf0] }
 0x1c1   :  { %1716 = vmatpush.bf16.msrb.mxu1 %v4364_v9  ;;  %v4356_v12 = vor.u32 %v4880_v38, %v4355_v39  ;;  %1814 = vmatpush.bf16.msra.mxu3 %v4368_v56  ;;  %v4893_v56 = vld [vmem:[#allocation6 + $0xd4] sm:$0xf]  ;;  %v4413_v38 = vld [vmem:[#allocation6 + $0xd8] sm:$0xf0] }
 0x1c2   :  { %v924_v6 = vpack.c.bf16 %v902_v3, %v900_v23  ;;  %v927_v58 = vpack.c.bf16 %v907_v24, %v905_v2  ;;  %v4411_v3 = vld [vmem:[#allocation6 + $0xd0] sm:$0xf]  ;;  %v4894_v24 = vld [vmem:[#allocation6 + $0xd4] sm:$0xf0] }
 0x1c3   :  { %v4412_v27 = vor.u32 %v4894_v24, %v4411_v3  ;;  %v4339_v3 = vld [vmem:[#allocation6 + $0x40] sm:$0xf]  ;;  %v4876_v24 = vld [vmem:[#allocation6 + $0x44] sm:$0xf0] }
 0x1c4   :  { %1158 = vmatmul.bf16.gmra.mxu1 %v924_v6  ;;  %1212 = vmatmul.bf16.gmra.mxu2 %v927_v58 }
 0x1c5   :  { %1256 = vmatmul.bf16.gmra.mxu3 %v924_v6  ;;  %1310 = vmatmul.bf16.gmra.mxu0 %v927_v58  ;;  %v707_v31 = vpop.f32.mrf.mxu2  ;;  %v761_v32 = vpop.f32.mrf.mxu3  ;;  %v4432_v58 = vor.u32 %v4897_v62, %v4429_v4  ;;  %v4403_v62 = vld [vmem:[#allocation6 + $0xc0] sm:$0xf]  ;;  %v4892_v4 = vld [vmem:[#allocation6 + $0xc4] sm:$0xf0] }
 0x1c6   :  { %v872_v47 = vmul.f32 %v707_v31, %v5863_v46  ;;  %v877_v11 = vmul.f32 %v761_v32, %v663_v53  ;;  %v4420_v53 = vor.u32 %v4896_v35, %v4419_v30  ;;  %1717 = vmatpush.bf16.msrb.mxu1 %v4356_v12  ;;  %v6553_v31 = vld [vmem:[#allocation35_spill] sm:$0xff]  ;;  %v4895_v30 = vld [vmem:[#allocation6 + $0xe4] sm:$0xf]  ;;  %v4421_v35 = vld [vmem:[#allocation6 + $0xe8] sm:$0xf0] }
 0x1c7   :  { %1863 = vmatpush.bf16.msra.mxu0 %v4432_v58  ;;  %v4341_v58 = vld [vmem:[#allocation6 + $0x48] sm:$0xf0] }
 0x1c8   :  { %v6008_v16 = vpop.f32.mrf.mxu0  ;;  %v904_v7 = vadd.f32 %v872_v47, %v840_v61  ;;  %v909_v57 = vadd.f32 %v877_v11, %v6552_v15  ;;  %1766 = vmatpush.bf16.msra.mxu2 %v4420_v53  ;;  %v670_v6 = vpop.f32.mrf.mxu1  ;;  %v846_v61 = vmul.f32 %v5901_v33, %v6556_v22  ;;  %v4424_v53 = vor.u32 %v4895_v30, %v4421_v35  ;;  %v4874_v22 = vld [vmem:[#allocation6 + $0x34] sm:$0xf0] }
 0x1cb   :  { %1864 = vmatpush.bf16.msra.mxu0 %v4424_v53 }
 0x1cc   :  { %1767 = vmatpush.bf16.msra.mxu2 %v4412_v27  ;;  %v4340_v27 = vor.u32 %v4876_v24, %v4339_v3 }
 0x1cd   :  { %v709_v41 = vpop.f32.mrf.mxu2  ;;  %v763_v1 = vpop.f32.mrf.mxu3 }
 0x1ce   :  { %v874_v26 = vmul.f32 %v709_v41, %v6551_v10  ;;  %v879_v18 = vmul.f32 %v763_v1, %v665_v29  ;;  %v6555_v29 = vld [vmem:[#allocation36_spill] sm:$0xff]  ;;  %v6557_v41 = vld [vmem:[#allocation31_spill] sm:$0xff]  ;;  %v6559_v10 = vld [vmem:[#allocation37_spill] sm:$0xff] }
 0x1cf   :  { %v844_v9 = vmul.f32 %v6555_v29, %v6554_v45  ;;  %v851_v1 = vmul.f32 %v5903_v14, %v6557_v41  ;;  %v4347_v14 = vld [vmem:[#allocation6 + $0x50] sm:$0xf]  ;;  %v4405_v45 = vld [vmem:[#allocation6 + $0xc8] sm:$0xf0] }
 0x1d0   :  { %v906_v43 = vadd.f32 %v874_v26, %v842_v44  ;;  %v911_v46 = vadd.f32 %v879_v18, %v847_v28  ;;  %v6019_v52 = vpop.f32.mrf.mxu0  ;;  %v6561_v41 = vld [vmem:[#allocation27_spill] sm:$0xff] }
 0x1d2   :  { %v926_v50 = vpack.c.bf16 %v906_v43, %v904_v7  ;;  %v929_v51 = vpack.c.bf16 %v911_v46, %v909_v57  ;;  %v4879_v57 = vld [vmem:[#allocation6 + $0x64] sm:$0xf]  ;;  %v4357_v43 = vld [vmem:[#allocation6 + $0x68] sm:$0xf0] }
 0x1d3   :  { %v4360_v46 = vor.u32 %v4879_v57, %v4357_v43  ;;  %v6565_v43 = vld [vmem:[#allocation41_spill] sm:$0xff] }
 0x1d4   :  { %1163 = vmatmul.bf16.gmra.mxu1 %v926_v50  ;;  %1217 = vmatmul.bf16.gmra.mxu2 %v929_v51 }
 0x1d5   :  { %1261 = vmatmul.bf16.gmra.mxu3 %v926_v50  ;;  %1315 = vmatmul.bf16.gmra.mxu0 %v929_v51  ;;  %v712_v13 = vpop.f32.mrf.mxu2  ;;  %v766_v23 = vpop.f32.mrf.mxu3  ;;  %v4348_v50 = vor.u32 %v4878_v36, %v4347_v14  ;;  %v4349_v51 = vld [vmem:[#allocation6 + $0x58] sm:$0xf0] }
 0x1d6   :  { %v876_v32 = vmul.f32 %v712_v13, %v6553_v31  ;;  %v881_v25 = vmul.f32 %v766_v23, %v668_v60  ;;  %1815 = vmatpush.bf16.msra.mxu3 %v4360_v46  ;;  %v4352_v12 = vor.u32 %v4877_v55, %v4349_v51  ;;  %v4416_v13 = vor.u32 %v4893_v56, %v4413_v38  ;;  %v4323_v55 = vld [vmem:[#allocation6 + $0x20] sm:$0xf]  ;;  %v4888_v38 = vld [vmem:[#allocation6 + $0xa4] sm:$0xf0] }
 0x1d7   :  { %1718 = vmatpush.bf16.msrb.mxu1 %v4348_v50  ;;  %v4404_v31 = vor.u32 %v4892_v4, %v4403_v62  ;;  %v4387_v50 = vld [vmem:[#allocation6 + $0xa0] sm:$0xf]  ;;  %v4389_v4 = vld [vmem:[#allocation6 + $0xa8] sm:$0xf0] }
 0x1d8   :  { %v6021_v2 = vpop.f32.mrf.mxu0  ;;  %v908_v28 = vadd.f32 %v876_v32, %v844_v9  ;;  %v913_v26 = vadd.f32 %v881_v25, %v6559_v10  ;;  %1865 = vmatpush.bf16.msra.mxu0 %v4416_v13  ;;  %v4891_v25 = vld [vmem:[#allocation6 + $0xc4] sm:$0xf]  ;;  %v6560_v9 = vld [vmem:[#allocation39_spill] sm:$0xff]  ;;  %v4325_v13 = vld [vmem:[#allocation6 + $0x28] sm:$0xf0]  ;;  %v4388_v24 = vor.u32 %v4888_v38, %v4387_v50 }
 0x1d9   :  { %v4408_v29 = vor.u32 %v4891_v25, %v4405_v45  ;;  %1768 = vmatpush.bf16.msra.mxu2 %v4404_v31  ;;  %v4873_v10 = vld [vmem:[#allocation6 + $0x34] sm:$0xf]  ;;  %v4870_v31 = vld [vmem:[#allocation6 + $0x14] sm:$0xf0] }
 0x1da   :  { %1816 = vmatpush.bf16.msra.mxu3 %v4352_v12  ;;  %v4871_v12 = vld [vmem:[#allocation6 + $0x24] sm:$0xf]  ;;  %v4886_v45 = vld [vmem:[#allocation6 + $0x94] sm:$0xf0] }
 0x1db   :  { %1719 = vmatpush.bf16.msrb.mxu1 %v4340_v27  ;;  %v4328_v62 = vor.u32 %v4871_v12, %v4325_v13  ;;  %v4887_v27 = vld [vmem:[#allocation6 + $0xa4] sm:$0xf] }
 0x1dc   :  { %1866 = vmatpush.bf16.msra.mxu0 %v4408_v29  ;;  %v4869_v29 = vld [vmem:[#allocation6 + $0x14] sm:$0xf] }
 0x1dd   :  { %v714_v47 = vpop.f32.mrf.mxu2  ;;  %v768_v11 = vpop.f32.mrf.mxu3 }
 0x1de   :  { %v878_v44 = vmul.f32 %v714_v47, %v6558_v54  ;;  %v883_v63 = vmul.f32 %v768_v11, %v670_v6  ;;  %v4875_v6 = vld [vmem:[#allocation6 + $0x44] sm:$0xf]  ;;  %v4331_v11 = vld [vmem:[#allocation6 + $0x30] sm:$0xf] }
 0x1df   :  { %v4344_v32 = vor.u32 %v4875_v6, %v4341_v58  ;;  %v4392_v6 = vor.u32 %v4887_v27, %v4389_v4  ;;  %v4315_v58 = vld [vmem:[#allocation6 + $0x10] sm:$0xf] }
 0x1e0   :  { %v910_v18 = vadd.f32 %v878_v44, %v846_v61  ;;  %v915_v7 = vadd.f32 %v883_v63, %v851_v1  ;;  %v6032_v15 = vpop.f32.mrf.mxu0  ;;  %v4395_v61 = vld [vmem:[#allocation6 + $0xb0] sm:$0xf]  ;;  %v6562_v1 = vld [vmem:[#allocation40_spill] sm:$0xff]  ;;  %v4332_v63 = vor.u32 %v4874_v22, %v4331_v11  ;;  %v4316_v25 = vor.u32 %v4870_v31, %v4315_v58  ;;  %v4885_v22 = vld [vmem:[#allocation6 + $0x94] sm:$0xf] }
 0x1e1   :  { %1817 = vmatpush.bf16.msra.mxu3 %v4344_v32  ;;  %v848_v54 = vmul.f32 %v6562_v1, %v6561_v41  ;;  %v4379_v32 = vld [vmem:[#allocation6 + $0x90] sm:$0xf] }
 0x1e2   :  { %v928_v60 = vpack.c.bf16 %v910_v18, %v908_v28  ;;  %v931_v33 = vpack.c.bf16 %v915_v7, %v913_v26  ;;  %v4890_v28 = vld [vmem:[#allocation6 + $0xb4] sm:$0xf0]  ;;  %v4333_v26 = vld [vmem:[#allocation6 + $0x38] sm:$0xf0]  ;;  %v6564_v7 = vld [vmem:[#allocation42_spill] sm:$0xff]  ;;  %1720 = vmatpush.bf16.msrb.mxu1 %v4332_v63 }
 0x1e3   :  { %v6563_v18 = vld [vmem:[#allocation28_spill] sm:$0xff]  ;;  %v4396_v30 = vor.u32 %v4890_v28, %v4395_v61  ;;  %v4336_v35 = vor.u32 %v4873_v10, %v4333_v26  ;;  %v4884_v26 = vld [vmem:[#allocation6 + $0x84] sm:$0xf0] }
 0x1e4   :  { %1168 = vmatmul.bf16.gmra.mxu1 %v928_v60  ;;  %1222 = vmatmul.bf16.gmra.mxu2 %v931_v33  ;;  %v850_v57 = vmul.f32 %v6564_v7, %v6563_v18  ;;  %v4381_v61 = vld [vmem:[#allocation6 + $0x98] sm:$0xf0]  ;;  %v4371_v63 = vld [vmem:[#allocation6 + $0x80] sm:$0xf]  ;;  %v4867_v18 = vld [vmem:[#allocation6 + $0x4] sm:$0xf] }
 0x1e5   :  { %1266 = vmatmul.bf16.gmra.mxu3 %v928_v60  ;;  %1320 = vmatmul.bf16.gmra.mxu0 %v931_v33  ;;  %v717_v39 = vpop.f32.mrf.mxu2  ;;  %v4889_v60 = vld [vmem:[#allocation6 + $0xb4] sm:$0xf]  ;;  %v4397_v33 = vld [vmem:[#allocation6 + $0xb8] sm:$0xf0]  ;;  %v4384_v1 = vor.u32 %v4885_v22, %v4381_v61  ;;  %v4309_v7 = vld [vmem:[#allocation6 + $0x8] sm:$0xf0] }
 0x1e6   :  { %v880_v47 = vmul.f32 %v717_v39, %v6560_v9  ;;  %v4400_v53 = vor.u32 %v4889_v60, %v4397_v33  ;;  %1769 = vmatpush.bf16.msra.mxu2 %v4396_v30  ;;  %1818 = vmatpush.bf16.msra.mxu3 %v4336_v35  ;;  %v4872_v39 = vld [vmem:[#allocation6 + $0x24] sm:$0xf0]  ;;  %v4317_v9 = vld [vmem:[#allocation6 + $0x18] sm:$0xf0]  ;;  %v4373_v30 = vld [vmem:[#allocation6 + $0x88] sm:$0xf0] }
 0x1e7   :  { %v4324_v56 = vor.u32 %v4872_v39, %v4323_v55  ;;  %v4320_v11 = vor.u32 %v4869_v29, %v4317_v9 }
 0x1e8   :  { %v6034_v23 = vpop.f32.mrf.mxu0  ;;  %v912_v14 = vadd.f32 %v880_v47, %v848_v54  ;;  %1867 = vmatpush.bf16.msra.mxu0 %v4400_v53  ;;  %v4380_v47 = vor.u32 %v4886_v45, %v4379_v32  ;;  %v4307_v54 = vld [vmem:[#allocation6] sm:$0xf] }
 0x1e9   :  { %1721 = vmatpush.bf16.msrb.mxu1 %v4324_v56  ;;  %v964_v53 = vld [vmem:[%s6566_s4] sm:$0x3] }
 0x1ea   :  { %1770 = vmatpush.bf16.msra.mxu2 %v4388_v24  ;;  %1819 = vmatpush.bf16.msra.mxu3 %v4328_v62  ;;  %v6049_v55 = vperm.slane %v964_v53, 1 }
 0x1ec   :  { %1868 = vmatpush.bf16.msra.mxu0 %v4392_v6 }
 0x1ed   :  { %v719_v44 = vpop.f32.mrf.mxu2  ;;  %1722 = vmatpush.bf16.msrb.mxu1 %v4316_v25 }
 0x1ee   :  { %v882_v46 = vmul.f32 %v719_v44, %v6565_v43  ;;  %1771 = vmatpush.bf16.msra.mxu2 %v4380_v47  ;;  %v4868_v44 = vld [vmem:[#allocation6 + $0x4] sm:$0xf0]  ;;  %1820 = vmatpush.bf16.msra.mxu3 %v4320_v11  ;;  %v4312_v43 = vor.u32 %v4867_v18, %v4309_v7 }
 0x1ef   :  { %v4308_v10 = vor.u32 %v4868_v44, %v4307_v54 }
 0x1f0   :  { %v914_v36 = vadd.f32 %v882_v46, %v850_v57  ;;  %1869 = vmatpush.bf16.msra.mxu0 %v4384_v1  ;;  %v4372_v57 = vor.u32 %v4884_v26, %v4371_v63  ;;  %v4883_v46 = vld [vmem:[#allocation6 + $0x84] sm:$0xf] }
 0x1f1   :  { %v6042_v51 = vpop.f32.mrf.mxu0  ;;  %1723 = vmatpush.bf16.msrb.mxu1 %v4308_v10  ;;  %v4376_v35 = vor.u32 %v4883_v46, %v4373_v30 }
 0x1f2   :  { %v930_v3 = vpack.c.bf16 %v914_v36, %v912_v14  ;;  %1772 = vmatpush.bf16.msra.mxu2 %v4372_v57  ;;  %1821 = vmatpush.bf16.msra.mxu3 %v4312_v43  ;;  %v6047_v36 = vperm.slane %v964_v53, 0 }
 0x1f4   :  { %1173 = vmatmul.bf16.gmra.mxu1 %v930_v3  ;;  %1870 = vmatpush.bf16.msra.mxu0 %v4376_v35 }
 0x1f5   :  { %1271 = vmatmul.bf16.gmra.mxu3 %v930_v3 }
 0x1f7   :  { %v1188_v41 = vpop.f32.mrf.mxu2 }
 0x1f9   :  { %v1288_v28 = vpop.f32.mrf.mxu0 }
 0x1ff   :  { %v1190_v60 = vpop.f32.mrf.mxu2 }
 0x201   :  { %v1139_v33 = vpop.f32.mrf.mxu1 }
 0x202   :  { %v1291_v14 = vpop.f32.mrf.mxu0  ;;  %v1140_v56 = vadd.f32 %v1139_v33, %v6047_v36 }
 0x204   :  { %v1189_v62 = vadd.f32 %v1188_v41, %v1140_v56 }
 0x206   :  { %v1358_v31 = vmul.f32 0.01, %v1189_v62  ;;  %vm1326_vm10 = vcmp.gt.f32.partialorder %v1189_v62, 0.0 }
 0x207   :  { %v1193_v39 = vpop.f32.mrf.mxu2 }
 0x208   :  { %v1237_v50 = vpop.f32.mrf.mxu3  ;;  %v1390_v11 = vsel %vm1326_vm10, %v1189_v62, %v1358_v31 }
 0x209   :  { %v1238_v38 = vadd.f32 %v1237_v50, %v6049_v55  ;;  %v1141_v12 = vpop.f32.mrf.mxu1 }
 0x20a   :  { %v1293_v13 = vpop.f32.mrf.mxu0  ;;  %v1142_v24 = vadd.f32 %v1141_v12, %v6047_v36 }
 0x20b   :  { %v1287_v3 = vadd.f32 %v6042_v51, %v1238_v38 }
 0x20c   :  { %v1191_v4 = vadd.f32 %v1190_v60, %v1142_v24 }
 0x20d   :  { %v1359_v27 = vmul.f32 0.01, %v1287_v3  ;;  %vm1327_vm9 = vcmp.gt.f32.partialorder %v1287_v3, 0.0 }
 0x20e   :  { %v1360_v29 = vmul.f32 0.01, %v1191_v4  ;;  %vm1328_vm11 = vcmp.gt.f32.partialorder %v1191_v4, 0.0 }
 0x20f   :  { %v1195_v6 = vpop.f32.mrf.mxu2  ;;  %v1391_v45 = vsel %vm1327_vm9, %v1287_v3, %v1359_v27 }
 0x210   :  { %v1239_v58 = vpop.f32.mrf.mxu3  ;;  %v6056_v22 = vpack.c.bf16 %v1391_v45, %v1390_v11  ;;  %v1392_v61 = vsel %vm1328_vm11, %v1191_v4, %v1360_v29 }
 0x211   :  { %v1240_v32 = vadd.f32 %v1239_v58, %v6049_v55  ;;  %v1144_v25 = vpop.f32.mrf.mxu1 }
 0x212   :  { %v1296_v47 = vpop.f32.mrf.mxu0  ;;  %v1145_v63 = vadd.f32 %v1144_v25, %v6047_v36  ;;  %v1493_v7 = vunpack.c.h.b16 %v6056_v22 }
 0x213   :  { %v1289_v9 = vadd.f32 %v1288_v28, %v1240_v32  ;;  %v1492_v28 = vunpack.c.l.b16 %v6056_v22 }
 0x214   :  { %v1194_v60 = vadd.f32 %v1193_v39, %v1145_v63 }
 0x215   :  { %vm1329_vm12 = vcmp.gt.f32.partialorder %v1289_v9, 0.0  ;;  %v1361_v51 = vmul.f32 0.01, %v1289_v9 }
 0x216   :  { %v1362_v12 = vmul.f32 0.01, %v1194_v60  ;;  %vm1330_vm14 = vcmp.gt.f32.partialorder %v1194_v60, 0.0 }
 0x217   :  { %v1393_v41 = vsel %vm1329_vm12, %v1289_v9, %v1361_v51  ;;  %v1198_v1 = vpop.f32.mrf.mxu2 }
 0x218   :  { %v6058_v54 = vpack.c.bf16 %v1393_v41, %v1392_v61  ;;  %v1242_v44 = vpop.f32.mrf.mxu3  ;;  %v1394_v39 = vsel %vm1330_vm14, %v1194_v60, %v1362_v12 }
 0x219   :  { %v1243_v10 = vadd.f32 %v1242_v44, %v6049_v55  ;;  %v1146_v26 = vpop.f32.mrf.mxu1 }
 0x21a   :  { %v1494_v18 = vunpack.c.l.b16 %v6058_v54  ;;  %v1495_v57 = vunpack.c.h.b16 %v6058_v54  ;;  %v1147_v46 = vadd.f32 %v1146_v26, %v6047_v36  ;;  %v1298_v33 = vpop.f32.mrf.mxu0 }
 0x21b   :  { %v1292_v43 = vadd.f32 %v1291_v14, %v1243_v10 }
 0x21c   :  { %v1524_v30 = vpack.c.b16 %v1494_v18, %v1492_v28  ;;  %v1525_v35 = vpack.c.b16 %v1495_v57, %v1493_v7  ;;  %v1196_v50 = vadd.f32 %v1195_v6, %v1147_v46 }
 0x21d   :  { %v1363_v53 = vmul.f32 0.01, %v1292_v43  ;;  %vm1331_vm13 = vcmp.gt.f32.partialorder %v1292_v43, 0.0 }
 0x21e   :  { %1724 = vmatmul.bf16.vlgmr.msrb.gmra.mxu1 %v1524_v30  ;;  %1773 = vmatmul.bf16.vlgmr.msra.gmra.mxu2 %v1525_v35  ;;  %v1364_v62 = vmul.f32 0.01, %v1196_v50  ;;  %vm1332_vm15 = vcmp.gt.f32.partialorder %v1196_v50, 0.0 }
 0x21f   :  { %1822 = vmatmul.bf16.vlgmr.msra.gmra.mxu3 %v1524_v30  ;;  %1871 = vmatmul.bf16.vlgmr.msra.gmra.mxu0 %v1525_v35  ;;  %v1200_v56 = vpop.f32.mrf.mxu2  ;;  %v1395_v14 = vsel %vm1331_vm13, %v1292_v43, %v1363_v53 }
 0x220   :  { %v1244_v38 = vpop.f32.mrf.mxu3  ;;  %v6068_v58 = vpack.c.bf16 %v1395_v14, %v1394_v39  ;;  %v1396_v6 = vsel %vm1332_vm15, %v1196_v50, %v1364_v62 }
 0x221   :  { %v1245_v3 = vadd.f32 %v1244_v38, %v6049_v55  ;;  %v1149_v24 = vpop.f32.mrf.mxu1 }
 0x222   :  { %v1301_v45 = vpop.f32.mrf.mxu0  ;;  %v1150_v9 = vadd.f32 %v1149_v24, %v6047_v36  ;;  %v1497_v41 = vunpack.c.h.b16 %v6068_v58 }
 0x223   :  { %v1294_v27 = vadd.f32 %v1293_v13, %v1245_v3  ;;  %v1496_v13 = vunpack.c.l.b16 %v6068_v58 }
 0x224   :  { %v1199_v18 = vadd.f32 %v1198_v1, %v1150_v9 }
 0x225   :  { %vm1333_vm0 = vcmp.gt.f32.partialorder %v1294_v27, 0.0  ;;  %v1365_v4 = vmul.f32 0.01, %v1294_v27 }
 0x226   :  { %v1366_v30 = vmul.f32 0.01, %v1199_v18  ;;  %vm1334_vm2 = vcmp.gt.f32.partialorder %v1199_v18, 0.0 }
 0x227   :  { %v1397_v31 = vsel %vm1333_vm0, %v1294_v27, %v1365_v4  ;;  %v1203_v32 = vpop.f32.mrf.mxu2 }
 0x228   :  { %v6070_v25 = vpack.c.bf16 %v1397_v31, %v1396_v6  ;;  %v1247_v29 = vpop.f32.mrf.mxu3  ;;  %v1398_v1 = vsel %vm1334_vm2, %v1199_v18, %v1366_v30 }
 0x229   :  { %v1248_v11 = vadd.f32 %v1247_v29, %v6049_v55  ;;  %v1151_v51 = vpop.f32.mrf.mxu1 }
 0x22a   :  { %v1498_v61 = vunpack.c.l.b16 %v6070_v25  ;;  %v1499_v44 = vunpack.c.h.b16 %v6070_v25  ;;  %v1152_v10 = vadd.f32 %v1151_v51, %v6047_v36 }
 0x22b   :  { %v1297_v63 = vadd.f32 %v1296_v47, %v1248_v11  ;;  %v1303_v47 = vpop.f32.mrf.mxu0 }
 0x22c   :  { %v1526_v26 = vpack.c.b16 %v1498_v61, %v1496_v13  ;;  %v1527_v28 = vpack.c.b16 %v1499_v44, %v1497_v41  ;;  %v1201_v57 = vadd.f32 %v1200_v56, %v1152_v10 }
 0x22d   :  { %v1367_v7 = vmul.f32 0.01, %v1297_v63  ;;  %vm1335_vm1 = vcmp.gt.f32.partialorder %v1297_v63, 0.0 }
 0x22e   :  { %1729 = vmatmul.bf16.gmra.mxu1 %v1526_v26  ;;  %1778 = vmatmul.bf16.gmra.mxu2 %v1527_v28  ;;  %v1368_v50 = vmul.f32 0.01, %v1201_v57  ;;  %vm1336_vm3 = vcmp.gt.f32.partialorder %v1201_v57, 0.0 }
 0x22f   :  { %1827 = vmatmul.bf16.gmra.mxu3 %v1526_v26  ;;  %1876 = vmatmul.bf16.gmra.mxu0 %v1527_v28  ;;  %v1205_v43 = vpop.f32.mrf.mxu2  ;;  %v1399_v53 = vsel %vm1335_vm1, %v1297_v63, %v1367_v7 }
 0x230   :  { %v1249_v46 = vpop.f32.mrf.mxu3  ;;  %v6080_v3 = vpack.c.bf16 %v1399_v53, %v1398_v1  ;;  %v1400_v56 = vsel %vm1336_vm3, %v1201_v57, %v1368_v50 }
 0x231   :  { %v1250_v35 = vadd.f32 %v1249_v46, %v6049_v55  ;;  %v1154_v60 = vpop.f32.mrf.mxu1 }
 0x232   :  { %v1155_v39 = vadd.f32 %v1154_v60, %v6047_v36  ;;  %v1500_v31 = vunpack.c.l.b16 %v6080_v3  ;;  %v1501_v29 = vunpack.c.h.b16 %v6080_v3 }
 0x233   :  { %v1299_v38 = vadd.f32 %v1298_v33, %v1250_v35  ;;  %v1306_v13 = vpop.f32.mrf.mxu0 }
 0x234   :  { %v1204_v44 = vadd.f32 %v1203_v32, %v1155_v39 }
 0x235   :  { %vm1337_vm4 = vcmp.gt.f32.partialorder %v1299_v38, 0.0  ;;  %v1369_v12 = vmul.f32 0.01, %v1299_v38 }
 0x236   :  { %v1370_v28 = vmul.f32 0.01, %v1204_v44  ;;  %vm1338_vm6 = vcmp.gt.f32.partialorder %v1204_v44, 0.0 }
 0x237   :  { %v1401_v24 = vsel %vm1337_vm4, %v1299_v38, %v1369_v12  ;;  %v1208_v62 = vpop.f32.mrf.mxu2 }
 0x238   :  { %v6082_v14 = vpack.c.bf16 %v1401_v24, %v1400_v56  ;;  %v1252_v27 = vpop.f32.mrf.mxu3  ;;  %v1402_v35 = vsel %vm1338_vm6, %v1204_v44, %v1370_v28 }
 0x239   :  { %v1253_v4 = vadd.f32 %v1252_v27, %v6049_v55  ;;  %v1156_v6 = vpop.f32.mrf.mxu1 }
 0x23a   :  { %v1502_v33 = vunpack.c.l.b16 %v6082_v14  ;;  %v1503_v9 = vunpack.c.h.b16 %v6082_v14  ;;  %v1157_v51 = vadd.f32 %v1156_v6, %v6047_v36 }
 0x23b   :  { %v1302_v11 = vadd.f32 %v1301_v45, %v1253_v4 }
 0x23c   :  { %v1528_v61 = vpack.c.b16 %v1502_v33, %v1500_v31  ;;  %v1529_v41 = vpack.c.b16 %v1503_v9, %v1501_v29  ;;  %v1206_v10 = vadd.f32 %v1205_v43, %v1157_v51  ;;  %v1308_v43 = vpop.f32.mrf.mxu0 }
 0x23d   :  { %v1371_v63 = vmul.f32 0.01, %v1302_v11  ;;  %vm1339_vm5 = vcmp.gt.f32.partialorder %v1302_v11, 0.0 }
 0x23e   :  { %1734 = vmatmul.bf16.gmra.mxu1 %v1528_v61  ;;  %1783 = vmatmul.bf16.gmra.mxu2 %v1529_v41  ;;  %v1372_v46 = vmul.f32 0.01, %v1206_v10  ;;  %vm1340_vm7 = vcmp.gt.f32.partialorder %v1206_v10, 0.0 }
 0x23f   :  { %1832 = vmatmul.bf16.gmra.mxu3 %v1528_v61  ;;  %1881 = vmatmul.bf16.gmra.mxu0 %v1529_v41  ;;  %v1210_v45 = vpop.f32.mrf.mxu2  ;;  %v1403_v57 = vsel %vm1339_vm5, %v1302_v11, %v1371_v63 }
 0x240   :  { %v1254_v26 = vpop.f32.mrf.mxu3  ;;  %v6092_v60 = vpack.c.bf16 %v1403_v57, %v1402_v35  ;;  %v1404_v53 = vsel %vm1340_vm7, %v1206_v10, %v1372_v46 }
 0x241   :  { %v1255_v18 = vadd.f32 %v1254_v26, %v6049_v55  ;;  %v1159_v7 = vpop.f32.mrf.mxu1 }
 0x242   :  { %v1160_v12 = vadd.f32 %v1159_v7, %v6047_v36  ;;  %v1504_v27 = vunpack.c.l.b16 %v6092_v60  ;;  %v1505_v39 = vunpack.c.h.b16 %v6092_v60 }
 0x243   :  { %v1304_v30 = vadd.f32 %v1303_v47, %v1255_v18 }
 0x244   :  { %v1209_v11 = vadd.f32 %v1208_v62, %v1160_v12  ;;  %v1311_v41 = vpop.f32.mrf.mxu0 }
 0x245   :  { %vm1341_vm8 = vcmp.gt.f32.partialorder %v1304_v30, 0.0  ;;  %v1373_v32 = vmul.f32 0.01, %v1304_v30 }
 0x246   :  { %v1374_v63 = vmul.f32 0.01, %v1209_v11  ;;  %vm1342_vm10 = vcmp.gt.f32.partialorder %v1209_v11, 0.0 }
 0x247   :  { %v1405_v50 = vsel %vm1341_vm8, %v1304_v30, %v1373_v32  ;;  %v1213_v33 = vpop.f32.mrf.mxu2 }
 0x248   :  { %v6094_v38 = vpack.c.bf16 %v1405_v50, %v1404_v53  ;;  %v1257_v1 = vpop.f32.mrf.mxu3  ;;  %v1406_v7 = vsel %vm1342_vm10, %v1209_v11, %v1374_v63  ;;  %v4913_v50 = vld [vmem:[#allocation8 + $0x74] sm:$0xf] }
 0x249   :  { %v1258_v56 = vadd.f32 %v1257_v1, %v6049_v55  ;;  %v1161_v24 = vpop.f32.mrf.mxu1  ;;  %v4493_v1 = vld [vmem:[#allocation8 + $0x78] sm:$0xf0] }
 0x24a   :  { %v1506_v47 = vunpack.c.l.b16 %v6094_v38  ;;  %v1507_v4 = vunpack.c.h.b16 %v6094_v38  ;;  %v1162_v31 = vadd.f32 %v1161_v24, %v6047_v36 }
 0x24b   :  { %v1307_v6 = vadd.f32 %v1306_v13, %v1258_v56 }
 0x24c   :  { %v1530_v29 = vpack.c.b16 %v1506_v47, %v1504_v27  ;;  %v1531_v9 = vpack.c.b16 %v1507_v4, %v1505_v39  ;;  %v1211_v61 = vadd.f32 %v1210_v45, %v1162_v31  ;;  %v1313_v24 = vpop.f32.mrf.mxu0 }
 0x24d   :  { %v1375_v51 = vmul.f32 0.01, %v1307_v6  ;;  %vm1343_vm9 = vcmp.gt.f32.partialorder %v1307_v6, 0.0 }
 0x24e   :  { %1739 = vmatmul.bf16.gmra.mxu1 %v1530_v29  ;;  %1788 = vmatmul.bf16.gmra.mxu2 %v1531_v9  ;;  %v1376_v28 = vmul.f32 0.01, %v1211_v61  ;;  %vm1344_vm11 = vcmp.gt.f32.partialorder %v1211_v61, 0.0 }
 0x24f   :  { %1837 = vmatmul.bf16.gmra.mxu3 %v1530_v29  ;;  %1886 = vmatmul.bf16.gmra.mxu0 %v1531_v9  ;;  %v1407_v13 = vsel %vm1343_vm9, %v1307_v6, %v1375_v51  ;;  %v1215_v45 = vpop.f32.mrf.mxu2 }
 0x250   :  { %v1259_v44 = vpop.f32.mrf.mxu3  ;;  %v6104_v57 = vpack.c.bf16 %v1407_v13, %v1406_v7  ;;  %v1408_v46 = vsel %vm1344_vm11, %v1211_v61, %v1376_v28 }
 0x251   :  { %v1260_v10 = vadd.f32 %v1259_v44, %v6049_v55  ;;  %v1164_v26 = vpop.f32.mrf.mxu1 }
 0x252   :  { %v1165_v32 = vadd.f32 %v1164_v26, %v6047_v36  ;;  %v1508_v27 = vunpack.c.l.b16 %v6104_v57  ;;  %v1509_v39 = vunpack.c.h.b16 %v6104_v57 }
 0x253   :  { %v1309_v18 = vadd.f32 %v1308_v43, %v1260_v10  ;;  %v4496_v43 = vor.u32 %v4913_v50, %v4493_v1  ;;  %v4911_v1 = vld [vmem:[#allocation8 + $0x64] sm:$0xf] }
 0x254   :  { %v1214_v29 = vadd.f32 %v1213_v33, %v1165_v32  ;;  %v1316_v7 = vpop.f32.mrf.mxu0 }
 0x255   :  { %vm1345_vm12 = vcmp.gt.f32.partialorder %v1309_v18, 0.0  ;;  %v1377_v62 = vmul.f32 0.01, %v1309_v18  ;;  %2320 = vmatpush.bf16.msrb.mxu3 %v4496_v43 }
 0x256   :  { %v1378_v44 = vmul.f32 0.01, %v1214_v29  ;;  %vm1346_vm14 = vcmp.gt.f32.partialorder %v1214_v29, 0.0 }
 0x257   :  { %v1409_v30 = vsel %vm1345_vm12, %v1309_v18, %v1377_v62  ;;  %v1218_v63 = vpop.f32.mrf.mxu2 }
 0x258   :  { %v6106_v35 = vpack.c.bf16 %v1409_v30, %v1408_v46  ;;  %v1262_v53 = vpop.f32.mrf.mxu3  ;;  %v1410_v33 = vsel %vm1346_vm14, %v1214_v29, %v1378_v44 }
 0x259   :  { %v1263_v12 = vadd.f32 %v1262_v53, %v6049_v55  ;;  %v1166_v56 = vpop.f32.mrf.mxu1 }
 0x25a   :  { %v1510_v47 = vunpack.c.l.b16 %v6106_v35  ;;  %v1511_v4 = vunpack.c.h.b16 %v6106_v35  ;;  %v1167_v31 = vadd.f32 %v1166_v56, %v6047_v36 }
 0x25b   :  { %v1312_v6 = vadd.f32 %v1311_v41, %v1263_v12  ;;  %v4485_v12 = vld [vmem:[#allocation8 + $0x68] sm:$0xf0] }
 0x25c   :  { %v1532_v9 = vpack.c.b16 %v1510_v47, %v1508_v27  ;;  %v1533_v11 = vpack.c.b16 %v1511_v4, %v1509_v39  ;;  %v1216_v61 = vadd.f32 %v1215_v45, %v1167_v31  ;;  %v4488_v47 = vor.u32 %v4911_v1, %v4485_v12  ;;  %v4929_v12 = vld [vmem:[#allocation8 + $0xf4] sm:$0xf] }
 0x25d   :  { %v1379_v51 = vmul.f32 0.01, %v1312_v6  ;;  %vm1347_vm13 = vcmp.gt.f32.partialorder %v1312_v6, 0.0 }
 0x25e   :  { %1744 = vmatmul.bf16.gmra.mxu1 %v1532_v9  ;;  %1793 = vmatmul.bf16.gmra.mxu2 %v1533_v11  ;;  %v1380_v28 = vmul.f32 0.01, %v1216_v61  ;;  %vm1348_vm15 = vcmp.gt.f32.partialorder %v1216_v61, 0.0 }
 0x25f   :  { %1842 = vmatmul.bf16.gmra.mxu3 %v1532_v9  ;;  %1891 = vmatmul.bf16.gmra.mxu0 %v1533_v11  ;;  %v1411_v13 = vsel %vm1347_vm13, %v1312_v6, %v1379_v51  ;;  %v1220_v39 = vpop.f32.mrf.mxu2 }
 0x260   :  { %v1264_v10 = vpop.f32.mrf.mxu3  ;;  %v6116_v62 = vpack.c.bf16 %v1411_v13, %v1410_v33  ;;  %v1412_v30 = vsel %vm1348_vm15, %v1216_v61, %v1380_v28  ;;  %2321 = vmatpush.bf16.msrb.mxu3 %v4488_v47  ;;  %v4914_v13 = vld [vmem:[#allocation8 + $0x74] sm:$0xf0]  ;;  %v4909_v28 = vld [vmem:[#allocation8 + $0x54] sm:$0xf] }
 0x261   :  { %v1265_v26 = vadd.f32 %v1264_v10, %v6049_v55  ;;  %v1169_v41 = vpop.f32.mrf.mxu1 }
 0x262   :  { %v1170_v45 = vadd.f32 %v1169_v41, %v6047_v36  ;;  %v1512_v27 = vunpack.c.l.b16 %v6116_v62  ;;  %v1513_v31 = vunpack.c.h.b16 %v6116_v62  ;;  %v4491_v41 = vld [vmem:[#allocation8 + $0x70] sm:$0xf] }
 0x263   :  { %v1314_v18 = vadd.f32 %v1313_v24, %v1265_v26  ;;  %v4492_v33 = vor.u32 %v4914_v13, %v4491_v41  ;;  %v4549_v41 = vld [vmem:[#allocation8 + $0xe8] sm:$0xf0]  ;;  %v4475_v13 = vld [vmem:[#allocation8 + $0x50] sm:$0xf] }
 0x264   :  { %v1219_v56 = vadd.f32 %v1218_v63, %v1170_v45  ;;  %v1318_v63 = vpop.f32.mrf.mxu0  ;;  %v4930_v45 = vld [vmem:[#allocation8 + $0xf4] sm:$0xf0] }
 0x265   :  { %vm1349_vm0 = vcmp.gt.f32.partialorder %v1314_v18, 0.0  ;;  %v1381_v46 = vmul.f32 0.01, %v1314_v18  ;;  %2222 = vmatpush.bf16.msra.mxu1 %v4492_v33 }
 0x266   :  { %v1382_v44 = vmul.f32 0.01, %v1219_v56  ;;  %vm1350_vm1 = vcmp.gt.f32.partialorder %v1219_v56, 0.0 }
 0x267   :  { %v1413_v32 = vsel %vm1349_vm0, %v1314_v18, %v1381_v46  ;;  %v4555_v46 = vld [vmem:[#allocation8 + $0xf0] sm:$0xf] }
 0x268   :  { %v6119_v53 = vpack.c.bf16 %v1413_v32, %v1412_v30  ;;  %v1267_v50 = vpop.f32.mrf.mxu3  ;;  %v4556_v1 = vor.u32 %v4930_v45, %v4555_v46 }
 0x269   :  { %v1268_v43 = vadd.f32 %v1267_v50, %v6049_v55  ;;  %v1171_v24 = vpop.f32.mrf.mxu1 }
 0x26a   :  { %v1172_v4 = vadd.f32 %v1171_v24, %v6047_v36  ;;  %v1514_v6 = vunpack.c.l.b16 %v6119_v53  ;;  %v1515_v29 = vunpack.c.h.b16 %v6119_v53  ;;  %v4483_v24 = vld [vmem:[#allocation8 + $0x60] sm:$0xf]  ;;  %2271 = vmatpush.bf16.msrb.mxu2 %v4556_v1 }
 0x26b   :  { %v1317_v9 = vadd.f32 %v1316_v7, %v1268_v43  ;;  %v4477_v7 = vld [vmem:[#allocation8 + $0x58] sm:$0xf0] }
 0x26c   :  { %v1221_v11 = vadd.f32 %v1220_v39, %v1172_v4  ;;  %v1534_v51 = vpack.c.b16 %v1514_v6, %v1512_v27  ;;  %v1535_v61 = vpack.c.b16 %v1515_v29, %v1513_v31  ;;  %v4480_v50 = vor.u32 %v4909_v28, %v4477_v7  ;;  %v4557_v43 = vld [vmem:[#allocation8 + $0xf8] sm:$0xf0]  ;;  %v4912_v39 = vld [vmem:[#allocation8 + $0x64] sm:$0xf0]  ;;  %v4547_v4 = vld [vmem:[#allocation8 + $0xe0] sm:$0xf]  ;;  %v1223_v28 = vpop.f32.mrf.mxu2 }
 0x26d   :  { %vm1351_vm2 = vcmp.gt.f32.partialorder %v1317_v9, 0.0  ;;  %v1383_v10 = vmul.f32 0.01, %v1317_v9  ;;  %v4560_v47 = vor.u32 %v4929_v12, %v4557_v43  ;;  %v4928_v6 = vld [vmem:[#allocation8 + $0xe4] sm:$0xf0]  ;;  %v4484_v29 = vor.u32 %v4912_v39, %v4483_v24 }
 0x26e   :  { %v1384_v26 = vmul.f32 0.01, %v1221_v11  ;;  %1749 = vmatmul.bf16.gmra.mxu1 %v1534_v51  ;;  %1798 = vmatmul.bf16.gmra.mxu2 %v1535_v61  ;;  %vm1352_vm3 = vcmp.gt.f32.partialorder %v1221_v11, 0.0  ;;  %v4910_v7 = vld [vmem:[#allocation8 + $0x54] sm:$0xf0] }
 0x26f   :  { %1847 = vmatmul.bf16.gmra.mxu3 %v1534_v51  ;;  %1896 = vmatmul.bf16.gmra.mxu0 %v1535_v61  ;;  %v1415_v27 = vsel %vm1351_vm2, %v1317_v9, %v1383_v10  ;;  %v4548_v51 = vor.u32 %v4928_v6, %v4547_v4  ;;  %v4927_v61 = vld [vmem:[#allocation8 + $0xe4] sm:$0xf]  ;;  %v1414_v9 = vsel %vm1350_vm1, %v1219_v56, %v1382_v44  ;;  %v4925_v39 = vld [vmem:[#allocation8 + $0xd4] sm:$0xf] }
 0x270   :  { %v1269_v18 = vpop.f32.mrf.mxu3  ;;  %2322 = vmatpush.bf16.msrb.mxu3 %v4480_v50  ;;  %2369 = vmatpush.bf16.msrb.mxu0 %v4560_v47  ;;  %v6131_v46 = vpack.c.bf16 %v1415_v27, %v1414_v9  ;;  %v1416_v45 = vsel %vm1352_vm3, %v1221_v11, %v1384_v26  ;;  %v1321_v50 = vpop.f32.mrf.mxu0  ;;  %v4539_v26 = vld [vmem:[#allocation8 + $0xd0] sm:$0xf]  ;;  %v4926_v47 = vld [vmem:[#allocation8 + $0xd4] sm:$0xf0] }
 0x271   :  { %v1270_v30 = vadd.f32 %v1269_v18, %v6049_v55  ;;  %v1174_v32 = vpop.f32.mrf.mxu1  ;;  %v4552_v18 = vor.u32 %v4927_v61, %v4549_v41  ;;  %2223 = vmatpush.bf16.msra.mxu1 %v4484_v29  ;;  %2272 = vmatpush.bf16.msrb.mxu2 %v4548_v51  ;;  %v4541_v29 = vld [vmem:[#allocation8 + $0xd8] sm:$0xf0] }
 0x272   :  { %v1175_v33 = vadd.f32 %v1174_v32, %v6047_v36  ;;  %v1516_v24 = vunpack.c.l.b16 %v6131_v46  ;;  %v1517_v27 = vunpack.c.h.b16 %v6131_v46  ;;  %v4544_v41 = vor.u32 %v4925_v39, %v4541_v29 }
 0x273   :  { %v1319_v31 = vadd.f32 %v1318_v63, %v1270_v30  ;;  %v4476_v63 = vor.u32 %v4910_v7, %v4475_v13  ;;  %v4467_v13 = vld [vmem:[#allocation8 + $0x40] sm:$0xf] }
 0x274   :  { %2370 = vmatpush.bf16.msrb.mxu0 %v4552_v18  ;;  %v6135_v43 = vadd.f32 %v1223_v28, %v1175_v33  ;;  %v4908_v28 = vld [vmem:[#allocation8 + $0x44] sm:$0xf0]  ;;  %v4907_v18 = vld [vmem:[#allocation8 + $0x44] sm:$0xf]  ;;  %v1225_v33 = vpop.f32.mrf.mxu2 }
 0x275   :  { %vm1353_vm4 = vcmp.gt.f32.partialorder %v1319_v31, 0.0  ;;  %v1385_v10 = vmul.f32 0.01, %v1319_v31  ;;  %2224 = vmatpush.bf16.msra.mxu1 %v4476_v63  ;;  %v4468_v9 = vor.u32 %v4908_v28, %v4467_v13  ;;  %v4921_v13 = vld [vmem:[#allocation8 + $0xb4] sm:$0xf] }
 0x276   :  { %v1386_v7 = vmul.f32 0.01, %v6135_v43  ;;  %vm1354_vm6 = vcmp.gt.f32.partialorder %v6135_v43, 0.0 }
 0x277   :  { %v1417_v30 = vsel %vm1353_vm4, %v1319_v31, %v1385_v10  ;;  %v4540_v31 = vor.u32 %v4926_v47, %v4539_v26  ;;  %v4469_v10 = vld [vmem:[#allocation8 + $0x48] sm:$0xf0] }
 0x278   :  { %v6133_v1 = vpack.c.bf16 %v1417_v30, %v1416_v45  ;;  %v1272_v12 = vpop.f32.mrf.mxu3  ;;  %v4472_v45 = vor.u32 %v4907_v18, %v4469_v10  ;;  %2371 = vmatpush.bf16.msrb.mxu0 %v4544_v41  ;;  %v4922_v41 = vld [vmem:[#allocation8 + $0xb4] sm:$0xf0]  ;;  %v4525_v10 = vld [vmem:[#allocation8 + $0xb8] sm:$0xf0] }
 0x279   :  { %v1273_v56 = vadd.f32 %v1272_v12, %v6049_v55  ;;  %v1176_v44 = vpop.f32.mrf.mxu1  ;;  %2273 = vmatpush.bf16.msrb.mxu2 %v4540_v31  ;;  %v4923_v12 = vld [vmem:[#allocation8 + $0xc4] sm:$0xf]  ;;  %2225 = vmatpush.bf16.msra.mxu1 %v4468_v9  ;;  %v1323_v31 = vpop.f32.mrf.mxu0 }
 0x27a   :  { %v1518_v32 = vunpack.c.l.b16 %v6133_v1  ;;  %v1519_v11 = vunpack.c.h.b16 %v6133_v1  ;;  %v1177_v6 = vadd.f32 %v1176_v44, %v6047_v36  ;;  %v4531_v36 = vld [vmem:[#allocation8 + $0xc0] sm:$0xf]  ;;  %2323 = vmatpush.bf16.msrb.mxu3 %v4472_v45 }
 0x27b   :  { %v1322_v4 = vadd.f32 %v1321_v50, %v1273_v56  ;;  %v4924_v50 = vld [vmem:[#allocation8 + $0xc4] sm:$0xf0]  ;;  %v4533_v56 = vld [vmem:[#allocation8 + $0xc8] sm:$0xf0]  ;;  %v4451_v45 = vld [vmem:[#allocation8 + $0x20] sm:$0xf] }
 0x27c   :  { %v1536_v51 = vpack.c.b16 %v1518_v32, %v1516_v24  ;;  %v1537_v61 = vpack.c.b16 %v1519_v11, %v1517_v27  ;;  %v1226_v30 = vadd.f32 %v1225_v33, %v1177_v6  ;;  %v4532_v24 = vor.u32 %v4924_v50, %v4531_v36  ;;  %v4459_v32 = vld [vmem:[#allocation8 + $0x30] sm:$0xf]  ;;  %v4906_v27 = vld [vmem:[#allocation8 + $0x34] sm:$0xf0]  ;;  %v4905_v11 = vld [vmem:[#allocation8 + $0x34] sm:$0xf] }
 0x27d   :  { %vm1355_vm5 = vcmp.gt.f32.partialorder %v1322_v4, 0.0  ;;  %v1387_v63 = vmul.f32 0.01, %v1322_v4  ;;  %v4536_v47 = vor.u32 %v4923_v12, %v4533_v56  ;;  %v4460_v39 = vor.u32 %v4906_v27, %v4459_v32  ;;  %v4461_v6 = vld [vmem:[#allocation8 + $0x38] sm:$0xf0] }
 0x27e   :  { %1754 = vmatmul.bf16.gmra.mxu1 %v1536_v51  ;;  %1803 = vmatmul.bf16.gmra.mxu2 %v1537_v61  ;;  %vm1356_vm7 = vcmp.gt.f32.partialorder %v1226_v30, 0.0  ;;  %v1388_v28 = vmul.f32 0.01, %v1226_v30  ;;  %v4528_v33 = vor.u32 %v4921_v13, %v4525_v10  ;;  %v4904_v36 = vld [vmem:[#allocation8 + $0x24] sm:$0xf0] }
 0x27f   :  { %1852 = vmatmul.bf16.gmra.mxu3 %v1536_v51  ;;  %1901 = vmatmul.bf16.gmra.mxu0 %v1537_v61  ;;  %v1419_v29 = vsel %vm1355_vm5, %v1322_v4, %v1387_v63  ;;  %v4464_v51 = vor.u32 %v4905_v11, %v4461_v6  ;;  %v4523_v61 = vld [vmem:[#allocation8 + $0xb0] sm:$0xf]  ;;  %v4903_v4 = vld [vmem:[#allocation8 + $0x24] sm:$0xf]  ;;  %v4452_v12 = vor.u32 %v4904_v36, %v4451_v45  ;;  %v4453_v56 = vld [vmem:[#allocation8 + $0x28] sm:$0xf0] }
 0x280   :  { %v1274_v44 = vpop.f32.mrf.mxu3  ;;  %2274 = vmatpush.bf16.msrb.mxu2 %v4532_v24  ;;  %v4524_v9 = vor.u32 %v4922_v41, %v4523_v61  ;;  %2372 = vmatpush.bf16.msrb.mxu0 %v4536_v47  ;;  %v4515_v24 = vld [vmem:[#allocation8 + $0xa0] sm:$0xf]  ;;  %v4920_v32 = vld [vmem:[#allocation8 + $0xa4] sm:$0xf0]  ;;  %v4919_v27 = vld [vmem:[#allocation8 + $0xa4] sm:$0xf] }
 0x281   :  { %v1275_v26 = vadd.f32 %v1274_v44, %v6049_v55  ;;  %v1418_v55 = vsel %vm1354_vm6, %v6135_v43, %v1386_v7  ;;  %2226 = vmatpush.bf16.msra.mxu1 %v4460_v39  ;;  %2324 = vmatpush.bf16.msrb.mxu3 %v4464_v51  ;;  %v4456_v44 = vor.u32 %v4903_v4, %v4453_v56  ;;  %v4443_v6 = vld [vmem:[#allocation8 + $0x10] sm:$0xf]  ;;  %v4445_v41 = vld [vmem:[#allocation8 + $0x18] sm:$0xf0]  ;;  %v4918_v10 = vld [vmem:[#allocation8 + $0x94] sm:$0xf0] }
 0x282   :  { %v6150_v63 = vpack.c.bf16 %v1419_v29, %v1418_v55  ;;  %v1420_v43 = vsel %vm1356_vm7, %v1226_v30, %v1388_v28  ;;  %v4516_v11 = vor.u32 %v4920_v32, %v4515_v24  ;;  %v4901_v29 = vld [vmem:[#allocation8 + $0x14] sm:$0xf]  ;;  %v4509_v45 = vld [vmem:[#allocation8 + $0x98] sm:$0xf0]  ;;  %v4900_v56 = vld [vmem:[#allocation8 + $0x4] sm:$0xf0] }
 0x283   :  { %v1324_v18 = vadd.f32 %v1323_v31, %v1275_v26  ;;  %v4517_v26 = vld [vmem:[#allocation8 + $0xa8] sm:$0xf0]  ;;  %v4902_v31 = vld [vmem:[#allocation8 + $0x14] sm:$0xf0]  ;;  %v4917_v55 = vld [vmem:[#allocation8 + $0x94] sm:$0xf] }
 0x284   :  { %2275 = vmatpush.bf16.msrb.mxu2 %v4524_v9  ;;  %2373 = vmatpush.bf16.msrb.mxu0 %v4528_v33  ;;  %v4520_v39 = vor.u32 %v4919_v27, %v4517_v26  ;;  %v1520_v51 = vunpack.c.l.b16 %v6150_v63  ;;  %v4444_v61 = vor.u32 %v4902_v31, %v4443_v6  ;;  %v1521_v30 = vunpack.c.h.b16 %v6150_v63  ;;  %v4507_v9 = vld [vmem:[#allocation8 + $0x90] sm:$0xf]  ;;  %v4437_v32 = vld [vmem:[#allocation8 + $0x8] sm:$0xf0] }
 0x285   :  { %vm1357_vm8 = vcmp.gt.f32.partialorder %v1324_v18, 0.0  ;;  %v1389_v50 = vmul.f32 0.01, %v1324_v18  ;;  %2227 = vmatpush.bf16.msra.mxu1 %v4452_v12  ;;  %2325 = vmatpush.bf16.msrb.mxu3 %v4456_v44  ;;  %v4508_v33 = vor.u32 %v4918_v10, %v4507_v9  ;;  %v4435_v12 = vld [vmem:[#allocation8] sm:$0xf] }
 0x286   :  { %v4899_v44 = vld [vmem:[#allocation8 + $0x4] sm:$0xf]  ;;  %v4436_v24 = vor.u32 %v4900_v56, %v4435_v12  ;;  %v4501_v26 = vld [vmem:[#allocation8 + $0x88] sm:$0xf0] }
 0x287   :  { %v1421_v7 = vsel %vm1357_vm8, %v1324_v18, %v1389_v50  ;;  %v4448_v18 = vor.u32 %v4901_v29, %v4445_v41  ;;  %v4512_v50 = vor.u32 %v4917_v55, %v4509_v45  ;;  %v4440_v27 = vor.u32 %v4899_v44, %v4437_v32 }
 0x288   :  { %v6153_v47 = vpack.c.bf16 %v1421_v7, %v1420_v43  ;;  %2276 = vmatpush.bf16.msrb.mxu2 %v4516_v11  ;;  %2374 = vmatpush.bf16.msrb.mxu0 %v4520_v39  ;;  %v4499_v43 = vld [vmem:[#allocation8 + $0x80] sm:$0xf]  ;;  %v4916_v7 = vld [vmem:[#allocation8 + $0x84] sm:$0xf0]  ;;  %v4915_v11 = vld [vmem:[#allocation8 + $0x84] sm:$0xf] }
 0x289   :  { %2228 = vmatpush.bf16.msra.mxu1 %v4444_v61  ;;  %2326 = vmatpush.bf16.msrb.mxu3 %v4448_v18  ;;  %v4500_v39 = vor.u32 %v4916_v7, %v4499_v43  ;;  %v4504_v6 = vor.u32 %v4915_v11, %v4501_v26 }
 0x28a   :  { %v1522_v13 = vunpack.c.l.b16 %v6153_v47  ;;  %v1523_v28 = vunpack.c.h.b16 %v6153_v47 }
 0x28c   :  { %v1538_v36 = vpack.c.b16 %v1522_v13, %v1520_v51  ;;  %v1539_v4 = vpack.c.b16 %v1523_v28, %v1521_v30  ;;  %2277 = vmatpush.bf16.msrb.mxu2 %v4508_v33  ;;  %2375 = vmatpush.bf16.msrb.mxu0 %v4512_v50  ;;  %v1470_v51 = vld [vmem:[%s6567_s2] sm:$0x3] }
 0x28d   :  { %2229 = vmatpush.bf16.msra.mxu1 %v4436_v24  ;;  %2327 = vmatpush.bf16.msrb.mxu3 %v4440_v27  ;;  %v6162_v61 = vperm.slane %v1470_v51, 0  ;;  %v6164_v13 = vperm.slane %v1470_v51, 1 }
 0x28e   :  { %1759 = vmatmul.bf16.gmra.mxu1 %v1538_v36  ;;  %1808 = vmatmul.bf16.gmra.mxu2 %v1539_v4 }
 0x28f   :  { %1857 = vmatmul.bf16.gmra.mxu3 %v1538_v36  ;;  %1906 = vmatmul.bf16.gmra.mxu0 %v1539_v4 }
 0x290   :  { %2278 = vmatpush.bf16.msrb.mxu2 %v4500_v39  ;;  %2376 = vmatpush.bf16.msrb.mxu0 %v4504_v6 }
 0x29b   :  { %v1725_v31 = vpop.f32.mrf.mxu1 }
 0x29c   :  { %v1872_v29 = vpop.f32.mrf.mxu0  ;;  %v1726_v18 = vadd.f32 %v1725_v31, %v6162_v61 }
 0x2a1   :  { %v1774_v41 = vpop.f32.mrf.mxu2 }
 0x2a2   :  { %v1823_v30 = vpop.f32.mrf.mxu3  ;;  %v1775_v55 = vadd.f32 %v1774_v41, %v1726_v18 }
 0x2a3   :  { %v1727_v28 = vpop.f32.mrf.mxu1  ;;  %v1824_v10 = vadd.f32 %v1823_v30, %v6164_v13 }
 0x2a4   :  { %v1874_v9 = vpop.f32.mrf.mxu0  ;;  %v1728_v33 = vadd.f32 %v1727_v28, %v6162_v61  ;;  %v1944_v4 = vmul.f32 0.01, %v1775_v55  ;;  %vm1912_vm9 = vcmp.gt.f32.partialorder %v1775_v55, 0.0 }
 0x2a5   :  { %v1873_v45 = vadd.f32 %v1872_v29, %v1824_v10 }
 0x2a6   :  { %v1976_v7 = vsel %vm1912_vm9, %v1775_v55, %v1944_v4 }
 0x2a7   :  { %v1945_v27 = vmul.f32 0.01, %v1873_v45  ;;  %vm1913_vm11 = vcmp.gt.f32.partialorder %v1873_v45, 0.0 }
 0x2a9   :  { %v1776_v36 = vpop.f32.mrf.mxu2  ;;  %v1977_v6 = vsel %vm1913_vm11, %v1873_v45, %v1945_v27 }
 0x2aa   :  { %v1777_v50 = vadd.f32 %v1776_v36, %v1728_v33  ;;  %v1825_v12 = vpop.f32.mrf.mxu3 }
 0x2ab   :  { %v1826_v56 = vadd.f32 %v1825_v12, %v6164_v13  ;;  %v1730_v44 = vpop.f32.mrf.mxu1 }
 0x2ac   :  { %vm1914_vm10 = vcmp.gt.f32.partialorder %v1777_v50, 0.0  ;;  %v1946_v24 = vmul.f32 0.01, %v1777_v50  ;;  %v1877_v32 = vpop.f32.mrf.mxu0  ;;  %v1731_v28 = vadd.f32 %v1730_v44, %v6162_v61 }
 0x2ad   :  { %v1875_v43 = vadd.f32 %v1874_v9, %v1826_v56 }
 0x2ae   :  { %v1978_v11 = vsel %vm1914_vm10, %v1777_v50, %v1946_v24 }
 0x2af   :  { %v2008_v26 = vpack.c.bf16 %v1978_v11, %v1976_v7  ;;  %vm1915_vm12 = vcmp.gt.f32.partialorder %v1875_v43, 0.0  ;;  %v1947_v39 = vmul.f32 0.01, %v1875_v43 }
 0x2b1   :  { %v1979_v31 = vsel %vm1915_vm12, %v1875_v43, %v1947_v39  ;;  %v1779_v29 = vpop.f32.mrf.mxu2  ;;  %2230 = vmatmul.bf16.vlgmr.msra.gmra.mxu1 %v2008_v26  ;;  %2328 = vmatmul.bf16.vlgmr.msrb.gmra.mxu3 %v2008_v26 }
 0x2b2   :  { %v2009_v51 = vpack.c.bf16 %v1979_v31, %v1977_v6  ;;  %v1828_v41 = vpop.f32.mrf.mxu3  ;;  %v1780_v10 = vadd.f32 %v1779_v29, %v1731_v28 }
 0x2b3   :  { %v1732_v30 = vpop.f32.mrf.mxu1  ;;  %v1829_v9 = vadd.f32 %v1828_v41, %v6164_v13 }
 0x2b4   :  { %v1879_v18 = vpop.f32.mrf.mxu0  ;;  %2279 = vmatmul.bf16.vlgmr.msrb.gmra.mxu2 %v2009_v51  ;;  %2377 = vmatmul.bf16.vlgmr.msrb.gmra.mxu0 %v2009_v51  ;;  %v1733_v55 = vadd.f32 %v1732_v30, %v6162_v61  ;;  %v1948_v45 = vmul.f32 0.01, %v1780_v10  ;;  %vm1916_vm13 = vcmp.gt.f32.partialorder %v1780_v10, 0.0 }
 0x2b5   :  { %v1878_v33 = vadd.f32 %v1877_v32, %v1829_v9 }
 0x2b6   :  { %v1980_v7 = vsel %vm1916_vm13, %v1780_v10, %v1948_v45 }
 0x2b7   :  { %v1949_v27 = vmul.f32 0.01, %v1878_v33  ;;  %vm1917_vm15 = vcmp.gt.f32.partialorder %v1878_v33, 0.0 }
 0x2b9   :  { %v1781_v36 = vpop.f32.mrf.mxu2  ;;  %v1981_v6 = vsel %vm1917_vm15, %v1878_v33, %v1949_v27 }
 0x2ba   :  { %v1782_v4 = vadd.f32 %v1781_v36, %v1733_v55  ;;  %v1830_v50 = vpop.f32.mrf.mxu3 }
 0x2bb   :  { %v1831_v12 = vadd.f32 %v1830_v50, %v6164_v13  ;;  %v1735_v56 = vpop.f32.mrf.mxu1 }
 0x2bc   :  { %vm1918_vm14 = vcmp.gt.f32.partialorder %v1782_v4, 0.0  ;;  %v1950_v24 = vmul.f32 0.01, %v1782_v4  ;;  %v1882_v44 = vpop.f32.mrf.mxu0  ;;  %v1736_v30 = vadd.f32 %v1735_v56, %v6162_v61 }
 0x2bd   :  { %v1880_v43 = vadd.f32 %v1879_v18, %v1831_v12 }
 0x2be   :  { %v1982_v11 = vsel %vm1918_vm14, %v1782_v4, %v1950_v24 }
 0x2bf   :  { %v1951_v26 = vmul.f32 0.01, %v1880_v43  ;;  %v2010_v39 = vpack.c.bf16 %v1982_v11, %v1980_v7  ;;  %vm1919_vm0 = vcmp.gt.f32.partialorder %v1880_v43, 0.0 }
 0x2c1   :  { %v1784_v32 = vpop.f32.mrf.mxu2  ;;  %2235 = vmatmul.bf16.gmra.mxu1 %v2010_v39  ;;  %2333 = vmatmul.bf16.gmra.mxu3 %v2010_v39  ;;  %v1983_v31 = vsel %vm1919_vm0, %v1880_v43, %v1951_v26 }
 0x2c2   :  { %v1833_v29 = vpop.f32.mrf.mxu3  ;;  %v2011_v51 = vpack.c.bf16 %v1983_v31, %v1981_v6  ;;  %v1785_v9 = vadd.f32 %v1784_v32, %v1736_v30 }
 0x2c3   :  { %v1737_v41 = vpop.f32.mrf.mxu1  ;;  %v1834_v18 = vadd.f32 %v1833_v29, %v6164_v13 }
 0x2c4   :  { %v1884_v28 = vpop.f32.mrf.mxu0  ;;  %2284 = vmatmul.bf16.gmra.mxu2 %v2011_v51  ;;  %2382 = vmatmul.bf16.gmra.mxu0 %v2011_v51  ;;  %v1738_v10 = vadd.f32 %v1737_v41, %v6162_v61  ;;  %v1952_v45 = vmul.f32 0.01, %v1785_v9  ;;  %vm1920_vm1 = vcmp.gt.f32.partialorder %v1785_v9, 0.0 }
 0x2c5   :  { %v1883_v55 = vadd.f32 %v1882_v44, %v1834_v18 }
 0x2c6   :  { %v1984_v7 = vsel %vm1920_vm1, %v1785_v9, %v1952_v45  ;;  %v4954_v9 = vld [vmem:[#allocation11 + $0x38] sm:$0xff] }
 0x2c7   :  { %v1953_v27 = vmul.f32 0.01, %v1883_v55  ;;  %vm1921_vm3 = vcmp.gt.f32.partialorder %v1883_v55, 0.0  ;;  %2992 = vmatpush.bf16.msra.mxu3 %v4954_v9  ;;  %v4953_v9 = vld [vmem:[#allocation11 + $0x30] sm:$0xff] }
 0x2c9   :  { %v1786_v36 = vpop.f32.mrf.mxu2  ;;  %v1985_v32 = vsel %vm1921_vm3, %v1883_v55, %v1953_v27 }
 0x2ca   :  { %v1787_v4 = vadd.f32 %v1786_v36, %v1738_v10  ;;  %v1835_v50 = vpop.f32.mrf.mxu3 }
 0x2cb   :  { %v1836_v33 = vadd.f32 %v1835_v50, %v6164_v13  ;;  %v1740_v12 = vpop.f32.mrf.mxu1  ;;  %2993 = vmatpush.bf16.msra.mxu3 %v4953_v9  ;;  %v4952_v9 = vld [vmem:[#allocation11 + $0x28] sm:$0xff] }
 0x2cc   :  { %vm1922_vm2 = vcmp.gt.f32.partialorder %v1787_v4, 0.0  ;;  %v1954_v24 = vmul.f32 0.01, %v1787_v4  ;;  %v1887_v56 = vpop.f32.mrf.mxu0  ;;  %v1741_v41 = vadd.f32 %v1740_v12, %v6162_v61 }
 0x2cd   :  { %v1885_v43 = vadd.f32 %v1884_v28, %v1836_v33 }
 0x2ce   :  { %v1986_v11 = vsel %vm1922_vm2, %v1787_v4, %v1954_v24 }
 0x2cf   :  { %v1955_v26 = vmul.f32 0.01, %v1885_v43  ;;  %v2012_v39 = vpack.c.bf16 %v1986_v11, %v1984_v7  ;;  %vm1923_vm4 = vcmp.gt.f32.partialorder %v1885_v43, 0.0  ;;  %2994 = vmatpush.bf16.msra.mxu3 %v4952_v9  ;;  %v4946_v9 = vld [vmem:[#allocation9 + $0x78] sm:$0xff] }
 0x2d0   :  { %2679 = vmatpush.bf16.msra.mxu2 %v4946_v9 }
 0x2d1   :  { %v1789_v44 = vpop.f32.mrf.mxu2  ;;  %2240 = vmatmul.bf16.gmra.mxu1 %v2012_v39  ;;  %2338 = vmatmul.bf16.gmra.mxu3 %v2012_v39  ;;  %v1987_v6 = vsel %vm1923_vm4, %v1885_v43, %v1955_v26 }
 0x2d2   :  { %v1838_v31 = vpop.f32.mrf.mxu3  ;;  %v2013_v29 = vpack.c.bf16 %v1987_v6, %v1985_v32  ;;  %v1790_v18 = vadd.f32 %v1789_v44, %v1741_v41 }
 0x2d3   :  { %v1742_v51 = vpop.f32.mrf.mxu1  ;;  %v1839_v28 = vadd.f32 %v1838_v31, %v6164_v13 }
 0x2d4   :  { %v1889_v30 = vpop.f32.mrf.mxu0  ;;  %2289 = vmatmul.bf16.gmra.mxu2 %v2013_v29  ;;  %2387 = vmatmul.bf16.gmra.mxu0 %v2013_v29  ;;  %v1743_v10 = vadd.f32 %v1742_v51, %v6162_v61  ;;  %v1956_v4 = vmul.f32 0.01, %v1790_v18  ;;  %vm1924_vm5 = vcmp.gt.f32.partialorder %v1790_v18, 0.0 }
 0x2d5   :  { %v1888_v36 = vadd.f32 %v1887_v56, %v1839_v28 }
 0x2d6   :  { %v1988_v11 = vsel %vm1924_vm5, %v1790_v18, %v1956_v4 }
 0x2d7   :  { %v1957_v43 = vmul.f32 0.01, %v1888_v36  ;;  %vm1925_vm7 = vcmp.gt.f32.partialorder %v1888_v36, 0.0 }
 0x2d9   :  { %v1791_v45 = vpop.f32.mrf.mxu2  ;;  %v1989_v32 = vsel %vm1925_vm7, %v1888_v36, %v1957_v43 }
 0x2da   :  { %v1792_v55 = vadd.f32 %v1791_v45, %v1743_v10  ;;  %v1840_v50 = vpop.f32.mrf.mxu3 }
 0x2db   :  { %v1841_v33 = vadd.f32 %v1840_v50, %v6164_v13  ;;  %v1745_v24 = vpop.f32.mrf.mxu1 }
 0x2dc   :  { %vm1926_vm6 = vcmp.gt.f32.partialorder %v1792_v55, 0.0  ;;  %v1958_v12 = vmul.f32 0.01, %v1792_v55  ;;  %v1892_v27 = vpop.f32.mrf.mxu0  ;;  %v1746_v41 = vadd.f32 %v1745_v24, %v6162_v61 }
 0x2dd   :  { %v1890_v7 = vadd.f32 %v1889_v30, %v1841_v33 }
 0x2de   :  { %v1990_v26 = vsel %vm1926_vm6, %v1792_v55, %v1958_v12 }
 0x2df   :  { %v1959_v39 = vmul.f32 0.01, %v1890_v7  ;;  %v2014_v44 = vpack.c.bf16 %v1990_v26, %v1988_v11  ;;  %vm1927_vm8 = vcmp.gt.f32.partialorder %v1890_v7, 0.0 }
 0x2e1   :  { %v1794_v56 = vpop.f32.mrf.mxu2  ;;  %2245 = vmatmul.bf16.gmra.mxu1 %v2014_v44  ;;  %2343 = vmatmul.bf16.gmra.mxu3 %v2014_v44  ;;  %v1991_v6 = vsel %vm1927_vm8, %v1890_v7, %v1959_v39 }
 0x2e2   :  { %v1843_v31 = vpop.f32.mrf.mxu3  ;;  %v2015_v29 = vpack.c.bf16 %v1991_v6, %v1989_v32  ;;  %v1795_v18 = vadd.f32 %v1794_v56, %v1746_v41 }
 0x2e3   :  { %v1747_v51 = vpop.f32.mrf.mxu1  ;;  %v1844_v30 = vadd.f32 %v1843_v31, %v6164_v13 }
 0x2e4   :  { %v1894_v28 = vpop.f32.mrf.mxu0  ;;  %2294 = vmatmul.bf16.gmra.mxu2 %v2015_v29  ;;  %2392 = vmatmul.bf16.gmra.mxu0 %v2015_v29  ;;  %v1748_v10 = vadd.f32 %v1747_v51, %v6162_v61  ;;  %v1960_v55 = vmul.f32 0.01, %v1795_v18  ;;  %vm1928_vm9 = vcmp.gt.f32.partialorder %v1795_v18, 0.0 }
 0x2e5   :  { %v1893_v45 = vadd.f32 %v1892_v27, %v1844_v30 }
 0x2e6   :  { %v1992_v26 = vsel %vm1928_vm9, %v1795_v18, %v1960_v55 }
 0x2e7   :  { %v1961_v7 = vmul.f32 0.01, %v1893_v45  ;;  %vm1929_vm11 = vcmp.gt.f32.partialorder %v1893_v45, 0.0 }
 0x2e9   :  { %v1796_v4 = vpop.f32.mrf.mxu2  ;;  %v1993_v32 = vsel %vm1929_vm11, %v1893_v45, %v1961_v7 }
 0x2ea   :  { %v1797_v36 = vadd.f32 %v1796_v4, %v1748_v10  ;;  %v1845_v50 = vpop.f32.mrf.mxu3 }
 0x2eb   :  { %v1846_v33 = vadd.f32 %v1845_v50, %v6164_v13  ;;  %v1750_v12 = vpop.f32.mrf.mxu1 }
 0x2ec   :  { %vm1930_vm10 = vcmp.gt.f32.partialorder %v1797_v36, 0.0  ;;  %v1962_v24 = vmul.f32 0.01, %v1797_v36  ;;  %v1897_v43 = vpop.f32.mrf.mxu0  ;;  %v1751_v41 = vadd.f32 %v1750_v12, %v6162_v61 }
 0x2ed   :  { %v1895_v11 = vadd.f32 %v1894_v28, %v1846_v33 }
 0x2ee   :  { %v1994_v39 = vsel %vm1930_vm10, %v1797_v36, %v1962_v24 }
 0x2ef   :  { %v1963_v44 = vmul.f32 0.01, %v1895_v11  ;;  %v2016_v56 = vpack.c.bf16 %v1994_v39, %v1992_v26  ;;  %vm1931_vm12 = vcmp.gt.f32.partialorder %v1895_v11, 0.0  ;;  %v4951_v26 = vld [vmem:[#allocation11 + $0x20] sm:$0xff] }
 0x2f0   :  { %2995 = vmatpush.bf16.msra.mxu3 %v4951_v26 }
 0x2f1   :  { %v1799_v27 = vpop.f32.mrf.mxu2  ;;  %2250 = vmatmul.bf16.gmra.mxu1 %v2016_v56  ;;  %2348 = vmatmul.bf16.gmra.mxu3 %v2016_v56  ;;  %v1995_v6 = vsel %vm1931_vm12, %v1895_v11, %v1963_v44 }
 0x2f2   :  { %v1848_v31 = vpop.f32.mrf.mxu3  ;;  %v2017_v29 = vpack.c.bf16 %v1995_v6, %v1993_v32  ;;  %v1800_v18 = vadd.f32 %v1799_v27, %v1751_v41 }
 0x2f3   :  { %v1752_v51 = vpop.f32.mrf.mxu1  ;;  %v1849_v28 = vadd.f32 %v1848_v31, %v6164_v13 }
 0x2f4   :  { %v1899_v30 = vpop.f32.mrf.mxu0  ;;  %2299 = vmatmul.bf16.gmra.mxu2 %v2017_v29  ;;  %2397 = vmatmul.bf16.gmra.mxu0 %v2017_v29  ;;  %v1753_v10 = vadd.f32 %v1752_v51, %v6162_v61  ;;  %v1964_v36 = vmul.f32 0.01, %v1800_v18  ;;  %vm1932_vm13 = vcmp.gt.f32.partialorder %v1800_v18, 0.0  ;;  %v4950_v29 = vld [vmem:[#allocation11 + $0x18] sm:$0xff] }
 0x2f5   :  { %v1898_v4 = vadd.f32 %v1897_v43, %v1849_v28  ;;  %2996 = vmatpush.bf16.msra.mxu3 %v4950_v29  ;;  %v4944_v29 = vld [vmem:[#allocation9 + $0x68] sm:$0xff] }
 0x2f6   :  { %v1996_v44 = vsel %vm1932_vm13, %v1800_v18, %v1964_v36  ;;  %v4938_v18 = vld [vmem:[#allocation9 + $0x38] sm:$0xff] }
 0x2f7   :  { %v1965_v7 = vmul.f32 0.01, %v1898_v4  ;;  %vm1933_vm15 = vcmp.gt.f32.partialorder %v1898_v4, 0.0  ;;  %2630 = vmatpush.bf16.msrb.mxu1 %v4938_v18 }
 0x2f9   :  { %v1801_v55 = vpop.f32.mrf.mxu2  ;;  %v1997_v6 = vsel %vm1933_vm15, %v1898_v4, %v1965_v7  ;;  %v4945_v4 = vld [vmem:[#allocation9 + $0x70] sm:$0xff] }
 0x2fa   :  { %v1802_v45 = vadd.f32 %v1801_v55, %v1753_v10  ;;  %v1850_v50 = vpop.f32.mrf.mxu3  ;;  %v4949_v10 = vld [vmem:[#allocation11 + $0x10] sm:$0xff]  ;;  %2680 = vmatpush.bf16.msra.mxu2 %v4945_v4 }
 0x2fb   :  { %v1851_v33 = vadd.f32 %v1850_v50, %v6164_v13  ;;  %v1755_v24 = vpop.f32.mrf.mxu1  ;;  %2997 = vmatpush.bf16.msra.mxu3 %v4949_v10  ;;  %v4948_v50 = vld [vmem:[#allocation11 + $0x8] sm:$0xff] }
 0x2fc   :  { %vm1934_vm14 = vcmp.gt.f32.partialorder %v1802_v45, 0.0  ;;  %v1966_v12 = vmul.f32 0.01, %v1802_v45  ;;  %v1902_v39 = vpop.f32.mrf.mxu0 }
 0x2fd   :  { %v1900_v11 = vadd.f32 %v1899_v30, %v1851_v33  ;;  %v1756_v30 = vadd.f32 %v1755_v24, %v6162_v61 }
 0x2fe   :  { %v1998_v56 = vsel %vm1934_vm14, %v1802_v45, %v1966_v12  ;;  %v4937_v45 = vld [vmem:[#allocation9 + $0x30] sm:$0xff]  ;;  %2681 = vmatpush.bf16.msra.mxu2 %v4944_v29 }
 0x2ff   :  { %v1967_v27 = vmul.f32 0.01, %v1900_v11  ;;  %v2018_v43 = vpack.c.bf16 %v1998_v56, %v1996_v44  ;;  %vm1935_vm0 = vcmp.gt.f32.partialorder %v1900_v11, 0.0  ;;  %2631 = vmatpush.bf16.msrb.mxu1 %v4937_v45  ;;  %2998 = vmatpush.bf16.msra.mxu3 %v4948_v50  ;;  %v4943_v45 = vld [vmem:[#allocation9 + $0x60] sm:$0xff] }
 0x301   :  { %v1804_v32 = vpop.f32.mrf.mxu2  ;;  %2255 = vmatmul.bf16.gmra.mxu1 %v2018_v43  ;;  %2353 = vmatmul.bf16.gmra.mxu3 %v2018_v43  ;;  %v1999_v31 = vsel %vm1935_vm0, %v1900_v11, %v1967_v27 }
 0x302   :  { %v1853_v51 = vpop.f32.mrf.mxu3  ;;  %v2019_v41 = vpack.c.bf16 %v1999_v31, %v1997_v6  ;;  %v1805_v36 = vadd.f32 %v1804_v32, %v1756_v30  ;;  %v4936_v31 = vld [vmem:[#allocation9 + $0x28] sm:$0xff]  ;;  %2682 = vmatpush.bf16.msra.mxu2 %v4943_v45 }
 0x303   :  { %v1757_v28 = vpop.f32.mrf.mxu1  ;;  %v1854_v55 = vadd.f32 %v1853_v51, %v6164_v13  ;;  %v4947_v51 = vld [vmem:[#allocation11] sm:$0xff]  ;;  %2632 = vmatpush.bf16.msrb.mxu1 %v4936_v31 }
 0x304   :  { %2304 = vmatmul.bf16.gmra.mxu2 %v2019_v41  ;;  %2402 = vmatmul.bf16.gmra.mxu0 %v2019_v41  ;;  %v1758_v33 = vadd.f32 %v1757_v28, %v6162_v61  ;;  %v1904_v12 = vpop.f32.mrf.mxu0  ;;  %v1968_v24 = vmul.f32 0.01, %v1805_v36  ;;  %vm1936_vm1 = vcmp.gt.f32.partialorder %v1805_v36, 0.0 }
 0x305   :  { %v1903_v7 = vadd.f32 %v1902_v39, %v1854_v55  ;;  %2999 = vmatpush.bf16.msra.mxu3 %v4947_v51  ;;  %v4935_v55 = vld [vmem:[#allocation9 + $0x20] sm:$0xff] }
 0x306   :  { %v2000_v39 = vsel %vm1936_vm1, %v1805_v36, %v1968_v24  ;;  %v4934_v24 = vld [vmem:[#allocation9 + $0x18] sm:$0xff] }
 0x307   :  { %v1969_v32 = vmul.f32 0.01, %v1903_v7  ;;  %vm1937_vm3 = vcmp.gt.f32.partialorder %v1903_v7, 0.0  ;;  %2633 = vmatpush.bf16.msrb.mxu1 %v4935_v55 }
 0x309   :  { %v1806_v11 = vpop.f32.mrf.mxu2  ;;  %v2001_v9 = vsel %vm1937_vm3, %v1903_v7, %v1969_v32  ;;  %v4933_v32 = vld [vmem:[#allocation9 + $0x10] sm:$0xff] }
 0x30a   :  { %v1807_v26 = vadd.f32 %v1806_v11, %v1758_v33  ;;  %v1855_v44 = vpop.f32.mrf.mxu3 }
 0x30b   :  { %v1856_v56 = vadd.f32 %v1855_v44, %v6164_v13  ;;  %v1760_v27 = vpop.f32.mrf.mxu1  ;;  %2634 = vmatpush.bf16.msrb.mxu1 %v4934_v24  ;;  %v2056_v24 = vld [vmem:[%s6495_s8] sm:$0x3] }
 0x30c   :  { %vm1938_vm2 = vcmp.gt.f32.partialorder %v1807_v26, 0.0  ;;  %v1970_v43 = vmul.f32 0.01, %v1807_v26  ;;  %v1907_v4 = vpop.f32.mrf.mxu0  ;;  %v1761_v36 = vadd.f32 %v1760_v27, %v6162_v61 }
 0x30d   :  { %v1905_v6 = vadd.f32 %v1904_v12, %v1856_v56 }
 0x30e   :  { %v2002_v41 = vsel %vm1938_vm2, %v1807_v26, %v1970_v43  ;;  %v4942_v26 = vld [vmem:[#allocation9 + $0x58] sm:$0xff] }
 0x30f   :  { %v1971_v28 = vmul.f32 0.01, %v1905_v6  ;;  %v2020_v30 = vpack.c.bf16 %v2002_v41, %v2000_v39  ;;  %vm1939_vm4 = vcmp.gt.f32.partialorder %v1905_v6, 0.0  ;;  %2683 = vmatpush.bf16.msra.mxu2 %v4942_v26  ;;  %2635 = vmatpush.bf16.msrb.mxu1 %v4933_v32 }
 0x311   :  { %v1809_v18 = vpop.f32.mrf.mxu2  ;;  %2260 = vmatmul.bf16.gmra.mxu1 %v2020_v30  ;;  %2358 = vmatmul.bf16.gmra.mxu3 %v2020_v30  ;;  %v2003_v10 = vsel %vm1939_vm4, %v1905_v6, %v1971_v28  ;;  %v4941_v6 = vld [vmem:[#allocation9 + $0x50] sm:$0xff] }
 0x312   :  { %v1858_v50 = vpop.f32.mrf.mxu3  ;;  %v2021_v33 = vpack.c.bf16 %v2003_v10, %v2001_v9  ;;  %v1810_v44 = vadd.f32 %v1809_v18, %v1761_v36  ;;  %v4932_v18 = vld [vmem:[#allocation9 + $0x8] sm:$0xff] }
 0x313   :  { %v1859_v12 = vadd.f32 %v1858_v50, %v6164_v13  ;;  %v1762_v11 = vpop.f32.mrf.mxu1  ;;  %2684 = vmatpush.bf16.msra.mxu2 %v4941_v6  ;;  %v4940_v9 = vld [vmem:[#allocation9 + $0x48] sm:$0xff]  ;;  %2636 = vmatpush.bf16.msrb.mxu1 %v4932_v18  ;;  %v4931_v50 = vld [vmem:[#allocation9] sm:$0xff]  ;;  %v2421_v18 = vunpack.c.h.bf16 %v6058_v54 }
 0x314   :  { %2309 = vmatmul.bf16.gmra.mxu2 %v2021_v33  ;;  %2407 = vmatmul.bf16.gmra.mxu0 %v2021_v33  ;;  %v1763_v7 = vadd.f32 %v1762_v11, %v6162_v61  ;;  %v1972_v31 = vmul.f32 0.01, %v1810_v44  ;;  %vm1940_vm5 = vcmp.gt.f32.partialorder %v1810_v44, 0.0  ;;  %v1909_v39 = vpop.f32.mrf.mxu0  ;;  %v4939_v33 = vld [vmem:[#allocation9 + $0x40] sm:$0xff] }
 0x315   :  { %v1908_v56 = vadd.f32 %v1907_v4, %v1859_v12 }
 0x316   :  { %v2004_v61 = vsel %vm1940_vm5, %v1810_v44, %v1972_v31  ;;  %v6202_v44 = vperm.slane %v2056_v24, 1 }
 0x317   :  { %v1973_v28 = vmul.f32 0.01, %v1908_v56  ;;  %vm1941_vm7 = vcmp.gt.f32.partialorder %v1908_v56, 0.0  ;;  %2685 = vmatpush.bf16.msra.mxu2 %v4940_v9  ;;  %2637 = vmatpush.bf16.msrb.mxu1 %v4931_v50 }
 0x319   :  { %v1811_v43 = vpop.f32.mrf.mxu2 }
 0x31a   :  { %v1812_v29 = vadd.f32 %v1811_v43, %v1763_v7  ;;  %v1860_v51 = vpop.f32.mrf.mxu3  ;;  %v6204_v43 = vperm.slane %v2056_v24, 0 }
 0x31b   :  { %v1861_v27 = vadd.f32 %v1860_v51, %v6164_v13  ;;  %v2005_v13 = vsel %vm1941_vm7, %v1908_v56, %v1973_v28  ;;  %2686 = vmatpush.bf16.msra.mxu2 %v4939_v33  ;;  %v2419_v28 = vunpack.c.h.bf16 %v6056_v22 }
 0x31c   :  { %vm1942_vm6 = vcmp.gt.f32.partialorder %v1812_v29, 0.0  ;;  %v1974_v41 = vmul.f32 0.01, %v1812_v29 }
 0x31d   :  { %v1910_v30 = vadd.f32 %v1909_v39, %v1861_v27 }
 0x31e   :  { %v2006_v10 = vsel %vm1942_vm6, %v1812_v29, %v1974_v41 }
 0x31f   :  { %v1975_v55 = vmul.f32 0.01, %v1910_v30  ;;  %v2022_v45 = vpack.c.bf16 %v2006_v10, %v2004_v61  ;;  %vm1943_vm8 = vcmp.gt.f32.partialorder %v1910_v30, 0.0  ;;  %v2418_v61 = vunpack.c.l.bf16 %v6056_v22 }
 0x321   :  { %2265 = vmatmul.bf16.gmra.mxu1 %v2022_v45  ;;  %2363 = vmatmul.bf16.gmra.mxu3 %v2022_v45  ;;  %v2007_v4 = vsel %vm1943_vm8, %v1910_v30, %v1975_v55  ;;  %v2420_v55 = vunpack.c.l.bf16 %v6058_v54 }
 0x322   :  { %v2023_v36 = vpack.c.bf16 %v2007_v4, %v2005_v13 }
 0x324   :  { %2314 = vmatmul.bf16.gmra.mxu2 %v2023_v36  ;;  %2412 = vmatmul.bf16.gmra.mxu0 %v2023_v36 }
 0x32e   :  { %v2231_v12 = vpop.f32.mrf.mxu1 }
 0x32f   :  { %v2232_v31 = vadd.f32 %v2231_v12, %v6204_v43 }
 0x331   :  { %v2378_v11 = vpop.f32.mrf.mxu0  ;;  %3000 = vmatmul.bf16.vlgmr.msra.gmra.mxu3 %v5941_v42 }
 0x334   :  { %v2329_v26 = vpop.f32.mrf.mxu3 }
 0x335   :  { %v2330_v32 = vadd.f32 %v2329_v26, %v6202_v44 }
 0x336   :  { %v2233_v7 = vpop.f32.mrf.mxu1 }
 0x337   :  { %v2280_v56 = vpop.f32.mrf.mxu2  ;;  %v2379_v51 = vadd.f32 %v2378_v11, %v2330_v32  ;;  %v2234_v27 = vadd.f32 %v2233_v7, %v6204_v43 }
 0x338   :  { %v2281_v39 = vadd.f32 %v2280_v56, %v2232_v31 }
 0x339   :  { %v2380_v6 = vpop.f32.mrf.mxu0  ;;  %v2451_v45 = vadd.f32 %v2419_v28, %v2379_v51  ;;  %v2423_v51 = vunpack.c.h.bf16 %v6068_v58  ;;  %v2422_v28 = vunpack.c.l.bf16 %v6068_v58  ;;  %v6227_v58 = vld [vmem:[%s6546_s5] ss:$0 sm:$0xff]  ;;  %s4019_s5 = sshll.u32 %s6510_s23, 4  ;;  %s4020_s5 = int_to_ptr.hbm [resolvable:$true] %s4019_s5 }
 0x33a   :  { %v2450_v50 = vadd.f32 %v2418_v61, %v2281_v39 }
 0x33c   :  { %v2331_v29 = vpop.f32.mrf.mxu3 }
 0x33d   :  { %v2332_v42 = vadd.f32 %v2331_v29, %v6202_v44 }
 0x33e   :  { %v2236_v41 = vpop.f32.mrf.mxu1 }
 0x33f   :  { %v2381_v30 = vadd.f32 %v2380_v6, %v2332_v42  ;;  %v2282_v9 = vpop.f32.mrf.mxu2  ;;  %v2237_v56 = vadd.f32 %v2236_v41, %v6204_v43 }
 0x340   :  { %v2283_v10 = vadd.f32 %v2282_v9, %v2234_v27  ;;  %v2425_v27 = vunpack.c.h.bf16 %v6070_v25 }
 0x341   :  { %v2453_v13 = vadd.f32 %v2421_v18, %v2381_v30  ;;  %v2383_v4 = vpop.f32.mrf.mxu0  ;;  %3005 = vmatmul.bf16.gmra.mxu3 %v5957_v19  ;;  %v2424_v18 = vunpack.c.l.bf16 %v6070_v25  ;;  %v2804_v25 = vadd.f32 %v6227_v58, %v5990_v40  ;;  %v2427_v40 = vunpack.c.h.bf16 %v6080_v3 }
 0x342   :  { %v2452_v33 = vadd.f32 %v2420_v55, %v2283_v10 }
 0x343   :  { %v2483_v36 = vpack.c.bf16 %v2453_v13, %v2451_v45  ;;  %vm2820_vm9 = vcmp.gt.f32.partialorder %v2804_v25, 0.0 }
 0x344   :  { %v2482_v12 = vpack.c.bf16 %v2452_v33, %v2450_v50  ;;  %v2334_v11 = vpop.f32.mrf.mxu3 }
 0x345   :  { %2687 = vmatmul.bf16.vlgmr.msra.gmra.mxu2 %v2483_v36  ;;  %v2335_v7 = vadd.f32 %v2334_v11, %v6202_v44 }
 0x346   :  { %2638 = vmatmul.bf16.vlgmr.msrb.gmra.mxu1 %v2482_v12  ;;  %v2238_v24 = vpop.f32.mrf.mxu1  ;;  %v2805_v12 = vadd.f32 %v6227_v58, %v5995_v48 }
 0x347   :  { %v2285_v26 = vpop.f32.mrf.mxu2  ;;  %v2384_v32 = vadd.f32 %v2383_v4, %v2335_v7  ;;  %v2239_v19 = vadd.f32 %v2238_v24, %v6204_v43 }
 0x348   :  { %v2286_v31 = vadd.f32 %v2285_v26, %v2237_v56  ;;  %v2837_v56 = vmul.f32 0.01, %v2805_v12  ;;  %vm2821_vm10 = vcmp.gt.f32.partialorder %v2805_v12, 0.0 }
 0x349   :  { %v2385_v22 = vpop.f32.mrf.mxu0  ;;  %v2455_v41 = vadd.f32 %v2423_v51, %v2384_v32 }
 0x34a   :  { %v2454_v10 = vadd.f32 %v2422_v28, %v2286_v31  ;;  %v2429_v31 = vunpack.c.h.bf16 %v6082_v14 }
 0x34c   :  { %v2336_v54 = vpop.f32.mrf.mxu3 }
 0x34d   :  { %v2337_v6 = vadd.f32 %v2336_v54, %v6202_v44 }
 0x34e   :  { %v2241_v29 = vpop.f32.mrf.mxu1 }
 0x34f   :  { %v2386_v42 = vadd.f32 %v2385_v22, %v2337_v6  ;;  %v2287_v39 = vpop.f32.mrf.mxu2  ;;  %v2242_v11 = vadd.f32 %v2241_v29, %v6204_v43  ;;  %v2836_v22 = vmul.f32 0.01, %v2804_v25  ;;  %v2426_v29 = vunpack.c.l.bf16 %v6080_v3 }
 0x350   :  { %v2288_v30 = vadd.f32 %v2287_v39, %v2239_v19 }
 0x351   :  { %v2457_v9 = vadd.f32 %v2425_v27, %v2386_v42  ;;  %v2388_v61 = vpop.f32.mrf.mxu0  ;;  %3010 = vmatmul.bf16.gmra.mxu3 %v5973_v17  ;;  %v2428_v42 = vunpack.c.l.bf16 %v6082_v14 }
 0x352   :  { %v2456_v55 = vadd.f32 %v2424_v18, %v2288_v30  ;;  %v2852_v30 = vsel %vm2820_vm9, %v2804_v25, %v2836_v22  ;;  %v2853_v18 = vsel %vm2821_vm10, %v2805_v12, %v2837_v56 }
 0x353   :  { %v2485_v45 = vpack.c.bf16 %v2457_v9, %v2455_v41 }
 0x354   :  { %v2339_v13 = vpop.f32.mrf.mxu3  ;;  %v2484_v4 = vpack.c.bf16 %v2456_v55, %v2454_v10 }
 0x355   :  { %2692 = vmatmul.bf16.gmra.mxu2 %v2485_v45  ;;  %v2340_v36 = vadd.f32 %v2339_v13, %v6202_v44  ;;  %v6243_v45 = vpack.c.bf16 %v2852_v30, %v2852_v30  ;;  %v6245_v13 = vpack.c.bf16 %v2853_v18, %v2853_v18 }
 0x356   :  { %2643 = vmatmul.bf16.gmra.mxu1 %v2484_v4  ;;  %v2243_v50 = vpop.f32.mrf.mxu1  ;;  %v2806_v4 = vadd.f32 %v6227_v58, %v6006_v0 }
 0x357   :  { %v2290_v33 = vpop.f32.mrf.mxu2  ;;  %v2389_v26 = vadd.f32 %v2388_v61, %v2340_v36  ;;  %v2244_v54 = vadd.f32 %v2243_v50, %v6204_v43  ;;  %v2921_v25 = vunpack.c.l.b16 %v6245_v13  ;;  %v4962_v36 = vld [vmem:[#allocation12 + $0x38] sm:$0xff] }
 0x358   :  { %v2291_v32 = vadd.f32 %v2290_v33, %v2242_v11  ;;  %v2920_v33 = vunpack.c.l.b16 %v6243_v45  ;;  %3165 = vmatpush.bf16.msra.mxu0 %v4962_v36  ;;  %vm2822_vm11 = vcmp.gt.f32.partialorder %v2806_v4, 0.0 }
 0x359   :  { %v2390_v17 = vpop.f32.mrf.mxu0  ;;  %v2459_v27 = vadd.f32 %v2427_v40, %v2389_v26  ;;  %v2431_v40 = vunpack.c.h.bf16 %v6092_v60 }
 0x35a   :  { %v2458_v41 = vadd.f32 %v2426_v29, %v2291_v32  ;;  %v2932_v0 = vpack.c.b16 %v2921_v25, %v2920_v33  ;;  %v2432_v29 = vunpack.c.l.bf16 %v6094_v38  ;;  %v2808_v33 = vadd.f32 %v6227_v58, %v6019_v52 }
 0x35b   :  { %v2809_v25 = vadd.f32 %v6227_v58, %v6021_v2  ;;  %v2435_v52 = vunpack.c.h.bf16 %v6104_v57  ;;  %v2437_v2 = vunpack.c.h.bf16 %v6106_v35 }
 0x35c   :  { %v2341_v24 = vpop.f32.mrf.mxu3  ;;  %vm2824_vm13 = vcmp.gt.f32.partialorder %v2808_v33, 0.0 }
 0x35d   :  { %v2342_v7 = vadd.f32 %v2341_v24, %v6202_v44  ;;  %vm2825_vm14 = vcmp.gt.f32.partialorder %v2809_v25, 0.0 }
 0x35e   :  { %v2246_v6 = vpop.f32.mrf.mxu1 }
 0x35f   :  { %v2391_v19 = vadd.f32 %v2390_v17, %v2342_v7  ;;  %v2292_v48 = vpop.f32.mrf.mxu2  ;;  %v2807_v17 = vadd.f32 %v6227_v58, %v6008_v16  ;;  %v2247_v12 = vadd.f32 %v2246_v6, %v6204_v43  ;;  %v2838_v7 = vmul.f32 0.01, %v2806_v4 }
 0x360   :  { %v2293_v51 = vadd.f32 %v2292_v48, %v2244_v54  ;;  %v2433_v16 = vunpack.c.h.bf16 %v6094_v38  ;;  %v2430_v6 = vunpack.c.l.bf16 %v6092_v60 }
 0x361   :  { %v2461_v39 = vadd.f32 %v2429_v31, %v2391_v19  ;;  %v2393_v28 = vpop.f32.mrf.mxu0  ;;  %3015 = vmatmul.bf16.gmra.mxu3 %v5993_v21  ;;  %v2839_v22 = vmul.f32 0.01, %v2807_v17  ;;  %vm2823_vm12 = vcmp.gt.f32.partialorder %v2807_v17, 0.0 }
 0x362   :  { %v2460_v9 = vadd.f32 %v2428_v42, %v2293_v51 }
 0x363   :  { %v2487_v61 = vpack.c.bf16 %v2461_v39, %v2459_v27  ;;  %v2854_v39 = vsel %vm2822_vm11, %v2806_v4, %v2838_v7 }
 0x364   :  { %v2344_v10 = vpop.f32.mrf.mxu3  ;;  %v2486_v55 = vpack.c.bf16 %v2460_v9, %v2458_v41 }
 0x365   :  { %2697 = vmatmul.bf16.gmra.mxu2 %v2487_v61  ;;  %v2345_v21 = vadd.f32 %v2344_v10, %v6202_v44  ;;  %v6262_v10 = vpack.c.bf16 %v2854_v39, %v2854_v39 }
 0x366   :  { %2648 = vmatmul.bf16.gmra.mxu1 %v2486_v55  ;;  %v2248_v3 = vpop.f32.mrf.mxu1 }
 0x367   :  { %v2295_v14 = vpop.f32.mrf.mxu2  ;;  %v2394_v24 = vadd.f32 %v2393_v28, %v2345_v21  ;;  %v2249_v56 = vadd.f32 %v2248_v3, %v6204_v43  ;;  %v2855_v28 = vsel %vm2823_vm12, %v2807_v17, %v2839_v22  ;;  %v2922_v21 = vunpack.c.l.b16 %v6262_v10 }
 0x368   :  { %v2296_v54 = vadd.f32 %v2295_v14, %v2247_v12  ;;  %v6264_v55 = vpack.c.bf16 %v2855_v28, %v2855_v28 }
 0x369   :  { %v2395_v50 = vpop.f32.mrf.mxu0  ;;  %v2463_v51 = vadd.f32 %v2431_v40, %v2394_v24 }
 0x36a   :  { %v2462_v30 = vadd.f32 %v2430_v6, %v2296_v54  ;;  %v2923_v4 = vunpack.c.l.b16 %v6264_v55 }
 0x36c   :  { %v2346_v11 = vpop.f32.mrf.mxu3  ;;  %v2933_v24 = vpack.c.b16 %v2923_v4, %v2922_v21  ;;  %v2811_v21 = vadd.f32 %v6227_v58, %v6034_v23  ;;  %v2438_v23 = vunpack.c.l.bf16 %v6116_v62 }
 0x36d   :  { %v2347_v26 = vadd.f32 %v2346_v11, %v6202_v44 }
 0x36e   :  { %v2251_v32 = vpop.f32.mrf.mxu1  ;;  %vm2827_vm0 = vcmp.gt.f32.partialorder %v2811_v21, 0.0 }
 0x36f   :  { %v2396_v19 = vadd.f32 %v2395_v50, %v2347_v26  ;;  %v2297_v31 = vpop.f32.mrf.mxu2  ;;  %v4961_v50 = vld [vmem:[#allocation12 + $0x30] sm:$0xff]  ;;  %v2252_v36 = vadd.f32 %v2251_v32, %v6204_v43  ;;  %v2840_v26 = vmul.f32 0.01, %v2808_v33  ;;  %v2434_v32 = vunpack.c.l.bf16 %v6104_v57 }
 0x370   :  { %v2298_v48 = vadd.f32 %v2297_v31, %v2249_v56  ;;  %3166 = vmatpush.bf16.msra.mxu0 %v4961_v50  ;;  %v2841_v56 = vmul.f32 0.01, %v2809_v25 }
 0x371   :  { %v2465_v42 = vadd.f32 %v2433_v16, %v2396_v19  ;;  %v2398_v27 = vpop.f32.mrf.mxu0  ;;  %3020 = vmatmul.bf16.gmra.mxu3 %v2932_v0  ;;  %v2436_v16 = vunpack.c.l.bf16 %v6106_v35 }
 0x372   :  { %v2464_v18 = vadd.f32 %v2432_v29, %v2298_v48 }
 0x373   :  { %v2489_v41 = vpack.c.bf16 %v2465_v42, %v2463_v51  ;;  %v2856_v42 = vsel %vm2824_vm13, %v2808_v33, %v2840_v26  ;;  %v2439_v26 = vunpack.c.h.bf16 %v6116_v62  ;;  %v4958_v62 = vld [vmem:[#allocation12 + $0x18] sm:$0xff] }
 0x374   :  { %v2349_v9 = vpop.f32.mrf.mxu3  ;;  %v2488_v61 = vpack.c.bf16 %v2464_v18, %v2462_v30  ;;  %v6281_v18 = vpack.c.bf16 %v2856_v42, %v2856_v42 }
 0x375   :  { %2702 = vmatmul.bf16.gmra.mxu2 %v2489_v41  ;;  %v2350_v3 = vadd.f32 %v2349_v9, %v6202_v44 }
 0x376   :  { %2653 = vmatmul.bf16.gmra.mxu1 %v2488_v61  ;;  %v2253_v60 = vpop.f32.mrf.mxu1 }
 0x377   :  { %v2300_v38 = vpop.f32.mrf.mxu2  ;;  %v2399_v12 = vadd.f32 %v2398_v27, %v2350_v3  ;;  %v2254_v0 = vadd.f32 %v2253_v60, %v6204_v43  ;;  %v2857_v27 = vsel %vm2825_vm14, %v2809_v25, %v2841_v56  ;;  %v4960_v60 = vld [vmem:[#allocation12 + $0x28] sm:$0xff]  ;;  %v2843_v56 = vmul.f32 0.01, %v2811_v21 }
 0x378   :  { %v2301_v7 = vadd.f32 %v2300_v38, %v2252_v36  ;;  %v6283_v41 = vpack.c.bf16 %v2857_v27, %v2857_v27  ;;  %v2924_v38 = vunpack.c.l.b16 %v6281_v18  ;;  %3167 = vmatpush.bf16.msra.mxu0 %v4960_v60 }
 0x379   :  { %v2400_v14 = vpop.f32.mrf.mxu0  ;;  %v2467_v31 = vadd.f32 %v2435_v52, %v2399_v12 }
 0x37a   :  { %v2466_v29 = vadd.f32 %v2434_v32, %v2301_v7  ;;  %v2925_v3 = vunpack.c.l.b16 %v6283_v41 }
 0x37c   :  { %v2351_v17 = vpop.f32.mrf.mxu3 }
 0x37d   :  { %v2352_v11 = vadd.f32 %v2351_v17, %v6202_v44 }
 0x37e   :  { %v2256_v22 = vpop.f32.mrf.mxu1 }
 0x37f   :  { %v2401_v54 = vadd.f32 %v2400_v14, %v2352_v11  ;;  %v2302_v40 = vpop.f32.mrf.mxu2  ;;  %v2810_v14 = vadd.f32 %v6227_v58, %v6032_v15  ;;  %v2257_v4 = vadd.f32 %v2256_v22, %v6204_v43  ;;  %v2934_v11 = vpack.c.b16 %v2925_v3, %v2924_v38  ;;  %v4956_v3 = vld [vmem:[#allocation12 + $0x8] sm:$0xff] }
 0x380   :  { %v2303_v19 = vadd.f32 %v2302_v40, %v2254_v0  ;;  %v2441_v15 = vunpack.c.h.bf16 %v6119_v53  ;;  %v2440_v22 = vunpack.c.l.bf16 %v6119_v53  ;;  %v4959_v40 = vld [vmem:[#allocation12 + $0x20] sm:$0xff] }
 0x381   :  { %v2469_v6 = vadd.f32 %v2437_v2, %v2401_v54  ;;  %v2403_v48 = vpop.f32.mrf.mxu0  ;;  %3025 = vmatmul.bf16.gmra.mxu3 %v2933_v24  ;;  %v2842_v24 = vmul.f32 0.01, %v2810_v14  ;;  %vm2826_vm15 = vcmp.gt.f32.partialorder %v2810_v14, 0.0  ;;  %3168 = vmatpush.bf16.msra.mxu0 %v4959_v40  ;;  %v4984_v40 = vld [vmem:[#allocation17 + $0x28] sm:$0xff] }
 0x382   :  { %v2468_v51 = vadd.f32 %v2436_v16, %v2303_v19 }
 0x383   :  { %v2491_v39 = vpack.c.bf16 %v2469_v6, %v2467_v31  ;;  %v2858_v31 = vsel %vm2826_vm15, %v2810_v14, %v2842_v24  ;;  %v2859_v6 = vsel %vm2827_vm0, %v2811_v21, %v2843_v56  ;;  %v4986_v14 = vld [vmem:[#allocation17 + $0x38] sm:$0xff]  ;;  %v2444_v24 = vunpack.c.l.bf16 %v6133_v1  ;;  %v4985_v56 = vld [vmem:[#allocation17 + $0x30] sm:$0xff] }
 0x384   :  { %v2354_v28 = vpop.f32.mrf.mxu3  ;;  %v2490_v30 = vpack.c.bf16 %v2468_v51, %v2466_v29  ;;  %v6299_v51 = vpack.c.bf16 %v2858_v31, %v2858_v31  ;;  %v6301_v53 = vpack.c.bf16 %v2859_v6, %v2859_v6  ;;  %3836 = vmatpush.bf16.msrb.mxu3 %v4986_v14 }
 0x385   :  { %2707 = vmatmul.bf16.gmra.mxu2 %v2491_v39  ;;  %v2355_v9 = vadd.f32 %v2354_v28, %v6202_v44  ;;  %3169 = vmatpush.bf16.msra.mxu0 %v4958_v62  ;;  %v4957_v28 = vld [vmem:[#allocation12 + $0x10] sm:$0xff] }
 0x386   :  { %2658 = vmatmul.bf16.gmra.mxu1 %v2490_v30  ;;  %v2258_v57 = vpop.f32.mrf.mxu1 }
 0x387   :  { %v2305_v35 = vpop.f32.mrf.mxu2  ;;  %v2404_v33 = vadd.f32 %v2403_v48, %v2355_v9  ;;  %v2259_v36 = vadd.f32 %v2258_v57, %v6204_v43  ;;  %v2926_v57 = vunpack.c.l.b16 %v6299_v51 }
 0x388   :  { %v2306_v17 = vadd.f32 %v2305_v35, %v2257_v4  ;;  %v2927_v35 = vunpack.c.l.b16 %v6301_v53  ;;  %3837 = vmatpush.bf16.msrb.mxu3 %v4985_v56 }
 0x389   :  { %v2405_v61 = vpop.f32.mrf.mxu0  ;;  %v2471_v52 = vadd.f32 %v2439_v26, %v2404_v33  ;;  %3170 = vmatpush.bf16.msra.mxu0 %v4957_v28 }
 0x38a   :  { %v2470_v32 = vadd.f32 %v2438_v23, %v2306_v17  ;;  %v2935_v17 = vpack.c.b16 %v2927_v35, %v2926_v57  ;;  %v2446_v35 = vunpack.c.l.bf16 %v6150_v63 }
 0x38c   :  { %v2356_v50 = vpop.f32.mrf.mxu3  ;;  %3838 = vmatpush.bf16.msrb.mxu3 %v4984_v40 }
 0x38d   :  { %v2357_v25 = vadd.f32 %v2356_v50, %v6202_v44  ;;  %v2443_v50 = vunpack.c.h.bf16 %v6131_v46  ;;  %3171 = vmatpush.bf16.msra.mxu0 %v4956_v3 }
 0x38e   :  { %v2261_v12 = vpop.f32.mrf.mxu1 }
 0x38f   :  { %v2406_v0 = vadd.f32 %v2405_v61, %v2357_v25  ;;  %v2307_v7 = vpop.f32.mrf.mxu2  ;;  %v2262_v9 = vadd.f32 %v2261_v12, %v6204_v43  ;;  %v2445_v25 = vunpack.c.h.bf16 %v6133_v1  ;;  %v2442_v12 = vunpack.c.l.bf16 %v6131_v46 }
 0x390   :  { %v2308_v58 = vadd.f32 %v2307_v7, %v2259_v36  ;;  %v4955_v7 = vld [vmem:[#allocation12] sm:$0xff] }
 0x391   :  { %v2473_v54 = vadd.f32 %v2441_v15, %v2406_v0  ;;  %v2408_v2 = vpop.f32.mrf.mxu0  ;;  %3030 = vmatmul.bf16.gmra.mxu3 %v2934_v11  ;;  %3172 = vmatpush.bf16.msra.mxu0 %v4955_v7 }
 0x392   :  { %v2472_v19 = vadd.f32 %v2440_v22, %v2308_v58 }
 0x393   :  { %v2493_v16 = vpack.c.bf16 %v2473_v54, %v2471_v52 }
 0x394   :  { %v2359_v48 = vpop.f32.mrf.mxu3  ;;  %v2492_v29 = vpack.c.bf16 %v2472_v19, %v2470_v32  ;;  %v4983_v32 = vld [vmem:[#allocation17 + $0x20] sm:$0xff] }
 0x395   :  { %2712 = vmatmul.bf16.gmra.mxu2 %v2493_v16  ;;  %v2360_v39 = vadd.f32 %v2359_v48, %v6202_v44  ;;  %3839 = vmatpush.bf16.msrb.mxu3 %v4983_v32 }
 0x396   :  { %2663 = vmatmul.bf16.gmra.mxu1 %v2492_v29  ;;  %v2263_v42 = vpop.f32.mrf.mxu1  ;;  %v4982_v29 = vld [vmem:[#allocation17 + $0x18] sm:$0xff] }
 0x397   :  { %v2310_v27 = vpop.f32.mrf.mxu2  ;;  %v2409_v60 = vadd.f32 %v2408_v2, %v2360_v39  ;;  %v2264_v21 = vadd.f32 %v2263_v42, %v6204_v43  ;;  %v2447_v39 = vunpack.c.h.bf16 %v6150_v63 }
 0x398   :  { %v2311_v4 = vadd.f32 %v2310_v27, %v2262_v9 }
 0x399   :  { %v2410_v30 = vpop.f32.mrf.mxu0  ;;  %v2475_v26 = vadd.f32 %v2443_v50, %v2409_v60  ;;  %3840 = vmatpush.bf16.msrb.mxu3 %v4982_v29  ;;  %v6324_v50 = vld [vmem:[%s6499_s12] ss:$0 sm:$0xff] }
 0x39a   :  { %v2474_v23 = vadd.f32 %v2442_v12, %v2311_v4 }
 0x39c   :  { %v2361_v61 = vpop.f32.mrf.mxu3 }
 0x39d   :  { %v2362_v38 = vadd.f32 %v2361_v61, %v6202_v44  ;;  %v2448_v61 = vunpack.c.l.bf16 %v6153_v47 }
 0x39e   :  { %v2266_v15 = vpop.f32.mrf.mxu1 }
 0x39f   :  { %v2411_v33 = vadd.f32 %v2410_v30, %v2362_v38  ;;  %v2312_v36 = vpop.f32.mrf.mxu2  ;;  %v2267_v16 = vadd.f32 %v2266_v15, %v6204_v43  ;;  %v2449_v30 = vunpack.c.h.bf16 %v6153_v47  ;;  %v4979_v47 = vld [vmem:[#allocation17] sm:$0xff] }
 0x3a0   :  { %v2313_v11 = vadd.f32 %v2312_v36, %v2264_v21 }
 0x3a1   :  { %v2477_v0 = vadd.f32 %v2445_v25, %v2411_v33  ;;  %3035 = vmatmul.bf16.gmra.mxu3 %v2935_v17  ;;  %v2413_v52 = vpop.f32.mrf.mxu0  ;;  %v4980_v33 = vld [vmem:[#allocation17 + $0x8] sm:$0xff] }
 0x3a2   :  { %v2476_v58 = vadd.f32 %v2444_v24, %v2313_v11 }
 0x3a3   :  { %v2495_v22 = vpack.c.bf16 %v2477_v0, %v2475_v26  ;;  %v6331_v0 = vld [vmem:[%s6497_s10] ss:$0 sm:$0xff] }
 0x3a4   :  { %v2364_v54 = vpop.f32.mrf.mxu3  ;;  %v2494_v2 = vpack.c.bf16 %v2476_v58, %v2474_v23 }
 0x3a5   :  { %2717 = vmatmul.bf16.gmra.mxu2 %v2495_v22  ;;  %v2365_v1 = vadd.f32 %v2364_v54, %v6202_v44 }
 0x3a6   :  { %2668 = vmatmul.bf16.gmra.mxu1 %v2494_v2  ;;  %v2268_v19 = vpop.f32.mrf.mxu1 }
 0x3a7   :  { %v2315_v46 = vpop.f32.mrf.mxu2  ;;  %v2414_v6 = vadd.f32 %v2413_v52, %v2365_v1  ;;  %v2269_v62 = vadd.f32 %v2268_v19, %v6204_v43 }
 0x3a8   :  { %v2316_v42 = vadd.f32 %v2315_v46, %v2267_v16 }
 0x3a9   :  { %v2415_v27 = vpop.f32.mrf.mxu0  ;;  %v2479_v60 = vadd.f32 %v2447_v39, %v2414_v6 }
 0x3aa   :  { %v2478_v3 = vadd.f32 %v2446_v35, %v2316_v42 }
 0x3ac   :  { %v2366_v31 = vpop.f32.mrf.mxu3 }
 0x3ad   :  { %v2367_v48 = vadd.f32 %v2366_v31, %v6202_v44  ;;  %v4981_v44 = vld [vmem:[#allocation17 + $0x10] sm:$0xff] }
 0x3ae   :  { %3841 = vmatpush.bf16.msrb.mxu3 %v4981_v44 }
 0x3af   :  { %v2416_v28 = vadd.f32 %v2415_v27, %v2367_v48  ;;  %v2317_v57 = vpop.f32.mrf.mxu2 }
 0x3b0   :  { %v2318_v9 = vadd.f32 %v2317_v57, %v2269_v62 }
 0x3b1   :  { %v2481_v38 = vadd.f32 %v2449_v30, %v2416_v28 }
 0x3b2   :  { %v2480_v14 = vadd.f32 %v2448_v61, %v2318_v9  ;;  %3842 = vmatpush.bf16.msrb.mxu3 %v4980_v33 }
 0x3b3   :  { %v2497_v43 = vpack.c.bf16 %v2481_v38, %v2479_v60 }
 0x3b4   :  { %v3001_v21 = vpop.f32.mrf.mxu3  ;;  %v2496_v4 = vpack.c.bf16 %v2480_v14, %v2478_v3 }
 0x3b5   :  { %2722 = vmatmul.bf16.gmra.mxu2 %v2497_v43  ;;  %v3002_v63 = vadd.f32 %v6324_v50, %v3001_v21 }
 0x3b6   :  { %2673 = vmatmul.bf16.gmra.mxu1 %v2496_v4  ;;  %3843 = vmatpush.bf16.msrb.mxu3 %v4979_v47 }
 0x3b7   :  { %v3057_v36 = vmul.f32 0.01, %v3002_v63  ;;  %vm3041_vm1 = vcmp.gt.f32.partialorder %v3002_v63, 0.0 }
 0x3b9   :  { %v3073_v11 = vsel %vm3041_vm1, %v3002_v63, %v3057_v36 }
 0x3bc   :  { %v3003_v25 = vpop.f32.mrf.mxu3 }
 0x3bd   :  { %v3004_v17 = vadd.f32 %v6324_v50, %v3003_v25 }
 0x3bf   :  { %vm3042_vm2 = vcmp.gt.f32.partialorder %v3004_v17, 0.0  ;;  %v3058_v12 = vmul.f32 0.01, %v3004_v17 }
 0x3c1   :  { %v3074_v24 = vsel %vm3042_vm2, %v3004_v17, %v3058_v12 }
 0x3c2   :  { %v3089_v26 = vpack.c.bf16 %v3074_v24, %v3073_v11 }
 0x3c3   :  { %v2639_v15 = vpop.f32.mrf.mxu1 }
 0x3c4   :  { %v3006_v7 = vpop.f32.mrf.mxu3  ;;  %3173 = vmatmul.bf16.vlgmr.msra.gmra.mxu0 %v3089_v26  ;;  %v2640_v56 = vadd.f32 %v6331_v0, %v2639_v15 }
 0x3c5   :  { %v3007_v58 = vadd.f32 %v6324_v50, %v3006_v7 }
 0x3c7   :  { %v3059_v2 = vmul.f32 0.01, %v3007_v58  ;;  %vm3043_vm3 = vcmp.gt.f32.partialorder %v3007_v58, 0.0 }
 0x3c8   :  { %v2688_v23 = vpop.f32.mrf.mxu2 }
 0x3c9   :  { %v2689_v22 = vadd.f32 %v2688_v23, %v2640_v56  ;;  %v3075_v6 = vsel %vm3043_vm3, %v3007_v58, %v3059_v2 }
 0x3cb   :  { %v2641_v52 = vpop.f32.mrf.mxu1  ;;  %v2744_v40 = vmul.f32 0.01, %v2689_v22  ;;  %vm2728_vm4 = vcmp.gt.f32.partialorder %v2689_v22, 0.0 }
 0x3cc   :  { %v3008_v54 = vpop.f32.mrf.mxu3  ;;  %v2642_v1 = vadd.f32 %v6331_v0, %v2641_v52 }
 0x3cd   :  { %v3009_v46 = vadd.f32 %v6324_v50, %v3008_v54  ;;  %v2760_v16 = vsel %vm2728_vm4, %v2689_v22, %v2744_v40 }
 0x3ce   :  { %v2776_v27 = vpack.c.bf16 %v2760_v16, %v2760_v16 }
 0x3cf   :  { %vm3044_vm5 = vcmp.gt.f32.partialorder %v3009_v46, 0.0  ;;  %v3060_v32 = vmul.f32 0.01, %v3009_v46 }
 0x3d0   :  { %v2690_v19 = vpop.f32.mrf.mxu2  ;;  %v3624_v35 = vunpack.c.l.b16 %v2776_v27 }
 0x3d1   :  { %v2691_v31 = vadd.f32 %v2690_v19, %v2642_v1  ;;  %v3076_v48 = vsel %vm3044_vm5, %v3009_v46, %v3060_v32 }
 0x3d2   :  { %v3090_v29 = vpack.c.bf16 %v3076_v48, %v3075_v6 }
 0x3d3   :  { %vm2729_vm6 = vcmp.gt.f32.partialorder %v2691_v31, 0.0  ;;  %v2745_v62 = vmul.f32 0.01, %v2691_v31  ;;  %v2644_v42 = vpop.f32.mrf.mxu1 }
 0x3d4   :  { %v3011_v39 = vpop.f32.mrf.mxu3  ;;  %3178 = vmatmul.bf16.gmra.mxu0 %v3090_v29  ;;  %v2645_v57 = vadd.f32 %v6331_v0, %v2644_v42 }
 0x3d5   :  { %v2761_v28 = vsel %vm2729_vm6, %v2691_v31, %v2745_v62  ;;  %v3012_v60 = vadd.f32 %v6324_v50, %v3011_v39 }
 0x3d6   :  { %v2777_v30 = vpack.c.bf16 %v2761_v28, %v2761_v28 }
 0x3d7   :  { %v3061_v43 = vmul.f32 0.01, %v3012_v60  ;;  %vm3045_vm7 = vcmp.gt.f32.partialorder %v3012_v60, 0.0 }
 0x3d8   :  { %v3625_v9 = vunpack.c.l.b16 %v2777_v30  ;;  %v2693_v61 = vpop.f32.mrf.mxu2 }
 0x3d9   :  { %v2694_v38 = vadd.f32 %v2693_v61, %v2645_v57  ;;  %v3077_v17 = vsel %vm3045_vm7, %v3012_v60, %v3061_v43  ;;  %v4970_v43 = vld [vmem:[#allocation14 + $0x38] sm:$0xff] }
 0x3da   :  { %v3640_v44 = vpack.c.b16 %v3625_v9, %v3624_v35  ;;  %3370 = vmatpush.bf16.msra.mxu1 %v4970_v43 }
 0x3db   :  { %v2646_v3 = vpop.f32.mrf.mxu1  ;;  %v2746_v21 = vmul.f32 0.01, %v2694_v38  ;;  %vm2730_vm8 = vcmp.gt.f32.partialorder %v2694_v38, 0.0 }
 0x3dc   :  { %v3013_v14 = vpop.f32.mrf.mxu3  ;;  %3844 = vmatmul.bf16.vlgmr.msrb.gmra.mxu3 %v3640_v44  ;;  %v2647_v33 = vadd.f32 %v6331_v0, %v2646_v3 }
 0x3dd   :  { %v3014_v4 = vadd.f32 %v6324_v50, %v3013_v14  ;;  %v2762_v25 = vsel %vm2730_vm8, %v2694_v38, %v2746_v21 }
 0x3de   :  { %v2778_v15 = vpack.c.bf16 %v2762_v25, %v2762_v25 }
 0x3df   :  { %vm3046_vm9 = vcmp.gt.f32.partialorder %v3014_v4, 0.0  ;;  %v3062_v63 = vmul.f32 0.01, %v3014_v4 }
 0x3e0   :  { %v2695_v47 = vpop.f32.mrf.mxu2  ;;  %v3626_v22 = vunpack.c.l.b16 %v2778_v15 }
 0x3e1   :  { %v2696_v36 = vadd.f32 %v2695_v47, %v2647_v33  ;;  %v3078_v12 = vsel %vm3046_vm9, %v3014_v4, %v3062_v63 }
 0x3e2   :  { %v3091_v11 = vpack.c.bf16 %v3078_v12, %v3077_v17 }
 0x3e3   :  { %vm2731_vm10 = vcmp.gt.f32.partialorder %v2696_v36, 0.0  ;;  %v2747_v24 = vmul.f32 0.01, %v2696_v36  ;;  %v2649_v26 = vpop.f32.mrf.mxu1 }
 0x3e4   :  { %v3016_v7 = vpop.f32.mrf.mxu3  ;;  %3183 = vmatmul.bf16.gmra.mxu0 %v3091_v11  ;;  %v2650_v58 = vadd.f32 %v6331_v0, %v2649_v26 }
 0x3e5   :  { %v2763_v56 = vsel %vm2731_vm10, %v2696_v36, %v2747_v24  ;;  %v3017_v2 = vadd.f32 %v6324_v50, %v3016_v7 }
 0x3e6   :  { %v2779_v23 = vpack.c.bf16 %v2763_v56, %v2763_v56 }
 0x3e7   :  { %v3063_v19 = vmul.f32 0.01, %v3017_v2  ;;  %vm3047_vm11 = vcmp.gt.f32.partialorder %v3017_v2, 0.0 }
 0x3e8   :  { %v2698_v52 = vpop.f32.mrf.mxu2  ;;  %v3627_v54 = vunpack.c.l.b16 %v2779_v23 }
 0x3e9   :  { %v2699_v40 = vadd.f32 %v2698_v52, %v2650_v58  ;;  %v3079_v27 = vsel %vm3047_vm11, %v3017_v2, %v3063_v19 }
 0x3ea   :  { %v3641_v46 = vpack.c.b16 %v3627_v54, %v3626_v22 }
 0x3eb   :  { %v2651_v1 = vpop.f32.mrf.mxu1  ;;  %v2748_v16 = vmul.f32 0.01, %v2699_v40  ;;  %vm2732_vm12 = vcmp.gt.f32.partialorder %v2699_v40, 0.0 }
 0x3ec   :  { %v3018_v32 = vpop.f32.mrf.mxu3  ;;  %3849 = vmatmul.bf16.gmra.mxu3 %v3641_v46  ;;  %v2652_v6 = vadd.f32 %v6331_v0, %v2651_v1 }
 0x3ed   :  { %v3019_v31 = vadd.f32 %v6324_v50, %v3018_v32  ;;  %v2764_v62 = vsel %vm2732_vm12, %v2699_v40, %v2748_v16  ;;  %v4969_v16 = vld [vmem:[#allocation14 + $0x30] sm:$0xff] }
 0x3ee   :  { %v2780_v35 = vpack.c.bf16 %v2764_v62, %v2764_v62  ;;  %3371 = vmatpush.bf16.msra.mxu1 %v4969_v16 }
 0x3ef   :  { %vm3048_vm13 = vcmp.gt.f32.partialorder %v3019_v31, 0.0  ;;  %v3064_v48 = vmul.f32 0.01, %v3019_v31 }
 0x3f0   :  { %v2700_v29 = vpop.f32.mrf.mxu2  ;;  %v3628_v44 = vunpack.c.l.b16 %v2780_v35 }
 0x3f1   :  { %v2701_v42 = vadd.f32 %v2700_v29, %v2652_v6  ;;  %v3080_v39 = vsel %vm3048_vm13, %v3019_v31, %v3064_v48 }
 0x3f2   :  { %v3092_v28 = vpack.c.bf16 %v3080_v39, %v3079_v27 }
 0x3f3   :  { %vm2733_vm14 = vcmp.gt.f32.partialorder %v2701_v42, 0.0  ;;  %v2749_v30 = vmul.f32 0.01, %v2701_v42  ;;  %v2654_v57 = vpop.f32.mrf.mxu1 }
 0x3f4   :  { %v3021_v9 = vpop.f32.mrf.mxu3  ;;  %3188 = vmatmul.bf16.gmra.mxu0 %v3092_v28  ;;  %v2655_v38 = vadd.f32 %v6331_v0, %v2654_v57 }
 0x3f5   :  { %v2765_v61 = vsel %vm2733_vm14, %v2701_v42, %v2749_v30  ;;  %v3022_v21 = vadd.f32 %v6324_v50, %v3021_v9 }
 0x3f6   :  { %v2781_v60 = vpack.c.bf16 %v2765_v61, %v2765_v61 }
 0x3f7   :  { %v3065_v25 = vmul.f32 0.01, %v3022_v21  ;;  %vm3049_vm15 = vcmp.gt.f32.partialorder %v3022_v21, 0.0 }
 0x3f8   :  { %v2703_v3 = vpop.f32.mrf.mxu2  ;;  %v3629_v14 = vunpack.c.l.b16 %v2781_v60 }
 0x3f9   :  { %v2704_v4 = vadd.f32 %v2703_v3, %v2655_v38  ;;  %v3081_v7 = vsel %vm3049_vm15, %v3022_v21, %v3065_v25 }
 0x3fa   :  { %v3642_v33 = vpack.c.b16 %v3629_v14, %v3628_v44 }
 0x3fb   :  { %v2656_v63 = vpop.f32.mrf.mxu1  ;;  %v2750_v36 = vmul.f32 0.01, %v2704_v4  ;;  %vm2734_vm0 = vcmp.gt.f32.partialorder %v2704_v4, 0.0 }
 0x3fc   :  { %v3023_v47 = vpop.f32.mrf.mxu3  ;;  %3854 = vmatmul.bf16.gmra.mxu3 %v3642_v33  ;;  %v2657_v12 = vadd.f32 %v6331_v0, %v2656_v63 }
 0x3fd   :  { %v3024_v17 = vadd.f32 %v6324_v50, %v3023_v47  ;;  %v2766_v26 = vsel %vm2734_vm0, %v2704_v4, %v2750_v36  ;;  %v4968_v36 = vld [vmem:[#allocation14 + $0x28] sm:$0xff] }
 0x3fe   :  { %v2782_v52 = vpack.c.bf16 %v2766_v26, %v2766_v26  ;;  %3372 = vmatpush.bf16.msra.mxu1 %v4968_v36 }
 0x3ff   :  { %vm3050_vm1 = vcmp.gt.f32.partialorder %v3024_v17, 0.0  ;;  %v3066_v11 = vmul.f32 0.01, %v3024_v17 }
 0x400   :  { %v2705_v24 = vpop.f32.mrf.mxu2  ;;  %v3630_v1 = vunpack.c.l.b16 %v2782_v52  ;;  %v4967_v52 = vld [vmem:[#allocation14 + $0x20] sm:$0xff] }
 0x401   :  { %v2706_v15 = vadd.f32 %v2705_v24, %v2657_v12  ;;  %v3082_v56 = vsel %vm3050_vm1, %v3024_v17, %v3066_v11 }
 0x402   :  { %v3093_v23 = vpack.c.bf16 %v3082_v56, %v3081_v7  ;;  %3373 = vmatpush.bf16.msra.mxu1 %v4967_v52 }
 0x403   :  { %vm2735_vm2 = vcmp.gt.f32.partialorder %v2706_v15, 0.0  ;;  %v2751_v58 = vmul.f32 0.01, %v2706_v15  ;;  %v2659_v22 = vpop.f32.mrf.mxu1 }
 0x404   :  { %v3026_v54 = vpop.f32.mrf.mxu3  ;;  %3193 = vmatmul.bf16.gmra.mxu0 %v3093_v23  ;;  %v2660_v46 = vadd.f32 %v6331_v0, %v2659_v22 }
 0x405   :  { %v2767_v2 = vsel %vm2735_vm2, %v2706_v15, %v2751_v58  ;;  %v3027_v31 = vadd.f32 %v6324_v50, %v3026_v54 }
 0x406   :  { %v2783_v40 = vpack.c.bf16 %v2767_v2, %v2767_v2 }
 0x407   :  { %v3067_v42 = vmul.f32 0.01, %v3027_v31  ;;  %vm3051_vm3 = vcmp.gt.f32.partialorder %v3027_v31, 0.0 }
 0x408   :  { %v2708_v32 = vpop.f32.mrf.mxu2  ;;  %v3631_v19 = vunpack.c.l.b16 %v2783_v40 }
 0x409   :  { %v2709_v6 = vadd.f32 %v2708_v32, %v2660_v46  ;;  %v3083_v61 = vsel %vm3051_vm3, %v3027_v31, %v3067_v42 }
 0x40a   :  { %v3643_v48 = vpack.c.b16 %v3631_v19, %v3630_v1 }
 0x40b   :  { %v2661_v29 = vpop.f32.mrf.mxu1  ;;  %v2752_v27 = vmul.f32 0.01, %v2709_v6  ;;  %vm2736_vm4 = vcmp.gt.f32.partialorder %v2709_v6, 0.0 }
 0x40c   :  { %v3028_v62 = vpop.f32.mrf.mxu3  ;;  %3859 = vmatmul.bf16.gmra.mxu3 %v3643_v48  ;;  %v2662_v28 = vadd.f32 %v6331_v0, %v2661_v29 }
 0x40d   :  { %v3029_v39 = vadd.f32 %v6324_v50, %v3028_v62  ;;  %v2768_v35 = vsel %vm2736_vm4, %v2709_v6, %v2752_v27  ;;  %v4966_v6 = vld [vmem:[#allocation14 + $0x18] sm:$0xff] }
 0x40e   :  { %v2784_v14 = vpack.c.bf16 %v2768_v35, %v2768_v35  ;;  %3374 = vmatpush.bf16.msra.mxu1 %v4966_v6 }
 0x40f   :  { %vm3052_vm5 = vcmp.gt.f32.partialorder %v3029_v39, 0.0  ;;  %v3068_v30 = vmul.f32 0.01, %v3029_v39 }
 0x410   :  { %v2710_v57 = vpop.f32.mrf.mxu2  ;;  %v3632_v63 = vunpack.c.l.b16 %v2784_v14 }
 0x411   :  { %v2711_v9 = vadd.f32 %v2710_v57, %v2662_v28  ;;  %v3084_v60 = vsel %vm3052_vm5, %v3029_v39, %v3068_v30  ;;  %v4965_v28 = vld [vmem:[#allocation14 + $0x10] sm:$0xff] }
 0x412   :  { %v3094_v38 = vpack.c.bf16 %v3084_v60, %v3083_v61  ;;  %3375 = vmatpush.bf16.msra.mxu1 %v4965_v28  ;;  %v4964_v60 = vld [vmem:[#allocation14 + $0x8] sm:$0xff] }
 0x413   :  { %vm2737_vm6 = vcmp.gt.f32.partialorder %v2711_v9, 0.0  ;;  %v2753_v44 = vmul.f32 0.01, %v2711_v9  ;;  %v2664_v3 = vpop.f32.mrf.mxu1 }
 0x414   :  { %v3031_v43 = vpop.f32.mrf.mxu3  ;;  %3198 = vmatmul.bf16.gmra.mxu0 %v3094_v38  ;;  %v2665_v33 = vadd.f32 %v6331_v0, %v2664_v3 }
 0x415   :  { %v2769_v21 = vsel %vm2737_vm6, %v2711_v9, %v2753_v44  ;;  %v3032_v17 = vadd.f32 %v6324_v50, %v3031_v43 }
 0x416   :  { %v2785_v4 = vpack.c.bf16 %v2769_v21, %v2769_v21  ;;  %3376 = vmatpush.bf16.msra.mxu1 %v4964_v60 }
 0x417   :  { %v3069_v15 = vmul.f32 0.01, %v3032_v17  ;;  %vm3053_vm7 = vcmp.gt.f32.partialorder %v3032_v17, 0.0 }
 0x418   :  { %v3633_v47 = vunpack.c.l.b16 %v2785_v4  ;;  %v2713_v25 = vpop.f32.mrf.mxu2  ;;  %v4963_v4 = vld [vmem:[#allocation14] sm:$0xff] }
 0x419   :  { %v2714_v12 = vadd.f32 %v2713_v25, %v2665_v33  ;;  %v3085_v40 = vsel %vm3053_vm7, %v3032_v17, %v3069_v15 }
 0x41a   :  { %v3644_v11 = vpack.c.b16 %v3633_v47, %v3632_v63  ;;  %3377 = vmatpush.bf16.msra.mxu1 %v4963_v4 }
 0x41b   :  { %v2666_v24 = vpop.f32.mrf.mxu1  ;;  %v2754_v7 = vmul.f32 0.01, %v2714_v12  ;;  %vm2738_vm8 = vcmp.gt.f32.partialorder %v2714_v12, 0.0 }
 0x41c   :  { %v3033_v26 = vpop.f32.mrf.mxu3  ;;  %3864 = vmatmul.bf16.gmra.mxu3 %v3644_v11  ;;  %v2667_v23 = vadd.f32 %v6331_v0, %v2666_v24 }
 0x41d   :  { %v3034_v56 = vadd.f32 %v6324_v50, %v3033_v26  ;;  %v2770_v54 = vsel %vm2738_vm8, %v2714_v12, %v2754_v7 }
 0x41e   :  { %v2786_v16 = vpack.c.bf16 %v2770_v54, %v2770_v54 }
 0x41f   :  { %vm3054_vm9 = vcmp.gt.f32.partialorder %v3034_v56, 0.0  ;;  %v3070_v58 = vmul.f32 0.01, %v3034_v56 }
 0x420   :  { %v2715_v22 = vpop.f32.mrf.mxu2  ;;  %v3634_v42 = vunpack.c.l.b16 %v2786_v16 }
 0x421   :  { %v2716_v2 = vadd.f32 %v2715_v22, %v2667_v23  ;;  %v3086_v46 = vsel %vm3054_vm9, %v3034_v56, %v3070_v58 }
 0x422   :  { %v3095_v1 = vpack.c.bf16 %v3086_v46, %v3085_v40  ;;  %v6366_v40 = vld [vmem:[%s6501_s14] ss:$0 sm:$0xff] }
 0x423   :  { %vm2739_vm10 = vcmp.gt.f32.partialorder %v2716_v2, 0.0  ;;  %v2755_v32 = vmul.f32 0.01, %v2716_v2  ;;  %v2669_v19 = vpop.f32.mrf.mxu1 }
 0x424   :  { %v3036_v31 = vpop.f32.mrf.mxu3  ;;  %3203 = vmatmul.bf16.gmra.mxu0 %v3095_v1  ;;  %v2670_v62 = vadd.f32 %v6331_v0, %v2669_v19 }
 0x425   :  { %v2771_v48 = vsel %vm2739_vm10, %v2716_v2, %v2755_v32  ;;  %v3037_v30 = vadd.f32 %v6324_v50, %v3036_v31 }
 0x426   :  { %v2787_v29 = vpack.c.bf16 %v2771_v48, %v2771_v48 }
 0x427   :  { %v3071_v38 = vmul.f32 0.01, %v3037_v30  ;;  %vm3055_vm11 = vcmp.gt.f32.partialorder %v3037_v30, 0.0 }
 0x428   :  { %v3635_v27 = vunpack.c.l.b16 %v2787_v29  ;;  %v2718_v39 = vpop.f32.mrf.mxu2  ;;  %v6568_v29 = vld [vmem:[#allocation43_spill] sm:$0xff] }
 0x429   :  { %v2719_v57 = vadd.f32 %v2718_v39, %v2670_v62  ;;  %v3087_v47 = vsel %vm3055_vm11, %v3037_v30, %v3071_v38  ;;  %v3214_v62 = vunpack.c.l.bf16 %v6568_v29  ;;  %v3215_v30 = vunpack.c.l.bf16 %v5932_v20 }
 0x42a   :  { %v3645_v35 = vpack.c.b16 %v3635_v27, %v3634_v42 }
 0x42b   :  { %v2671_v9 = vpop.f32.mrf.mxu1  ;;  %v2756_v44 = vmul.f32 0.01, %v2719_v57  ;;  %vm2740_vm12 = vcmp.gt.f32.partialorder %v2719_v57, 0.0 }
 0x42c   :  { %v3038_v61 = vpop.f32.mrf.mxu3  ;;  %3869 = vmatmul.bf16.gmra.mxu3 %v3645_v35  ;;  %v2672_v14 = vadd.f32 %v6331_v0, %v2671_v9 }
 0x42d   :  { %v3039_v3 = vadd.f32 %v6324_v50, %v3038_v61  ;;  %v2772_v33 = vsel %vm2740_vm12, %v2719_v57, %v2756_v44 }
 0x42e   :  { %v2788_v11 = vpack.c.bf16 %v2772_v33, %v2772_v33  ;;  %v3217_v33 = vunpack.c.l.bf16 %v5947_v34  ;;  %v3219_v34 = vunpack.c.l.bf16 %v5963_v49  ;;  %v3221_v49 = vunpack.c.l.bf16 %v5985_v8 }
 0x42f   :  { %vm3056_vm13 = vcmp.gt.f32.partialorder %v3039_v3, 0.0  ;;  %v3072_v43 = vmul.f32 0.01, %v3039_v3 }
 0x430   :  { %v2720_v21 = vpop.f32.mrf.mxu2  ;;  %v3636_v15 = vunpack.c.l.b16 %v2788_v11 }
 0x431   :  { %v2721_v63 = vadd.f32 %v2720_v21, %v2672_v14  ;;  %v3088_v25 = vsel %vm3056_vm13, %v3039_v3, %v3072_v43  ;;  %v3216_v43 = vunpack.c.l.bf16 %v5944_v37  ;;  %v3218_v37 = vunpack.c.l.bf16 %v5960_v59 }
 0x432   :  { %v3096_v36 = vpack.c.bf16 %v3088_v25, %v3087_v47  ;;  %v3220_v59 = vunpack.c.l.bf16 %v5976_v5 }
 0x433   :  { %vm2741_vm14 = vcmp.gt.f32.partialorder %v2721_v63, 0.0  ;;  %v2757_v17 = vmul.f32 0.01, %v2721_v63  ;;  %v2674_v12 = vpop.f32.mrf.mxu1 }
 0x434   :  { %3208 = vmatmul.bf16.gmra.mxu0 %v3096_v36  ;;  %v2675_v26 = vadd.f32 %v6331_v0, %v2674_v12 }
 0x435   :  { %v2773_v50 = vsel %vm2741_vm14, %v2721_v63, %v2757_v17 }
 0x436   :  { %v2789_v24 = vpack.c.bf16 %v2773_v50, %v2773_v50 }
 0x438   :  { %v3637_v7 = vunpack.c.l.b16 %v2789_v24  ;;  %v2723_v56 = vpop.f32.mrf.mxu2 }
 0x439   :  { %v2724_v23 = vadd.f32 %v2723_v56, %v2675_v26 }
 0x43a   :  { %v3646_v58 = vpack.c.b16 %v3637_v7, %v3636_v15 }
 0x43b   :  { %v2676_v22 = vpop.f32.mrf.mxu1  ;;  %v2758_v52 = vmul.f32 0.01, %v2724_v23  ;;  %vm2742_vm15 = vcmp.gt.f32.partialorder %v2724_v23, 0.0 }
 0x43c   :  { %3874 = vmatmul.bf16.gmra.mxu3 %v3646_v58  ;;  %v2677_v54 = vadd.f32 %v6331_v0, %v2676_v22 }
 0x43d   :  { %v2774_v46 = vsel %vm2742_vm15, %v2724_v23, %v2758_v52 }
 0x43e   :  { %v2790_v16 = vpack.c.bf16 %v2774_v46, %v2774_v46 }
 0x440   :  { %v2725_v2 = vpop.f32.mrf.mxu2  ;;  %v3638_v42 = vunpack.c.l.b16 %v2790_v16 }
 0x441   :  { %v2726_v1 = vadd.f32 %v2725_v2, %v2677_v54  ;;  %v3174_v32 = vpop.f32.mrf.mxu0 }
 0x442   :  { %v3175_v31 = vadd.f32 %v6366_v40, %v3174_v32 }
 0x443   :  { %vm2743_vm0 = vcmp.gt.f32.partialorder %v2726_v1, 0.0  ;;  %v2759_v19 = vmul.f32 0.01, %v2726_v1 }
 0x444   :  { %v3230_v27 = vadd.f32 %v3214_v62, %v3175_v31 }
 0x445   :  { %v2775_v6 = vsel %vm2743_vm0, %v2726_v1, %v2759_v19 }
 0x446   :  { %v2791_v48 = vpack.c.bf16 %v2775_v6, %v2775_v6  ;;  %v3262_v35 = vmul.f32 0.01, %v3230_v27  ;;  %vm3246_vm1 = vcmp.gt.f32.partialorder %v3230_v27, 0.0  ;;  %v4978_v6 = vld [vmem:[#allocation15 + $0x38] sm:$0xff] }
 0x447   :  { %3495 = vmatpush.bf16.msrb.mxu2 %v4978_v6 }
 0x448   :  { %v3639_v0 = vunpack.c.l.b16 %v2791_v48  ;;  %v3278_v60 = vsel %vm3246_vm1, %v3230_v27, %v3262_v35 }
 0x449   :  { %v3176_v39 = vpop.f32.mrf.mxu0 }
 0x44a   :  { %v3177_v28 = vadd.f32 %v6366_v40, %v3176_v39  ;;  %v3647_v57 = vpack.c.b16 %v3639_v0, %v3638_v42  ;;  %v3222_v0 = vunpack.c.l.bf16 %v6243_v45 }
 0x44c   :  { %v3231_v9 = vadd.f32 %v3215_v30, %v3177_v28  ;;  %3879 = vmatmul.bf16.gmra.mxu3 %v3647_v57  ;;  %v3223_v28 = vunpack.c.l.bf16 %v6245_v13 }
 0x44e   :  { %vm3247_vm2 = vcmp.gt.f32.partialorder %v3231_v9, 0.0  ;;  %v3263_v61 = vmul.f32 0.01, %v3231_v9 }
 0x450   :  { %v3279_v38 = vsel %vm3247_vm2, %v3231_v9, %v3263_v61  ;;  %v4977_v9 = vld [vmem:[#allocation15 + $0x30] sm:$0xff] }
 0x451   :  { %v3294_v44 = vpack.c.bf16 %v3279_v38, %v3278_v60  ;;  %v3179_v3 = vpop.f32.mrf.mxu0  ;;  %3496 = vmatpush.bf16.msrb.mxu2 %v4977_v9 }
 0x452   :  { %v3180_v14 = vadd.f32 %v6366_v40, %v3179_v3  ;;  %v3224_v3 = vunpack.c.l.bf16 %v6262_v10 }
 0x453   :  { %3378 = vmatmul.bf16.vlgmr.msra.gmra.mxu1 %v3294_v44 }
 0x454   :  { %v3232_v21 = vadd.f32 %v3216_v43, %v3180_v14 }
 0x456   :  { %v3264_v63 = vmul.f32 0.01, %v3232_v21  ;;  %vm3248_vm3 = vcmp.gt.f32.partialorder %v3232_v21, 0.0 }
 0x458   :  { %v3280_v36 = vsel %vm3248_vm3, %v3232_v21, %v3264_v63  ;;  %v3225_v21 = vunpack.c.l.bf16 %v6264_v55  ;;  %v4976_v63 = vld [vmem:[#allocation15 + $0x28] sm:$0xff] }
 0x459   :  { %v3181_v4 = vpop.f32.mrf.mxu0  ;;  %3497 = vmatpush.bf16.msrb.mxu2 %v4976_v63 }
 0x45a   :  { %v3182_v20 = vadd.f32 %v6366_v40, %v3181_v4 }
 0x45c   :  { %v3233_v47 = vadd.f32 %v3217_v33, %v3182_v20 }
 0x45e   :  { %v3265_v25 = vmul.f32 0.01, %v3233_v47  ;;  %vm3249_vm4 = vcmp.gt.f32.partialorder %v3233_v47, 0.0 }
 0x460   :  { %v3281_v17 = vsel %vm3249_vm4, %v3233_v47, %v3265_v25 }
 0x461   :  { %v3184_v12 = vpop.f32.mrf.mxu0  ;;  %v3295_v11 = vpack.c.bf16 %v3281_v17, %v3280_v36 }
 0x462   :  { %v3185_v50 = vadd.f32 %v6366_v40, %v3184_v12  ;;  %v3226_v12 = vunpack.c.l.bf16 %v6281_v18  ;;  %v4973_v18 = vld [vmem:[#allocation15 + $0x10] sm:$0xff] }
 0x463   :  { %3383 = vmatmul.bf16.gmra.mxu1 %v3295_v11 }
 0x464   :  { %v3234_v24 = vadd.f32 %v3218_v37, %v3185_v50  ;;  %v4975_v50 = vld [vmem:[#allocation15 + $0x20] sm:$0xff] }
 0x465   :  { %3498 = vmatpush.bf16.msrb.mxu2 %v4975_v50 }
 0x466   :  { %v3266_v7 = vmul.f32 0.01, %v3234_v24  ;;  %vm3250_vm5 = vcmp.gt.f32.partialorder %v3234_v24, 0.0 }
 0x468   :  { %v3282_v58 = vsel %vm3250_vm5, %v3234_v24, %v3266_v7  ;;  %v3227_v24 = vunpack.c.l.bf16 %v6283_v41  ;;  %v3228_v41 = vunpack.c.l.bf16 %v6299_v51  ;;  %v5020_v51 = vld [vmem:[%s6503_s16] ss:$0 sm:$0xff] }
 0x469   :  { %v3186_v26 = vpop.f32.mrf.mxu0 }
 0x46a   :  { %v3187_v15 = vadd.f32 %v6366_v40, %v3186_v26  ;;  %v4974_v26 = vld [vmem:[#allocation15 + $0x18] sm:$0xff] }
 0x46b   :  { %3499 = vmatpush.bf16.msrb.mxu2 %v4974_v26  ;;  %v4990_v26 = vld [vmem:[#allocation17 + $0x58] sm:$0xff] }
 0x46c   :  { %v3235_v56 = vadd.f32 %v3219_v34, %v3187_v15 }
 0x46e   :  { %v3267_v23 = vmul.f32 0.01, %v3235_v56  ;;  %vm3251_vm6 = vcmp.gt.f32.partialorder %v3235_v56, 0.0 }
 0x46f   :  { %3500 = vmatpush.bf16.msrb.mxu2 %v4973_v18  ;;  %v6406_v18 = vld [vmem:[%s6505_s18] ss:$0 sm:$0xff] }
 0x470   :  { %v3283_v22 = vsel %vm3251_vm6, %v3235_v56, %v3267_v23 }
 0x471   :  { %v3189_v52 = vpop.f32.mrf.mxu0  ;;  %v3296_v54 = vpack.c.bf16 %v3283_v22, %v3282_v58 }
 0x472   :  { %v3190_v2 = vadd.f32 %v6366_v40, %v3189_v52  ;;  %v4972_v52 = vld [vmem:[#allocation15 + $0x8] sm:$0xff] }
 0x473   :  { %3388 = vmatmul.bf16.gmra.mxu1 %v3296_v54  ;;  %3501 = vmatpush.bf16.msrb.mxu2 %v4972_v52 }
 0x474   :  { %v3236_v46 = vadd.f32 %v3220_v59, %v3190_v2 }
 0x476   :  { %v3268_v19 = vmul.f32 0.01, %v3236_v46  ;;  %vm3252_vm7 = vcmp.gt.f32.partialorder %v3236_v46, 0.0 }
 0x478   :  { %v3284_v48 = vsel %vm3252_vm7, %v3236_v46, %v3268_v19 }
 0x479   :  { %v3191_v1 = vpop.f32.mrf.mxu0 }
 0x47a   :  { %v3192_v32 = vadd.f32 %v6366_v40, %v3191_v1  ;;  %v3229_v1 = vunpack.c.l.bf16 %v6301_v53 }
 0x47c   :  { %v3237_v16 = vadd.f32 %v3221_v49, %v3192_v32  ;;  %v4971_v32 = vld [vmem:[#allocation15] sm:$0xff] }
 0x47d   :  { %3502 = vmatpush.bf16.msrb.mxu2 %v4971_v32 }
 0x47e   :  { %v3269_v31 = vmul.f32 0.01, %v3237_v16  ;;  %vm3253_vm8 = vcmp.gt.f32.partialorder %v3237_v16, 0.0 }
 0x480   :  { %v3285_v29 = vsel %vm3253_vm8, %v3237_v16, %v3269_v31 }
 0x481   :  { %v3194_v62 = vpop.f32.mrf.mxu0  ;;  %v3297_v42 = vpack.c.bf16 %v3285_v29, %v3284_v48 }
 0x482   :  { %v3195_v5 = vadd.f32 %v6366_v40, %v3194_v62 }
 0x483   :  { %3393 = vmatmul.bf16.gmra.mxu1 %v3297_v42 }
 0x484   :  { %v3238_v27 = vadd.f32 %v3222_v0, %v3195_v5 }
 0x486   :  { %v3270_v30 = vmul.f32 0.01, %v3238_v27  ;;  %vm3254_vm9 = vcmp.gt.f32.partialorder %v3238_v27, 0.0 }
 0x488   :  { %v3286_v61 = vsel %vm3254_vm9, %v3238_v27, %v3270_v30 }
 0x489   :  { %v3196_v39 = vpop.f32.mrf.mxu0 }
 0x48a   :  { %v3197_v8 = vadd.f32 %v6366_v40, %v3196_v39 }
 0x48c   :  { %v3239_v57 = vadd.f32 %v3223_v28, %v3197_v8 }
 0x48e   :  { %vm3255_vm10 = vcmp.gt.f32.partialorder %v3239_v57, 0.0  ;;  %v3271_v35 = vmul.f32 0.01, %v3239_v57 }
 0x490   :  { %v3287_v60 = vsel %vm3255_vm10, %v3239_v57, %v3271_v35 }
 0x491   :  { %v3199_v38 = vpop.f32.mrf.mxu0  ;;  %v3298_v44 = vpack.c.bf16 %v3287_v60, %v3286_v61 }
 0x492   :  { %v3200_v45 = vadd.f32 %v6366_v40, %v3199_v38 }
 0x493   :  { %3398 = vmatmul.bf16.gmra.mxu1 %v3298_v44 }
 0x494   :  { %v3240_v14 = vadd.f32 %v3224_v3, %v3200_v45 }
 0x496   :  { %v3272_v4 = vmul.f32 0.01, %v3240_v14  ;;  %vm3256_vm11 = vcmp.gt.f32.partialorder %v3240_v14, 0.0 }
 0x498   :  { %v3288_v47 = vsel %vm3256_vm11, %v3240_v14, %v3272_v4  ;;  %v4994_v14 = vld [vmem:[#allocation17 + $0x78] sm:$0xff] }
 0x499   :  { %v3201_v43 = vpop.f32.mrf.mxu0  ;;  %3885 = vmatpush.bf16.msrb.mxu0 %v4994_v14 }
 0x49a   :  { %v3202_v13 = vadd.f32 %v6366_v40, %v3201_v43 }
 0x49c   :  { %v3241_v20 = vadd.f32 %v3225_v21, %v3202_v13 }
 0x49e   :  { %vm3257_vm12 = vcmp.gt.f32.partialorder %v3241_v20, 0.0  ;;  %v3273_v33 = vmul.f32 0.01, %v3241_v20 }
 0x4a0   :  { %v3289_v25 = vsel %vm3257_vm12, %v3241_v20, %v3273_v33  ;;  %v4993_v33 = vld [vmem:[#allocation17 + $0x70] sm:$0xff] }
 0x4a1   :  { %v3204_v36 = vpop.f32.mrf.mxu0  ;;  %v3299_v17 = vpack.c.bf16 %v3289_v25, %v3288_v47  ;;  %3886 = vmatpush.bf16.msrb.mxu0 %v4993_v33 }
 0x4a2   :  { %v3205_v10 = vadd.f32 %v6366_v40, %v3204_v36 }
 0x4a3   :  { %3403 = vmatmul.bf16.gmra.mxu1 %v3299_v17  ;;  %v4992_v17 = vld [vmem:[#allocation17 + $0x68] sm:$0xff] }
 0x4a4   :  { %v3242_v11 = vadd.f32 %v3226_v12, %v3205_v10 }
 0x4a5   :  { %3887 = vmatpush.bf16.msrb.mxu0 %v4992_v17 }
 0x4a6   :  { %v3274_v15 = vmul.f32 0.01, %v3242_v11  ;;  %vm3258_vm13 = vcmp.gt.f32.partialorder %v3242_v11, 0.0 }
 0x4a8   :  { %v3290_v56 = vsel %vm3258_vm13, %v3242_v11, %v3274_v15 }
 0x4a9   :  { %v3206_v37 = vpop.f32.mrf.mxu0 }
 0x4aa   :  { %v3207_v55 = vadd.f32 %v6366_v40, %v3206_v37 }
 0x4ac   :  { %v3243_v34 = vadd.f32 %v3227_v24, %v3207_v55  ;;  %v4991_v24 = vld [vmem:[#allocation17 + $0x60] sm:$0xff] }
 0x4ad   :  { %3888 = vmatpush.bf16.msrb.mxu0 %v4991_v24 }
 0x4ae   :  { %vm3259_vm14 = vcmp.gt.f32.partialorder %v3243_v34, 0.0  ;;  %v3275_v7 = vmul.f32 0.01, %v3243_v34 }
 0x4b0   :  { %v3291_v23 = vsel %vm3259_vm14, %v3243_v34, %v3275_v7 }
 0x4b1   :  { %v3209_v58 = vpop.f32.mrf.mxu0  ;;  %v3300_v22 = vpack.c.bf16 %v3291_v23, %v3290_v56  ;;  %3889 = vmatpush.bf16.msrb.mxu0 %v4990_v26  ;;  %v4989_v56 = vld [vmem:[#allocation17 + $0x50] sm:$0xff] }
 0x4b2   :  { %v3210_v54 = vadd.f32 %v6366_v40, %v3209_v58  ;;  %v4988_v58 = vld [vmem:[#allocation17 + $0x48] sm:$0xff] }
 0x4b3   :  { %3408 = vmatmul.bf16.gmra.mxu1 %v3300_v22  ;;  %v4987_v22 = vld [vmem:[#allocation17 + $0x40] sm:$0xff] }
 0x4b4   :  { %v3244_v2 = vadd.f32 %v3228_v41, %v3210_v54 }
 0x4b5   :  { %3890 = vmatpush.bf16.msrb.mxu0 %v4989_v56 }
 0x4b6   :  { %v3276_v49 = vmul.f32 0.01, %v3244_v2  ;;  %vm3260_vm15 = vcmp.gt.f32.partialorder %v3244_v2, 0.0 }
 0x4b8   :  { %v3292_v31 = vsel %vm3260_vm15, %v3244_v2, %v3276_v49 }
 0x4b9   :  { %v3211_v59 = vpop.f32.mrf.mxu0  ;;  %3891 = vmatpush.bf16.msrb.mxu0 %v4988_v58 }
 0x4ba   :  { %v3212_v46 = vadd.f32 %v6366_v40, %v3211_v59 }
 0x4bc   :  { %v3245_v19 = vadd.f32 %v3229_v1, %v3212_v46 }
 0x4bd   :  { %3892 = vmatpush.bf16.msrb.mxu0 %v4987_v22 }
 0x4be   :  { %vm3261_vm0 = vcmp.gt.f32.partialorder %v3245_v19, 0.0  ;;  %v3277_v16 = vmul.f32 0.01, %v3245_v19 }
 0x4c0   :  { %v3293_v6 = vsel %vm3261_vm0, %v3245_v19, %v3277_v16 }
 0x4c1   :  { %v3301_v48 = vpack.c.bf16 %v3293_v6, %v3292_v31 }
 0x4c3   :  { %3413 = vmatmul.bf16.gmra.mxu1 %v3301_v48 }
 0x4d0   :  { %v3379_v29 = vpop.f32.mrf.mxu1 }
 0x4d1   :  { %v3380_v40 = vadd.f32 %v5020_v51, %v3379_v29 }
 0x4d8   :  { %v3381_v62 = vpop.f32.mrf.mxu1 }
 0x4d9   :  { %v3382_v42 = vadd.f32 %v5020_v51, %v3381_v62 }
 0x4db   :  { %v3419_v53 = vpack.c.bf16 %v3382_v42, %v3380_v40 }
 0x4dd   :  { %3503 = vmatmul.bf16.vlgmr.msrb.gmra.mxu2 %v3419_v53 }
 0x4e0   :  { %v3384_v5 = vpop.f32.mrf.mxu1 }
 0x4e1   :  { %v3385_v27 = vadd.f32 %v5020_v51, %v3384_v5 }
 0x4e8   :  { %v3386_v0 = vpop.f32.mrf.mxu1 }
 0x4e9   :  { %v3387_v39 = vadd.f32 %v5020_v51, %v3386_v0 }
 0x4eb   :  { %v3420_v8 = vpack.c.bf16 %v3387_v39, %v3385_v27 }
 0x4ed   :  { %3508 = vmatmul.bf16.gmra.mxu2 %v3420_v8 }
 0x4f0   :  { %v3389_v28 = vpop.f32.mrf.mxu1 }
 0x4f1   :  { %v3390_v57 = vadd.f32 %v5020_v51, %v3389_v28 }
 0x4f8   :  { %v3391_v30 = vpop.f32.mrf.mxu1 }
 0x4f9   :  { %v3392_v35 = vadd.f32 %v5020_v51, %v3391_v30 }
 0x4fb   :  { %v3421_v9 = vpack.c.bf16 %v3392_v35, %v3390_v57 }
 0x4fd   :  { %3513 = vmatmul.bf16.gmra.mxu2 %v3421_v9 }
 0x500   :  { %v3394_v61 = vpop.f32.mrf.mxu1 }
 0x501   :  { %v3395_v38 = vadd.f32 %v5020_v51, %v3394_v61 }
 0x508   :  { %v3396_v60 = vpop.f32.mrf.mxu1 }
 0x509   :  { %v3397_v44 = vadd.f32 %v5020_v51, %v3396_v60 }
 0x50b   :  { %v3422_v45 = vpack.c.bf16 %v3397_v44, %v3395_v38 }
 0x50d   :  { %3518 = vmatmul.bf16.gmra.mxu2 %v3422_v45 }
 0x510   :  { %v3399_v3 = vpop.f32.mrf.mxu1 }
 0x511   :  { %v3400_v13 = vadd.f32 %v5020_v51, %v3399_v3 }
 0x518   :  { %v3401_v43 = vpop.f32.mrf.mxu1 }
 0x519   :  { %v3402_v21 = vadd.f32 %v5020_v51, %v3401_v43 }
 0x51b   :  { %v3423_v4 = vpack.c.bf16 %v3402_v21, %v3400_v13 }
 0x51d   :  { %3523 = vmatmul.bf16.gmra.mxu2 %v3423_v4 }
 0x520   :  { %v3404_v20 = vpop.f32.mrf.mxu1 }
 0x521   :  { %v3405_v47 = vadd.f32 %v5020_v51, %v3404_v20 }
 0x528   :  { %v3406_v63 = vpop.f32.mrf.mxu1 }
 0x529   :  { %v3407_v25 = vadd.f32 %v5020_v51, %v3406_v63 }
 0x52b   :  { %v3424_v36 = vpack.c.bf16 %v3407_v25, %v3405_v47 }
 0x52d   :  { %3528 = vmatmul.bf16.gmra.mxu2 %v3424_v36 }
 0x530   :  { %v3409_v10 = vpop.f32.mrf.mxu1 }
 0x531   :  { %v3410_v11 = vadd.f32 %v5020_v51, %v3409_v10 }
 0x538   :  { %v3411_v12 = vpop.f32.mrf.mxu1 }
 0x539   :  { %v3412_v50 = vadd.f32 %v5020_v51, %v3411_v12 }
 0x53b   :  { %v3425_v37 = vpack.c.bf16 %v3412_v50, %v3410_v11 }
 0x53d   :  { %3533 = vmatmul.bf16.gmra.mxu2 %v3425_v37 }
 0x540   :  { %v3414_v55 = vpop.f32.mrf.mxu1 }
 0x541   :  { %v3415_v34 = vadd.f32 %v5020_v51, %v3414_v55 }
 0x548   :  { %v3416_v15 = vpop.f32.mrf.mxu1 }
 0x549   :  { %v3417_v7 = vadd.f32 %v5020_v51, %v3416_v15 }
 0x54b   :  { %v3426_v23 = vpack.c.bf16 %v3417_v7, %v3415_v34 }
 0x54d   :  { %3538 = vmatmul.bf16.gmra.mxu2 %v3426_v23 }
 0x560   :  { %v3504_v52 = vpop.f32.mrf.mxu2 }
 0x561   :  { %v3505_v54 = vadd.f32 %v6406_v18, %v3504_v52 }
 0x563   :  { %v3560_v41 = vmul.f32 0.01, %v3505_v54  ;;  %vm3544_vm1 = vcmp.gt.f32.partialorder %v3505_v54, 0.0 }
 0x565   :  { %v3576_v59 = vsel %vm3544_vm1, %v3505_v54, %v3560_v41 }
 0x566   :  { %v3592_v32 = vpack.c.bf16 %v3576_v59, %v3576_v59 }
 0x568   :  { %v3506_v2 = vpop.f32.mrf.mxu2  ;;  %v3672_v16 = vunpack.c.l.b16 %v3592_v32 }
 0x569   :  { %v3507_v46 = vadd.f32 %v6406_v18, %v3506_v2 }
 0x56b   :  { %vm3545_vm2 = vcmp.gt.f32.partialorder %v3507_v46, 0.0  ;;  %v3561_v1 = vmul.f32 0.01, %v3507_v46 }
 0x56d   :  { %v3577_v49 = vsel %vm3545_vm2, %v3507_v46, %v3561_v1 }
 0x56e   :  { %v3593_v19 = vpack.c.bf16 %v3577_v49, %v3577_v49 }
 0x570   :  { %v3673_v31 = vunpack.c.l.b16 %v3593_v19  ;;  %v3509_v6 = vpop.f32.mrf.mxu2 }
 0x571   :  { %v3510_v48 = vadd.f32 %v6406_v18, %v3509_v6 }
 0x572   :  { %v3688_v29 = vpack.c.b16 %v3673_v31, %v3672_v16 }
 0x573   :  { %v3562_v51 = vmul.f32 0.01, %v3510_v48  ;;  %vm3546_vm3 = vcmp.gt.f32.partialorder %v3510_v48, 0.0 }
 0x574   :  { %3893 = vmatmul.bf16.vlgmr.msrb.gmra.mxu0 %v3688_v29 }
 0x575   :  { %v3578_v40 = vsel %vm3546_vm3, %v3510_v48, %v3562_v51 }
 0x576   :  { %v3594_v5 = vpack.c.bf16 %v3578_v40, %v3578_v40 }
 0x578   :  { %v3511_v62 = vpop.f32.mrf.mxu2  ;;  %v3674_v39 = vunpack.c.l.b16 %v3594_v5 }
 0x579   :  { %v3512_v42 = vadd.f32 %v6406_v18, %v3511_v62 }
 0x57b   :  { %vm3547_vm4 = vcmp.gt.f32.partialorder %v3512_v42, 0.0  ;;  %v3563_v53 = vmul.f32 0.01, %v3512_v42 }
 0x57d   :  { %v3579_v0 = vsel %vm3547_vm4, %v3512_v42, %v3563_v53 }
 0x57e   :  { %v3595_v27 = vpack.c.bf16 %v3579_v0, %v3579_v0 }
 0x580   :  { %v3675_v8 = vunpack.c.l.b16 %v3595_v27  ;;  %v3514_v28 = vpop.f32.mrf.mxu2 }
 0x581   :  { %v3515_v30 = vadd.f32 %v6406_v18, %v3514_v28  ;;  %v3845_v28 = vpop.f32.mrf.mxu3 }
 0x582   :  { %v3689_v57 = vpack.c.b16 %v3675_v8, %v3674_v39 }
 0x583   :  { %v3564_v35 = vmul.f32 0.01, %v3515_v30  ;;  %vm3548_vm5 = vcmp.gt.f32.partialorder %v3515_v30, 0.0 }
 0x584   :  { %3898 = vmatmul.bf16.gmra.mxu0 %v3689_v57 }
 0x585   :  { %v3580_v61 = vsel %vm3548_vm5, %v3515_v30, %v3564_v35 }
 0x586   :  { %v3596_v44 = vpack.c.bf16 %v3580_v61, %v3580_v61 }
 0x588   :  { %v3516_v9 = vpop.f32.mrf.mxu2  ;;  %v3676_v14 = vunpack.c.l.b16 %v3596_v44 }
 0x589   :  { %v3517_v60 = vadd.f32 %v6406_v18, %v3516_v9  ;;  %v3847_v44 = vpop.f32.mrf.mxu3 }
 0x58b   :  { %vm3549_vm6 = vcmp.gt.f32.partialorder %v3517_v60, 0.0  ;;  %v3565_v38 = vmul.f32 0.01, %v3517_v60 }
 0x58d   :  { %v3581_v45 = vsel %vm3549_vm6, %v3517_v60, %v3565_v38 }
 0x58e   :  { %v3597_v3 = vpack.c.bf16 %v3581_v45, %v3581_v45 }
 0x590   :  { %v3677_v43 = vunpack.c.l.b16 %v3597_v3  ;;  %v3519_v13 = vpop.f32.mrf.mxu2 }
 0x591   :  { %v3520_v21 = vadd.f32 %v6406_v18, %v3519_v13 }
 0x592   :  { %v3690_v4 = vpack.c.b16 %v3677_v43, %v3676_v14 }
 0x593   :  { %v3566_v20 = vmul.f32 0.01, %v3520_v21  ;;  %vm3550_vm7 = vcmp.gt.f32.partialorder %v3520_v21, 0.0 }
 0x594   :  { %3903 = vmatmul.bf16.gmra.mxu0 %v3690_v4 }
 0x595   :  { %v3582_v63 = vsel %vm3550_vm7, %v3520_v21, %v3566_v20 }
 0x596   :  { %v3598_v36 = vpack.c.bf16 %v3582_v63, %v3582_v63  ;;  %v3850_v63 = vpop.f32.mrf.mxu3 }
 0x598   :  { %v3521_v33 = vpop.f32.mrf.mxu2  ;;  %v3678_v12 = vunpack.c.l.b16 %v3598_v36 }
 0x599   :  { %v3522_v47 = vadd.f32 %v6406_v18, %v3521_v33 }
 0x59b   :  { %vm3551_vm8 = vcmp.gt.f32.partialorder %v3522_v47, 0.0  ;;  %v3567_v25 = vmul.f32 0.01, %v3522_v47 }
 0x59d   :  { %v3583_v17 = vsel %vm3551_vm8, %v3522_v47, %v3567_v25  ;;  %v6427_v47 = vld [vmem:[%s6507_s20] ss:$0 sm:$0xff] }
 0x59e   :  { %v3599_v10 = vpack.c.bf16 %v3583_v17, %v3583_v17  ;;  %v3852_v25 = vpop.f32.mrf.mxu3  ;;  %v3846_v36 = vadd.f32 %v6427_v47, %v3845_v28 }
 0x5a0   :  { %v3679_v11 = vunpack.c.l.b16 %v3599_v10  ;;  %v3524_v50 = vpop.f32.mrf.mxu2 }
 0x5a1   :  { %v3525_v37 = vadd.f32 %v6406_v18, %v3524_v50 }
 0x5a2   :  { %v3691_v55 = vpack.c.b16 %v3679_v11, %v3678_v12  ;;  %v3848_v12 = vadd.f32 %v6427_v47, %v3847_v44 }
 0x5a3   :  { %v3568_v24 = vmul.f32 0.01, %v3525_v37  ;;  %vm3552_vm9 = vcmp.gt.f32.partialorder %v3525_v37, 0.0 }
 0x5a4   :  { %3908 = vmatmul.bf16.gmra.mxu0 %v3691_v55 }
 0x5a5   :  { %v3584_v15 = vsel %vm3552_vm9, %v3525_v37, %v3568_v24 }
 0x5a6   :  { %v3600_v56 = vpack.c.bf16 %v3584_v15, %v3584_v15  ;;  %v3855_v10 = vpop.f32.mrf.mxu3 }
 0x5a8   :  { %v3526_v26 = vpop.f32.mrf.mxu2  ;;  %v3680_v22 = vunpack.c.l.b16 %v3600_v56 }
 0x5a9   :  { %v3527_v34 = vadd.f32 %v6406_v18, %v3526_v26 }
 0x5ab   :  { %vm3553_vm10 = vcmp.gt.f32.partialorder %v3527_v34, 0.0  ;;  %v3569_v7 = vmul.f32 0.01, %v3527_v34 }
 0x5ad   :  { %v3585_v23 = vsel %vm3553_vm10, %v3527_v34, %v3569_v7  ;;  %v3851_v34 = vadd.f32 %v6427_v47, %v3850_v63 }
 0x5ae   :  { %v3601_v58 = vpack.c.bf16 %v3585_v23, %v3585_v23  ;;  %v3857_v7 = vpop.f32.mrf.mxu3 }
 0x5b0   :  { %v3681_v52 = vunpack.c.l.b16 %v3601_v58  ;;  %v3529_v54 = vpop.f32.mrf.mxu2  ;;  %v3853_v58 = vadd.f32 %v6427_v47, %v3852_v25 }
 0x5b1   :  { %v3530_v41 = vadd.f32 %v6406_v18, %v3529_v54 }
 0x5b2   :  { %v3692_v2 = vpack.c.b16 %v3681_v52, %v3680_v22 }
 0x5b3   :  { %v3570_v59 = vmul.f32 0.01, %v3530_v41  ;;  %vm3554_vm11 = vcmp.gt.f32.partialorder %v3530_v41, 0.0 }
 0x5b4   :  { %3913 = vmatmul.bf16.gmra.mxu0 %v3692_v2 }
 0x5b5   :  { %v3586_v1 = vsel %vm3554_vm11, %v3530_v41, %v3570_v59 }
 0x5b6   :  { %v3602_v19 = vpack.c.bf16 %v3586_v1, %v3586_v1  ;;  %v3860_v41 = vpop.f32.mrf.mxu3 }
 0x5b8   :  { %v3531_v46 = vpop.f32.mrf.mxu2  ;;  %v3682_v6 = vunpack.c.l.b16 %v3602_v19 }
 0x5b9   :  { %v3532_v32 = vadd.f32 %v6406_v18, %v3531_v46 }
 0x5bb   :  { %vm3555_vm12 = vcmp.gt.f32.partialorder %v3532_v32, 0.0  ;;  %v3571_v49 = vmul.f32 0.01, %v3532_v32 }
 0x5bd   :  { %v3587_v16 = vsel %vm3555_vm12, %v3532_v32, %v3571_v49  ;;  %v3856_v32 = vadd.f32 %v6427_v47, %v3855_v10 }
 0x5be   :  { %v3603_v31 = vpack.c.bf16 %v3587_v16, %v3587_v16  ;;  %v3862_v16 = vpop.f32.mrf.mxu3 }
 0x5c0   :  { %v3683_v48 = vunpack.c.l.b16 %v3603_v31  ;;  %v3534_v29 = vpop.f32.mrf.mxu2  ;;  %v3858_v31 = vadd.f32 %v6427_v47, %v3857_v7 }
 0x5c1   :  { %v3535_v51 = vadd.f32 %v6406_v18, %v3534_v29 }
 0x5c2   :  { %v3693_v62 = vpack.c.b16 %v3683_v48, %v3682_v6 }
 0x5c3   :  { %v3572_v40 = vmul.f32 0.01, %v3535_v51  ;;  %vm3556_vm13 = vcmp.gt.f32.partialorder %v3535_v51, 0.0 }
 0x5c4   :  { %3918 = vmatmul.bf16.gmra.mxu0 %v3693_v62 }
 0x5c5   :  { %v3588_v53 = vsel %vm3556_vm13, %v3535_v51, %v3572_v40 }
 0x5c6   :  { %v3604_v27 = vpack.c.bf16 %v3588_v53, %v3588_v53 }
 0x5c8   :  { %v3536_v42 = vpop.f32.mrf.mxu2  ;;  %v3684_v30 = vunpack.c.l.b16 %v3604_v27 }
 0x5c9   :  { %v3537_v5 = vadd.f32 %v6406_v18, %v3536_v42  ;;  %v3865_v42 = vpop.f32.mrf.mxu3 }
 0x5cb   :  { %vm3557_vm14 = vcmp.gt.f32.partialorder %v3537_v5, 0.0  ;;  %v3573_v0 = vmul.f32 0.01, %v3537_v5 }
 0x5cd   :  { %v3589_v39 = vsel %vm3557_vm14, %v3537_v5, %v3573_v0  ;;  %v3861_v5 = vadd.f32 %v6427_v47, %v3860_v41 }
 0x5ce   :  { %v3605_v8 = vpack.c.bf16 %v3589_v39, %v3589_v39  ;;  %v3863_v39 = vadd.f32 %v6427_v47, %v3862_v16 }
 0x5d0   :  { %v3685_v57 = vunpack.c.l.b16 %v3605_v8  ;;  %v3539_v35 = vpop.f32.mrf.mxu2 }
 0x5d1   :  { %v3540_v9 = vadd.f32 %v6406_v18, %v3539_v35  ;;  %v3867_v8 = vpop.f32.mrf.mxu3 }
 0x5d2   :  { %v3694_v61 = vpack.c.b16 %v3685_v57, %v3684_v30 }
 0x5d3   :  { %v3574_v60 = vmul.f32 0.01, %v3540_v9  ;;  %vm3558_vm15 = vcmp.gt.f32.partialorder %v3540_v9, 0.0 }
 0x5d4   :  { %3923 = vmatmul.bf16.gmra.mxu0 %v3694_v61 }
 0x5d5   :  { %v3590_v45 = vsel %vm3558_vm15, %v3540_v9, %v3574_v60 }
 0x5d6   :  { %v3606_v43 = vpack.c.bf16 %v3590_v45, %v3590_v45 }
 0x5d8   :  { %v3541_v38 = vpop.f32.mrf.mxu2  ;;  %v3686_v4 = vunpack.c.l.b16 %v3606_v43 }
 0x5d9   :  { %v3542_v3 = vadd.f32 %v6406_v18, %v3541_v38  ;;  %v3866_v38 = vadd.f32 %v6427_v47, %v3865_v42 }
 0x5db   :  { %vm3559_vm0 = vcmp.gt.f32.partialorder %v3542_v3, 0.0  ;;  %v3575_v14 = vmul.f32 0.01, %v3542_v3 }
 0x5dd   :  { %v3591_v13 = vsel %vm3559_vm0, %v3542_v3, %v3575_v14  ;;  %v3870_v3 = vpop.f32.mrf.mxu3  ;;  %v3868_v14 = vadd.f32 %v6427_v47, %v3867_v8 }
 0x5de   :  { %v3607_v21 = vpack.c.bf16 %v3591_v13, %v3591_v13 }
 0x5e0   :  { %v3687_v20 = vunpack.c.l.b16 %v3607_v21 }
 0x5e2   :  { %v3695_v33 = vpack.c.b16 %v3687_v20, %v3686_v4 }
 0x5e4   :  { %3928 = vmatmul.bf16.gmra.mxu0 %v3695_v33 }
 0x5e5   :  { %v3872_v20 = vpop.f32.mrf.mxu3 }
 0x5f1   :  { %v3894_v17 = vpop.f32.mrf.mxu0 }
 0x5f2   :  { %v3895_v18 = vadd.f32 %v3894_v17, %v3846_v36  ;;  %v3875_v17 = vpop.f32.mrf.mxu3 }
 0x5f4   :  { %v3950_v50 = vmul.f32 0.01, %v3895_v18  ;;  %vm3934_vm1 = vcmp.gt.f32.partialorder %v3895_v18, 0.0 }
 0x5f6   :  { %v6431_v24 = vsel %vm3934_vm1, %v3895_v18, %v3950_v50 }
 0x5f9   :  { %v3896_v11 = vpop.f32.mrf.mxu0 }
 0x5fa   :  { %v3897_v37 = vadd.f32 %v3896_v11, %v3848_v12  ;;  %v3877_v10 = vpop.f32.mrf.mxu3 }
 0x5fc   :  { %vm3935_vm2 = vcmp.gt.f32.partialorder %v3897_v37, 0.0  ;;  %v3951_v55 = vmul.f32 0.01, %v3897_v37 }
 0x5fe   :  { %v6433_v26 = vsel %vm3935_vm2, %v3897_v37, %v3951_v55 }
 0x5ff   :  { %v3982_v15 = vpack.c.bf16 %v6433_v26, %v6431_v24 }
 0x601   :  { %v3899_v56 = vpop.f32.mrf.mxu0 }
 0x602   :  { %v3900_v23 = vadd.f32 %v3899_v56, %v3851_v34  ;;  %v3880_v50 = vpop.f32.mrf.mxu3 }
 0x603   :  { %v3881_v55 = vadd.f32 %v6427_v47, %v3880_v50 }
 0x604   :  { %v3952_v52 = vmul.f32 0.01, %v3900_v23  ;;  %vm3936_vm3 = vcmp.gt.f32.partialorder %v3900_v23, 0.0 }
 0x606   :  { %v6439_v59 = vsel %vm3936_vm3, %v3900_v23, %v3952_v52 }
 0x609   :  { %v3901_v22 = vpop.f32.mrf.mxu0 }
 0x60a   :  { %v3902_v54 = vadd.f32 %v3901_v22, %v3853_v58  ;;  %v3882_v34 = vpop.f32.mrf.mxu3  ;;  %v3878_v58 = vadd.f32 %v6427_v47, %v3877_v10 }
 0x60b   :  { %v3883_v56 = vadd.f32 %v6427_v47, %v3882_v34 }
 0x60c   :  { %vm3937_vm4 = vcmp.gt.f32.partialorder %v3902_v54, 0.0  ;;  %v3953_v2 = vmul.f32 0.01, %v3902_v54 }
 0x60e   :  { %v6441_v46 = vsel %vm3937_vm4, %v3902_v54, %v3953_v2  ;;  %v3876_v54 = vadd.f32 %v6427_v47, %v3875_v17 }
 0x60f   :  { %v3983_v1 = vpack.c.bf16 %v6441_v46, %v6439_v59 }
 0x611   :  { %v3904_v49 = vpop.f32.mrf.mxu0 }
 0x612   :  { %v3905_v19 = vadd.f32 %v3904_v49, %v3856_v32 }
 0x614   :  { %v3954_v48 = vmul.f32 0.01, %v3905_v19  ;;  %vm3938_vm5 = vcmp.gt.f32.partialorder %v3905_v19, 0.0 }
 0x616   :  { %v6447_v62 = vsel %vm3938_vm5, %v3905_v19, %v3954_v48 }
 0x619   :  { %v3906_v6 = vpop.f32.mrf.mxu0 }
 0x61a   :  { %v3907_v29 = vadd.f32 %v3906_v6, %v3858_v31  ;;  %v3873_v6 = vadd.f32 %v6427_v47, %v3872_v20 }
 0x61c   :  { %vm3939_vm6 = vcmp.gt.f32.partialorder %v3907_v29, 0.0  ;;  %v3955_v51 = vmul.f32 0.01, %v3907_v29 }
 0x61e   :  { %v6449_v40 = vsel %vm3939_vm6, %v3907_v29, %v3955_v51  ;;  %v3871_v29 = vadd.f32 %v6427_v47, %v3870_v3  ;;  %v5288_v47 = vmov 0  }
 0x61f   :  { %v3984_v53 = vpack.c.bf16 %v6449_v40, %v6447_v62  ;;  %5014 = vset.pattern.permute.xlu0 %v5288_v47 }
 0x621   :  { %v3909_v0 = vpop.f32.mrf.mxu0 }
 0x622   :  { %v3910_v27 = vadd.f32 %v3909_v0, %v3861_v5 }
 0x624   :  { %v3956_v30 = vmul.f32 0.01, %v3910_v27  ;;  %vm3940_vm7 = vcmp.gt.f32.partialorder %v3910_v27, 0.0 }
 0x626   :  { %v6455_v9 = vsel %vm3940_vm7, %v3910_v27, %v3956_v30 }
 0x629   :  { %v3911_v28 = vpop.f32.mrf.mxu0 }
 0x62a   :  { %v3912_v57 = vadd.f32 %v3911_v28, %v3863_v39 }
 0x62c   :  { %vm3941_vm8 = vcmp.gt.f32.partialorder %v3912_v57, 0.0  ;;  %v3957_v35 = vmul.f32 0.01, %v3912_v57 }
 0x62e   :  { %v6457_v61 = vsel %vm3941_vm8, %v3912_v57, %v3957_v35  ;;  %v3991_v35 = vld [vmem:[#allocation2] sm:$0x1] }
 0x62f   :  { %v3985_v60 = vpack.c.bf16 %v6457_v61, %v6455_v9  ;;  %3994 = vperm.xlu0 %5014, %v3991_v35   ;;  %v3990_v9 = vld [vmem:[%s6508_s21] sm:$0x1] }
 0x631   :  { %v3914_v44 = vpop.f32.mrf.mxu0 }
 0x632   :  { %v3915_v45 = vadd.f32 %v3914_v44, %v3866_v38 }
 0x634   :  { %v3958_v13 = vmul.f32 0.01, %v3915_v45  ;;  %vm3942_vm9 = vcmp.gt.f32.partialorder %v3915_v45, 0.0 }
 0x636   :  { %v3974_v33 = vsel %vm3942_vm9, %v3915_v45, %v3958_v13 }
 0x639   :  { %v3916_v43 = vpop.f32.mrf.mxu0 }
 0x63a   :  { %v3917_v21 = vadd.f32 %v3916_v43, %v3868_v14 }
 0x63c   :  { %vm3943_vm10 = vcmp.gt.f32.partialorder %v3917_v21, 0.0  ;;  %v3959_v4 = vmul.f32 0.01, %v3917_v21 }
 0x63e   :  { %v3975_v63 = vsel %vm3943_vm10, %v3917_v21, %v3959_v4 }
 0x63f   :  { %v3986_v25 = vpack.c.bf16 %v3975_v63, %v3974_v33 }
 0x641   :  { %v3919_v36 = vpop.f32.mrf.mxu0 }
 0x642   :  { %v3920_v5 = vadd.f32 %v3919_v36, %v3871_v29 }
 0x644   :  { %v3960_v8 = vmul.f32 0.01, %v3920_v5  ;;  %vm3944_vm0 = vcmp.gt.f32.partialorder %v3920_v5, 0.0 }
 0x646   :  { %v3976_v30 = vsel %vm3944_vm0, %v3920_v5, %v3960_v8 }
 0x649   :  { %v3921_v18 = vpop.f32.mrf.mxu0 }
 0x64a   :  { %v3922_v51 = vadd.f32 %v3921_v18, %v3873_v6 }
 0x64c   :  { %v3961_v39 = vmul.f32 0.01, %v3922_v51  ;;  %vm3945_vm15 = vcmp.gt.f32.partialorder %v3922_v51, 0.0 }
 0x64e   :  { %v3977_v28 = vsel %vm3945_vm15, %v3922_v51, %v3961_v39 }
 0x64f   :  { %v3987_v57 = vpack.c.bf16 %v3977_v28, %v3976_v30 }
 0x651   :  { %v3924_v12 = vpop.f32.mrf.mxu0 }
 0x652   :  { %v3925_v32 = vadd.f32 %v3924_v12, %v3876_v54 }
 0x654   :  { %v3962_v48 = vmul.f32 0.01, %v3925_v32  ;;  %vm3946_vm14 = vcmp.gt.f32.partialorder %v3925_v32, 0.0 }
 0x656   :  { %v3978_v0 = vsel %vm3946_vm14, %v3925_v32, %v3962_v48 }
 0x659   :  { %v3926_v11 = vpop.f32.mrf.mxu0 }
 0x65a   :  { %v3927_v41 = vadd.f32 %v3926_v11, %v3878_v58 }
 0x65c   :  { %v3963_v31 = vmul.f32 0.01, %v3927_v41  ;;  %vm3947_vm13 = vcmp.gt.f32.partialorder %v3927_v41, 0.0 }
 0x65e   :  { %v3979_v42 = vsel %vm3947_vm13, %v3927_v41, %v3963_v31 }
 0x65f   :  { %v3988_v27 = vpack.c.bf16 %v3979_v42, %v3978_v0 }
 0x661   :  { %v3929_v37 = vpop.f32.mrf.mxu0 }
 0x662   :  { %v3930_v7 = vadd.f32 %v3929_v37, %v3881_v55 }
 0x664   :  { %v3964_v22 = vmul.f32 0.01, %v3930_v7  ;;  %vm3948_vm11 = vcmp.gt.f32.partialorder %v3930_v7, 0.0 }
 0x666   :  { %v3980_v49 = vsel %vm3948_vm11, %v3930_v7, %v3964_v22 }
 0x669   :  { %v3931_v23 = vpop.f32.mrf.mxu0 }
 0x66a   :  { %v3932_v52 = vadd.f32 %v3931_v23, %v3883_v56 }
 0x66c   :  { %vm3949_vm12 = vcmp.gt.f32.partialorder %v3932_v52, 0.0  ;;  %v3965_v2 = vmul.f32 0.01, %v3932_v52 }
 0x66e   :  { %v3981_v19 = vsel %vm3949_vm12, %v3932_v52, %v3965_v2 }
 0x66f   :  { %v3989_v16 = vpack.c.bf16 %v3981_v19, %v3980_v49 }
 0x671   :  { %3998 = vmatpush.bf16.xpose.msrb.mxu1 %v3989_v16 }
 0x679   :  { %3999 = vmatpush.bf16.xpose.msrb.mxu1 %v3988_v27 }
 0x681   :  { %4000 = vmatpush.bf16.xpose.msrb.mxu1 %v3987_v57 }
 0x689   :  { %4001 = vmatpush.bf16.xpose.msrb.mxu1 %v3986_v25 }
 0x691   :  { %4002 = vmatpush.bf16.xpose.msrb.mxu1 %v3985_v60 }
 0x699   :  { %4003 = vmatpush.bf16.xpose.msrb.mxu1 %v3984_v53 }
 0x6a1   :  { %4004 = vmatpush.bf16.xpose.msrb.mxu1 %v3983_v1  ;;  %v3995_v61 = vpop.permute.xlu0 %3994 }
 0x6a2   :  { %v3997_v60 = vperm.slane %v3995_v61, 0 }
 0x6a9   :  { %4005 = vmatpush.bf16.xpose.msrb.mxu1 %v3982_v15 }
 0x6b0   :  { %4006 = vmatmul.bf16.vlgmr.msrb.gmra.mxu1 %v3990_v9 }
 0x72d   :  { %v4007_v62 = vpop.f32.mrf.mxu1 }
 0x72e   :  { %v4008_v59 = vadd.f32 %v4007_v62, %v3997_v60 }
 0x730   :  { %4011 = vst [vmem:[#allocation18] sm:$0x1] %v4008_v59 }
 0x731   :  { %4022 = dma.vmem_to_hbm [thread:$0]  %s4018_s28, 16, %s4020_s5, [#allocation5]  }
 0x735   :  { %v4009_v24 = vpop.f32.mrf.mxu1 }
 0x736   :  { %5273 = dma.done.wait [#allocation5], 16  }
 0x737   :  { %5274 = vsyncadd [#allocation5], 4294967280 }
 0x738   :  { %4027 = vsyncpa [#allocation4], 1 }
 0x739   :  { %4028 = vsyncpa [#allocation7], 1 }
 0x73a   :  { %4029 = vsyncpa [#allocation10], 1 }
 0x73b   :  { %4030 = vsyncpa [#allocation13], 1 }
 0x73c   :  { %4031 = vsyncpa [#allocation16], 1 }
 0x73d   :  { %4032 = vsyncpa [#allocation5], 1 }

</bundles_post_ra>
